<compile_context>
chip_gen: v6e
topology: v6e:2x2x1
jax: 0.10.0
libtpu: 0.0.40
codegen_flags: <defaults>
</compile_context>

<pallas_src>
import functools

import jax
import jax.numpy as jnp
from jax import lax
from jax.experimental import pallas as pl
from jax.experimental.pallas import tpu as pltpu


# (Ci, Co, kernel, stride, pad)  -- stem is 'valid', body blocks are 'same' (pad=k//2)
_CONV_CFG = (
    # stem
    (1, 16, 11, 6, 0),
    (16, 16, 3, 2, 0),
    (16, 16, 3, 2, 0),
    # CNN_Block(16, 32)
    (16, 32, 3, 1, 1),
    (32, 32, 3, 1, 1),
    (32, 32, 2, 2, 1),
    # CNN_Block(32, 64)
    (32, 64, 3, 1, 1),
    (64, 64, 3, 1, 1),
    (64, 64, 2, 2, 1),
    # CNN_Block(64, 64)
    (64, 64, 3, 1, 1),
    (64, 64, 3, 1, 1),
    (64, 64, 2, 2, 1),
)


def _output_lengths(L):
    """Per-layer output lengths for input length L (PyTorch Conv1d formula)."""
    louts = []
    for (_, _, k, s, p) in _CONV_CFG:
        L = (L + 2 * p - k) // s + 1
        louts.append(L)
    return tuple(louts)


# ----------------------------------------------------------------------------
# The single fused kernel (one grid step == one batch element)
# ----------------------------------------------------------------------------
def _fused_forward_kernel(cfg, louts, x_ref, *args):
    n_conv = len(cfg)
    conv_ws = args[0:2 * n_conv:2]                 # 12x (k, Ci, Co)
    conv_bs = args[1:2 * n_conv:2]                 # 12x (1, Co)
    fc1w_ref, fc1b_ref, fc2wT_ref, fc2b_ref = args[2 * n_conv:2 * n_conv + 4]
    o_ref = args[2 * n_conv + 4]                   # (1, 1, 1) output block
    bufs = args[2 * n_conv + 5:]                   # VMEM scratch: input + 12 layer buffers
    xin_buf, layer_bufs = bufs[0], bufs[1:]

    # Stage this batch element's input (channels-last (L, 1)) into VMEM scratch.
    xin_buf[...] = x_ref[0]

    src = xin_buf
    for i, (Ci, Co, k, s, p) in enumerate(cfg):
        Lout = louts[i]
        w_ref = conv_ws[i]
        b_ref = conv_bs[i]

        # Conv1d as k matmuls over strided sublane slices of the padded input.
        acc = jnp.zeros((Lout, Co), jnp.float32)
        for t in range(k):
            idx = pl.ds(t, Lout, s) if s > 1 else pl.ds(t, Lout)
            xt = src[idx, :]                        # (Lout, Ci) strided VMEM read
            wt = w_ref[t]                           # (Ci, Co)
            if Ci == 1:
                acc = acc + xt * wt                 # outer product via broadcast (K=1)
            else:
                acc = acc + jnp.dot(xt, wt, preferred_element_type=jnp.float32)
        act = jnp.maximum(acc + b_ref[...], 0.0)    # bias + ReLU

        # Write into the next layer's input buffer, already placed at its halo
        # offset; zero the halo rows so the next conv's padding is implicit.
        dst = layer_bufs[i]
        p_next = cfg[i + 1][4] if i + 1 < n_conv else 0
        if p_next > 0:
            zrow = jnp.zeros((p_next, Co), jnp.float32)
            dst[0:p_next, :] = zrow
            dst[p_next + Lout:p_next + Lout + p_next, :] = zrow
        dst[p_next:p_next + Lout, :] = act
        src = dst

    # Head: AdaptiveAvgPool1d(1) -> Linear(64,16) -> Sigmoid -> Linear(16,1)
    #       -> ReLU -> clamp(max=1).  Pool is an explicit (tiny) sublane sum.
    Lf = louts[-1]
    pooled = src[0:1, :]
    for r in range(1, Lf):
        pooled = pooled + src[r:r + 1, :]
    pooled = pooled * (1.0 / Lf)                    # (1, 64)

    h = jnp.dot(pooled, fc1w_ref[...], preferred_element_type=jnp.float32)
    h = jax.nn.sigmoid(h + fc1b_ref[...])           # (1, 16)
    z = jnp.sum(h * fc2wT_ref[...], axis=1, keepdims=True) + fc2b_ref[...]
    z = jnp.minimum(jnp.maximum(z, 0.0), 1.0)       # ReLU + clamp(max=1)
    o_ref[0] = z.astype(o_ref.dtype)


def fused_forward(params, x_nlc):
    """x_nlc: (N, L, 1) channels-last input. Returns (N, 1)."""
    N, L, Ci_in = x_nlc.shape
    assert Ci_in == 1
    n_conv = len(_CONV_CFG)
    louts = _output_lengths(L)

    # Flat input list + BlockSpecs (all weight blocks are the full arrays).
    inputs = [x_nlc]
    in_specs = [pl.BlockSpec((1, L, 1), lambda n: (n, 0, 0))]
    for (w, b) in params["convs"]:
        k, Ci, Co = w.shape
        inputs += [w, b]
        in_specs += [pl.BlockSpec((k, Ci, Co), lambda n: (0, 0, 0)),
                     pl.BlockSpec((1, Co), lambda n: (0, 0))]
    fc1w, fc1b = params["fc1"]
    fc2wT, fc2b = params["fc2"]
    inputs += [fc1w, fc1b, fc2wT, fc2b]
    in_specs += [pl.BlockSpec(fc1w.shape, lambda n: (0, 0)),
                 pl.BlockSpec(fc1b.shape, lambda n: (0, 0)),
                 pl.BlockSpec(fc2wT.shape, lambda n: (0, 0)),
                 pl.BlockSpec(fc2b.shape, lambda n: (0, 0))]

    # VMEM scratch: staged input + one buffer per layer output (with halo rows
    # for the next layer's 'same' padding).  Total footprint is a few hundred KB.
    scratch = [pltpu.VMEM((L, 1), jnp.float32)]
    for i, (_, Co, _, _, _) in enumerate(_CONV_CFG):
        p_next = _CONV_CFG[i + 1][4] if i + 1 < n_conv else 0
        scratch.append(pltpu.VMEM((louts[i] + 2 * p_next, Co), jnp.float32))

    kern = functools.partial(_fused_forward_kernel, _CONV_CFG, louts)

    out = pl.pallas_call(
        kern,
        out_shape=jax.ShapeDtypeStruct((N, 1, 1), jnp.float32),
        grid=(N,),
        in_specs=in_specs,
        out_specs=pl.BlockSpec((1, 1, 1), lambda n: (n, 0, 0)),
        scratch_shapes=scratch,
        compiler_params=pltpu.CompilerParams(
            dimension_semantics=("parallel",)),   # lets v7x's 2 TCs split the batch
    )(*inputs)
    return out.reshape(N, 1)


# ----------------------------------------------------------------------------
# Parameter init (kaiming-normal conv weights, uniform biases/linears, as in spec)
# Conv weights are stored directly in kernel layout (k, Ci, Co); fc2 weight is
# stored pre-transposed as (1, 16).
# ----------------------------------------------------------------------------
def init_params(seed=0):
    key = jax.random.PRNGKey(seed)
    convs = []
    for (Ci, Co, k, _, _) in _CONV_CFG:
        key, kw, kb = jax.random.split(key, 3)
        fan_in = Ci * k
        w = jax.random.normal(kw, (k, Ci, Co), jnp.float32) * ((2.0 / fan_in) ** 0.5)
        bound = 1.0 / (fan_in ** 0.5)
        b = jax.random.uniform(kb, (1, Co), jnp.float32, -bound, bound)
        convs.append((w, b))
    key, k1w, k1b, k2w, k2b = jax.random.split(key, 5)
    b1 = 1.0 / (64.0 ** 0.5)
    b2 = 1.0 / (16.0 ** 0.5)
    fc1w = jax.random.uniform(k1w, (64, 16), jnp.float32, -b1, b1)
    fc1b = jax.random.uniform(k1b, (1, 16), jnp.float32, -b1, b1)
    fc2wT = jax.random.uniform(k2w, (1, 16), jnp.float32, -b2, b2)   # Linear(16,1) weight^T
    fc2b = jax.random.uniform(k2b, (1, 1), jnp.float32, -b2, b2)
    return {"convs": convs, "fc1": (fc1w, fc1b), "fc2": (fc2wT, fc2b)}


# ----------------------------------------------------------------------------
# Full forward (x is NCL = (N, 1, L), like PyTorch Conv1d)
# ----------------------------------------------------------------------------
@jax.jit
def model_forward(params, x):
    x_nlc = jnp.transpose(x, (0, 2, 1))   # (N, L, 1) channels-last
    return fused_forward(params, x_nlc)


# Pure-JAX reference (same math, no Pallas) for correctness checking.
def _reference_forward(params, x):
    y = jnp.transpose(x, (0, 2, 1))        # (N, L, 1)
    for (w, b), (Ci, Co, k, s, p) in zip(params["convs"], _CONV_CFG):
        N, L, _ = y.shape
        if p > 0:
            y = jnp.pad(y, ((0, 0), (p, p), (0, 0)))
        Lout = (L + 2 * p - k) // s + 1
        acc = jnp.zeros((N, Lout, Co), jnp.float32)
        for t in range(k):
            xt = y[:, t:t + (Lout - 1) * s + 1:s, :]
            acc = acc + jnp.einsum("nlc,cd->nld", xt, w[t],
                                   precision=lax.Precision.HIGHEST)
        y = jnp.maximum(acc + b, 0.0)
    pooled = jnp.mean(y, axis=1)                                   # (N, 64)
    fc1w, fc1b = params["fc1"]
    fc2wT, fc2b = params["fc2"]
    h = jax.nn.sigmoid(jnp.dot(pooled, fc1w,
                               precision=lax.Precision.HIGHEST) + fc1b)
    z = jnp.sum(h * fc2wT, axis=1, keepdims=True) + fc2b
    return jnp.minimum(jnp.maximum(z, 0.0), 1.0)


if __name__ == "__main__":
    params = init_params(seed=0)
    # Input: (batch=2, channels=1, length=256) — NCL, like PyTorch Conv1d.
    x = jax.random.normal(jax.random.PRNGKey(0), (2, 1, 256), jnp.float32)

    out = jax.block_until_ready(model_forward(params, x))
    assert out.shape == (2, 1)
    assert bool(jnp.all(out >= 0.0)) and bool(jnp.all(out <= 1.0))

    ref = _reference_forward(params, x)
    assert bool(jnp.allclose(out, ref, atol=1e-3, rtol=1e-2)), (out, ref)
    print("KERNEL_OK")
</pallas_src>

<mosaic_0001>
module attributes {stable_mosaic.version = 11 : i64} {
  func.func @_fused_forward_kernel(%arg0: i32, %arg1: memref<1x256x1xf32, #tpu.memory_space<vmem>>, %arg2: memref<11x1x16xf32, #tpu.memory_space<vmem>>, %arg3: memref<1x16xf32, #tpu.memory_space<vmem>>, %arg4: memref<3x16x16xf32, #tpu.memory_space<vmem>>, %arg5: memref<1x16xf32, #tpu.memory_space<vmem>>, %arg6: memref<3x16x16xf32, #tpu.memory_space<vmem>>, %arg7: memref<1x16xf32, #tpu.memory_space<vmem>>, %arg8: memref<3x16x32xf32, #tpu.memory_space<vmem>>, %arg9: memref<1x32xf32, #tpu.memory_space<vmem>>, %arg10: memref<3x32x32xf32, #tpu.memory_space<vmem>>, %arg11: memref<1x32xf32, #tpu.memory_space<vmem>>, %arg12: memref<2x32x32xf32, #tpu.memory_space<vmem>>, %arg13: memref<1x32xf32, #tpu.memory_space<vmem>>, %arg14: memref<3x32x64xf32, #tpu.memory_space<vmem>>, %arg15: memref<1x64xf32, #tpu.memory_space<vmem>>, %arg16: memref<3x64x64xf32, #tpu.memory_space<vmem>>, %arg17: memref<1x64xf32, #tpu.memory_space<vmem>>, %arg18: memref<2x64x64xf32, #tpu.memory_space<vmem>>, %arg19: memref<1x64xf32, #tpu.memory_space<vmem>>, %arg20: memref<3x64x64xf32, #tpu.memory_space<vmem>>, %arg21: memref<1x64xf32, #tpu.memory_space<vmem>>, %arg22: memref<3x64x64xf32, #tpu.memory_space<vmem>>, %arg23: memref<1x64xf32, #tpu.memory_space<vmem>>, %arg24: memref<2x64x64xf32, #tpu.memory_space<vmem>>, %arg25: memref<1x64xf32, #tpu.memory_space<vmem>>, %arg26: memref<64x16xf32, #tpu.memory_space<vmem>>, %arg27: memref<1x16xf32, #tpu.memory_space<vmem>>, %arg28: memref<1x16xf32, #tpu.memory_space<vmem>>, %arg29: memref<1x1xf32, #tpu.memory_space<vmem>>, %arg30: memref<1x1x1xf32, #tpu.memory_space<vmem>>, %arg31: memref<256x1xf32, #tpu.memory_space<vmem>>, %arg32: memref<41x16xf32, #tpu.memory_space<vmem>>, %arg33: memref<20x16xf32, #tpu.memory_space<vmem>>, %arg34: memref<11x16xf32, #tpu.memory_space<vmem>>, %arg35: memref<11x32xf32, #tpu.memory_space<vmem>>, %arg36: memref<11x32xf32, #tpu.memory_space<vmem>>, %arg37: memref<7x32xf32, #tpu.memory_space<vmem>>, %arg38: memref<7x64xf32, #tpu.memory_space<vmem>>, %arg39: memref<7x64xf32, #tpu.memory_space<vmem>>, %arg40: memref<5x64xf32, #tpu.memory_space<vmem>>, %arg41: memref<5x64xf32, #tpu.memory_space<vmem>>, %arg42: memref<5x64xf32, #tpu.memory_space<vmem>>, %arg43: memref<2x64xf32, #tpu.memory_space<vmem>>) attributes {dimension_semantics = [#tpu.dimension_semantics<parallel>], iteration_bounds = array<i64: 2>, scalar_prefetch = 0 : i64, scratch_operands = 13 : i64, tpu.core_type = #tpu.core_type<tc>, window_params = [{transform_indices = @transform_0, window_bounds = array<i64: 1, 256, 1>}, {pipeline_mode = #tpu.pipeline_mode<synchronous>, transform_indices = @transform_1, window_bounds = array<i64: 11, 1, 16>}, {pipeline_mode = #tpu.pipeline_mode<synchronous>, transform_indices = @transform_2, window_bounds = array<i64: 1, 16>}, {pipeline_mode = #tpu.pipeline_mode<synchronous>, transform_indices = @transform_3, window_bounds = array<i64: 3, 16, 16>}, {pipeline_mode = #tpu.pipeline_mode<synchronous>, transform_indices = @transform_4, window_bounds = array<i64: 1, 16>}, {pipeline_mode = #tpu.pipeline_mode<synchronous>, transform_indices = @transform_5, window_bounds = array<i64: 3, 16, 16>}, {pipeline_mode = #tpu.pipeline_mode<synchronous>, transform_indices = @transform_6, window_bounds = array<i64: 1, 16>}, {pipeline_mode = #tpu.pipeline_mode<synchronous>, transform_indices = @transform_7, window_bounds = array<i64: 3, 16, 32>}, {pipeline_mode = #tpu.pipeline_mode<synchronous>, transform_indices = @transform_8, window_bounds = array<i64: 1, 32>}, {pipeline_mode = #tpu.pipeline_mode<synchronous>, transform_indices = @transform_9, window_bounds = array<i64: 3, 32, 32>}, {pipeline_mode = #tpu.pipeline_mode<synchronous>, transform_indices = @transform_10, window_bounds = array<i64: 1, 32>}, {pipeline_mode = #tpu.pipeline_mode<synchronous>, transform_indices = @transform_11, window_bounds = array<i64: 2, 32, 32>}, {pipeline_mode = #tpu.pipeline_mode<synchronous>, transform_indices = @transform_12, window_bounds = array<i64: 1, 32>}, {pipeline_mode = #tpu.pipeline_mode<synchronous>, transform_indices = @transform_13, window_bounds = array<i64: 3, 32, 64>}, {pipeline_mode = #tpu.pipeline_mode<synchronous>, transform_indices = @transform_14, window_bounds = array<i64: 1, 64>}, {pipeline_mode = #tpu.pipeline_mode<synchronous>, transform_indices = @transform_15, window_bounds = array<i64: 3, 64, 64>}, {pipeline_mode = #tpu.pipeline_mode<synchronous>, transform_indices = @transform_16, window_bounds = array<i64: 1, 64>}, {pipeline_mode = #tpu.pipeline_mode<synchronous>, transform_indices = @transform_17, window_bounds = array<i64: 2, 64, 64>}, {pipeline_mode = #tpu.pipeline_mode<synchronous>, transform_indices = @transform_18, window_bounds = array<i64: 1, 64>}, {pipeline_mode = #tpu.pipeline_mode<synchronous>, transform_indices = @transform_19, window_bounds = array<i64: 3, 64, 64>}, {pipeline_mode = #tpu.pipeline_mode<synchronous>, transform_indices = @transform_20, window_bounds = array<i64: 1, 64>}, {pipeline_mode = #tpu.pipeline_mode<synchronous>, transform_indices = @transform_21, window_bounds = array<i64: 3, 64, 64>}, {pipeline_mode = #tpu.pipeline_mode<synchronous>, transform_indices = @transform_22, window_bounds = array<i64: 1, 64>}, {pipeline_mode = #tpu.pipeline_mode<synchronous>, transform_indices = @transform_23, window_bounds = array<i64: 2, 64, 64>}, {pipeline_mode = #tpu.pipeline_mode<synchronous>, transform_indices = @transform_24, window_bounds = array<i64: 1, 64>}, {pipeline_mode = #tpu.pipeline_mode<synchronous>, transform_indices = @transform_25, window_bounds = array<i64: 64, 16>}, {pipeline_mode = #tpu.pipeline_mode<synchronous>, transform_indices = @transform_26, window_bounds = array<i64: 1, 16>}, {pipeline_mode = #tpu.pipeline_mode<synchronous>, transform_indices = @transform_27, window_bounds = array<i64: 1, 16>}, {pipeline_mode = #tpu.pipeline_mode<synchronous>, transform_indices = @transform_28, window_bounds = array<i64: 1, 1>}, {transform_indices = @transform_29, window_bounds = array<i64: 1, 1, 1>}]} {
    %c0 = arith.constant 0 : index
    %c0_0 = arith.constant 0 : index
    %c0_1 = arith.constant 0 : index
    %0 = vector.load %arg1[%c0, %c0_0, %c0_1] : memref<1x256x1xf32, #tpu.memory_space<vmem>>, vector<1x256x1xf32>
    %1 = vector.shape_cast %0 : vector<1x256x1xf32> to vector<256x1xf32>
    %c0_2 = arith.constant 0 : index
    %c0_3 = arith.constant 0 : index
    %2 = vector.load %arg31[%c0_2, %c0_3] : memref<256x1xf32, #tpu.memory_space<vmem>>, vector<256x1xf32>
    tpu.vector_store %arg31[%c0_2, %c0_3], %1 {strides = array<i32>} : memref<256x1xf32, #tpu.memory_space<vmem>>, vector<256x1xf32>,
    %cst = arith.constant 0.000000e+00 : f32
    %3 = vector.broadcast %cst : f32 to vector<41x16xf32>
    %c0_4 = arith.constant 0 : index
    %c0_5 = arith.constant 0 : index
    %4 = tpu.strided_load %arg31[%c0_4, %c0_5] {strides = array<i32: 6, 1>} : memref<256x1xf32, #tpu.memory_space<vmem>>, vector<41x1xf32>
    %c0_6 = arith.constant 0 : index
    %c0_7 = arith.constant 0 : index
    %c0_8 = arith.constant 0 : index
    %5 = vector.load %arg2[%c0_6, %c0_7, %c0_8] : memref<11x1x16xf32, #tpu.memory_space<vmem>>, vector<1x1x16xf32>
    %6 = vector.shape_cast %5 : vector<1x1x16xf32> to vector<1x16xf32>
    %7 = vector.broadcast %4 : vector<41x1xf32> to vector<41x16xf32>
    %8 = vector.broadcast %6 : vector<1x16xf32> to vector<41x16xf32>
    %9 = arith.mulf %7, %8 : vector<41x16xf32>
    %10 = arith.addf %3, %9 : vector<41x16xf32>
    %c1 = arith.constant 1 : index
    %c0_9 = arith.constant 0 : index
    %11 = tpu.strided_load %arg31[%c1, %c0_9] {strides = array<i32: 6, 1>} : memref<256x1xf32, #tpu.memory_space<vmem>>, vector<41x1xf32>
    %c1_10 = arith.constant 1 : index
    %c0_11 = arith.constant 0 : index
    %c0_12 = arith.constant 0 : index
    %12 = vector.load %arg2[%c1_10, %c0_11, %c0_12] : memref<11x1x16xf32, #tpu.memory_space<vmem>>, vector<1x1x16xf32>
    %13 = vector.shape_cast %12 : vector<1x1x16xf32> to vector<1x16xf32>
    %14 = vector.broadcast %11 : vector<41x1xf32> to vector<41x16xf32>
    %15 = vector.broadcast %13 : vector<1x16xf32> to vector<41x16xf32>
    %16 = arith.mulf %14, %15 : vector<41x16xf32>
    %17 = arith.addf %10, %16 : vector<41x16xf32>
    %c2 = arith.constant 2 : index
    %c0_13 = arith.constant 0 : index
    %18 = tpu.strided_load %arg31[%c2, %c0_13] {strides = array<i32: 6, 1>} : memref<256x1xf32, #tpu.memory_space<vmem>>, vector<41x1xf32>
    %c2_14 = arith.constant 2 : index
    %c0_15 = arith.constant 0 : index
    %c0_16 = arith.constant 0 : index
    %19 = vector.load %arg2[%c2_14, %c0_15, %c0_16] : memref<11x1x16xf32, #tpu.memory_space<vmem>>, vector<1x1x16xf32>
    %20 = vector.shape_cast %19 : vector<1x1x16xf32> to vector<1x16xf32>
    %21 = vector.broadcast %18 : vector<41x1xf32> to vector<41x16xf32>
    %22 = vector.broadcast %20 : vector<1x16xf32> to vector<41x16xf32>
    %23 = arith.mulf %21, %22 : vector<41x16xf32>
    %24 = arith.addf %17, %23 : vector<41x16xf32>
    %c3 = arith.constant 3 : index
    %c0_17 = arith.constant 0 : index
    %25 = tpu.strided_load %arg31[%c3, %c0_17] {strides = array<i32: 6, 1>} : memref<256x1xf32, #tpu.memory_space<vmem>>, vector<41x1xf32>
    %c3_18 = arith.constant 3 : index
    %c0_19 = arith.constant 0 : index
    %c0_20 = arith.constant 0 : index
    %26 = vector.load %arg2[%c3_18, %c0_19, %c0_20] : memref<11x1x16xf32, #tpu.memory_space<vmem>>, vector<1x1x16xf32>
    %27 = vector.shape_cast %26 : vector<1x1x16xf32> to vector<1x16xf32>
    %28 = vector.broadcast %25 : vector<41x1xf32> to vector<41x16xf32>
    %29 = vector.broadcast %27 : vector<1x16xf32> to vector<41x16xf32>
    %30 = arith.mulf %28, %29 : vector<41x16xf32>
    %31 = arith.addf %24, %30 : vector<41x16xf32>
    %c4 = arith.constant 4 : index
    %c0_21 = arith.constant 0 : index
    %32 = tpu.strided_load %arg31[%c4, %c0_21] {strides = array<i32: 6, 1>} : memref<256x1xf32, #tpu.memory_space<vmem>>, vector<41x1xf32>
    %c4_22 = arith.constant 4 : index
    %c0_23 = arith.constant 0 : index
    %c0_24 = arith.constant 0 : index
    %33 = vector.load %arg2[%c4_22, %c0_23, %c0_24] : memref<11x1x16xf32, #tpu.memory_space<vmem>>, vector<1x1x16xf32>
    %34 = vector.shape_cast %33 : vector<1x1x16xf32> to vector<1x16xf32>
    %35 = vector.broadcast %32 : vector<41x1xf32> to vector<41x16xf32>
    %36 = vector.broadcast %34 : vector<1x16xf32> to vector<41x16xf32>
    %37 = arith.mulf %35, %36 : vector<41x16xf32>
    %38 = arith.addf %31, %37 : vector<41x16xf32>
    %c5 = arith.constant 5 : index
    %c0_25 = arith.constant 0 : index
    %39 = tpu.strided_load %arg31[%c5, %c0_25] {strides = array<i32: 6, 1>} : memref<256x1xf32, #tpu.memory_space<vmem>>, vector<41x1xf32>
    %c5_26 = arith.constant 5 : index
    %c0_27 = arith.constant 0 : index
    %c0_28 = arith.constant 0 : index
    %40 = vector.load %arg2[%c5_26, %c0_27, %c0_28] : memref<11x1x16xf32, #tpu.memory_space<vmem>>, vector<1x1x16xf32>
    %41 = vector.shape_cast %40 : vector<1x1x16xf32> to vector<1x16xf32>
    %42 = vector.broadcast %39 : vector<41x1xf32> to vector<41x16xf32>
    %43 = vector.broadcast %41 : vector<1x16xf32> to vector<41x16xf32>
    %44 = arith.mulf %42, %43 : vector<41x16xf32>
    %45 = arith.addf %38, %44 : vector<41x16xf32>
    %c6 = arith.constant 6 : index
    %c0_29 = arith.constant 0 : index
    %46 = tpu.strided_load %arg31[%c6, %c0_29] {strides = array<i32: 6, 1>} : memref<256x1xf32, #tpu.memory_space<vmem>>, vector<41x1xf32>
    %c6_30 = arith.constant 6 : index
    %c0_31 = arith.constant 0 : index
    %c0_32 = arith.constant 0 : index
    %47 = vector.load %arg2[%c6_30, %c0_31, %c0_32] : memref<11x1x16xf32, #tpu.memory_space<vmem>>, vector<1x1x16xf32>
    %48 = vector.shape_cast %47 : vector<1x1x16xf32> to vector<1x16xf32>
    %49 = vector.broadcast %46 : vector<41x1xf32> to vector<41x16xf32>
    %50 = vector.broadcast %48 : vector<1x16xf32> to vector<41x16xf32>
    %51 = arith.mulf %49, %50 : vector<41x16xf32>
    %52 = arith.addf %45, %51 : vector<41x16xf32>
    %c7 = arith.constant 7 : index
    %c0_33 = arith.constant 0 : index
    %53 = tpu.strided_load %arg31[%c7, %c0_33] {strides = array<i32: 6, 1>} : memref<256x1xf32, #tpu.memory_space<vmem>>, vector<41x1xf32>
    %c7_34 = arith.constant 7 : index
    %c0_35 = arith.constant 0 : index
    %c0_36 = arith.constant 0 : index
    %54 = vector.load %arg2[%c7_34, %c0_35, %c0_36] : memref<11x1x16xf32, #tpu.memory_space<vmem>>, vector<1x1x16xf32>
    %55 = vector.shape_cast %54 : vector<1x1x16xf32> to vector<1x16xf32>
    %56 = vector.broadcast %53 : vector<41x1xf32> to vector<41x16xf32>
    %57 = vector.broadcast %55 : vector<1x16xf32> to vector<41x16xf32>
    %58 = arith.mulf %56, %57 : vector<41x16xf32>
    %59 = arith.addf %52, %58 : vector<41x16xf32>
    %c8 = arith.constant 8 : index
    %c0_37 = arith.constant 0 : index
    %60 = tpu.strided_load %arg31[%c8, %c0_37] {strides = array<i32: 6, 1>} : memref<256x1xf32, #tpu.memory_space<vmem>>, vector<41x1xf32>
    %c8_38 = arith.constant 8 : index
    %c0_39 = arith.constant 0 : index
    %c0_40 = arith.constant 0 : index
    %61 = vector.load %arg2[%c8_38, %c0_39, %c0_40] : memref<11x1x16xf32, #tpu.memory_space<vmem>>, vector<1x1x16xf32>
    %62 = vector.shape_cast %61 : vector<1x1x16xf32> to vector<1x16xf32>
    %63 = vector.broadcast %60 : vector<41x1xf32> to vector<41x16xf32>
    %64 = vector.broadcast %62 : vector<1x16xf32> to vector<41x16xf32>
    %65 = arith.mulf %63, %64 : vector<41x16xf32>
    %66 = arith.addf %59, %65 : vector<41x16xf32>
    %c9 = arith.constant 9 : index
    %c0_41 = arith.constant 0 : index
    %67 = tpu.strided_load %arg31[%c9, %c0_41] {strides = array<i32: 6, 1>} : memref<256x1xf32, #tpu.memory_space<vmem>>, vector<41x1xf32>
    %c9_42 = arith.constant 9 : index
    %c0_43 = arith.constant 0 : index
    %c0_44 = arith.constant 0 : index
    %68 = vector.load %arg2[%c9_42, %c0_43, %c0_44] : memref<11x1x16xf32, #tpu.memory_space<vmem>>, vector<1x1x16xf32>
    %69 = vector.shape_cast %68 : vector<1x1x16xf32> to vector<1x16xf32>
    %70 = vector.broadcast %67 : vector<41x1xf32> to vector<41x16xf32>
    %71 = vector.broadcast %69 : vector<1x16xf32> to vector<41x16xf32>
    %72 = arith.mulf %70, %71 : vector<41x16xf32>
    %73 = arith.addf %66, %72 : vector<41x16xf32>
    %c10 = arith.constant 10 : index
    %c0_45 = arith.constant 0 : index
    %74 = tpu.strided_load %arg31[%c10, %c0_45] {strides = array<i32: 6, 1>} : memref<256x1xf32, #tpu.memory_space<vmem>>, vector<41x1xf32>
    %c10_46 = arith.constant 10 : index
    %c0_47 = arith.constant 0 : index
    %c0_48 = arith.constant 0 : index
    %75 = vector.load %arg2[%c10_46, %c0_47, %c0_48] : memref<11x1x16xf32, #tpu.memory_space<vmem>>, vector<1x1x16xf32>
    %76 = vector.shape_cast %75 : vector<1x1x16xf32> to vector<1x16xf32>
    %77 = vector.broadcast %74 : vector<41x1xf32> to vector<41x16xf32>
    %78 = vector.broadcast %76 : vector<1x16xf32> to vector<41x16xf32>
    %79 = arith.mulf %77, %78 : vector<41x16xf32>
    %80 = arith.addf %73, %79 : vector<41x16xf32>
    %c0_49 = arith.constant 0 : index
    %c0_50 = arith.constant 0 : index
    %81 = vector.load %arg3[%c0_49, %c0_50] : memref<1x16xf32, #tpu.memory_space<vmem>>, vector<1x16xf32>
    %82 = vector.broadcast %81 : vector<1x16xf32> to vector<41x16xf32>
    %83 = arith.addf %80, %82 : vector<41x16xf32>
    %cst_51 = arith.constant 0.000000e+00 : f32
    %84 = vector.broadcast %cst_51 : f32 to vector<41x16xf32>
    %85 = arith.maximumf %83, %84 : vector<41x16xf32>
    %c0_52 = arith.constant 0 : index
    %c0_53 = arith.constant 0 : index
    %86 = vector.load %arg32[%c0_52, %c0_53] : memref<41x16xf32, #tpu.memory_space<vmem>>, vector<41x16xf32>
    tpu.vector_store %arg32[%c0_52, %c0_53], %85 {strides = array<i32>} : memref<41x16xf32, #tpu.memory_space<vmem>>, vector<41x16xf32>,
    %cst_54 = arith.constant 0.000000e+00 : f32
    %87 = vector.broadcast %cst_54 : f32 to vector<20x16xf32>
    %c0_55 = arith.constant 0 : index
    %c0_56 = arith.constant 0 : index
    %88 = tpu.strided_load %arg32[%c0_55, %c0_56] {strides = array<i32: 2, 1>} : memref<41x16xf32, #tpu.memory_space<vmem>>, vector<20x16xf32>
    %c0_57 = arith.constant 0 : index
    %c0_58 = arith.constant 0 : index
    %c0_59 = arith.constant 0 : index
    %89 = vector.load %arg4[%c0_57, %c0_58, %c0_59] : memref<3x16x16xf32, #tpu.memory_space<vmem>>, vector<1x16x16xf32>
    %90 = vector.shape_cast %89 : vector<1x16x16xf32> to vector<16x16xf32>
    %cst_60 = arith.constant dense<0.000000e+00> : vector<20x16xf32>
    %91 = tpu.matmul %88, %90, %cst_60 {dimension_numbers = #tpu.dot_dimension_numbers<[1], [0], [0], [1], [0, 0, 1, 1], [], []>} : vector<20x16xf32>, vector<16x16xf32>, vector<20x16xf32> -> vector<20x16xf32>
    %92 = arith.addf %87, %91 : vector<20x16xf32>
    %c1_61 = arith.constant 1 : index
    %c0_62 = arith.constant 0 : index
    %93 = tpu.strided_load %arg32[%c1_61, %c0_62] {strides = array<i32: 2, 1>} : memref<41x16xf32, #tpu.memory_space<vmem>>, vector<20x16xf32>
    %c1_63 = arith.constant 1 : index
    %c0_64 = arith.constant 0 : index
    %c0_65 = arith.constant 0 : index
    %94 = vector.load %arg4[%c1_63, %c0_64, %c0_65] : memref<3x16x16xf32, #tpu.memory_space<vmem>>, vector<1x16x16xf32>
    %95 = vector.shape_cast %94 : vector<1x16x16xf32> to vector<16x16xf32>
    %cst_66 = arith.constant dense<0.000000e+00> : vector<20x16xf32>
    %96 = tpu.matmul %93, %95, %cst_66 {dimension_numbers = #tpu.dot_dimension_numbers<[1], [0], [0], [1], [0, 0, 1, 1], [], []>} : vector<20x16xf32>, vector<16x16xf32>, vector<20x16xf32> -> vector<20x16xf32>
    %97 = arith.addf %92, %96 : vector<20x16xf32>
    %c2_67 = arith.constant 2 : index
    %c0_68 = arith.constant 0 : index
    %98 = tpu.strided_load %arg32[%c2_67, %c0_68] {strides = array<i32: 2, 1>} : memref<41x16xf32, #tpu.memory_space<vmem>>, vector<20x16xf32>
    %c2_69 = arith.constant 2 : index
    %c0_70 = arith.constant 0 : index
    %c0_71 = arith.constant 0 : index
    %99 = vector.load %arg4[%c2_69, %c0_70, %c0_71] : memref<3x16x16xf32, #tpu.memory_space<vmem>>, vector<1x16x16xf32>
    %100 = vector.shape_cast %99 : vector<1x16x16xf32> to vector<16x16xf32>
    %cst_72 = arith.constant dense<0.000000e+00> : vector<20x16xf32>
    %101 = tpu.matmul %98, %100, %cst_72 {dimension_numbers = #tpu.dot_dimension_numbers<[1], [0], [0], [1], [0, 0, 1, 1], [], []>} : vector<20x16xf32>, vector<16x16xf32>, vector<20x16xf32> -> vector<20x16xf32>
    %102 = arith.addf %97, %101 : vector<20x16xf32>
    %c0_73 = arith.constant 0 : index
    %c0_74 = arith.constant 0 : index
    %103 = vector.load %arg5[%c0_73, %c0_74] : memref<1x16xf32, #tpu.memory_space<vmem>>, vector<1x16xf32>
    %104 = vector.broadcast %103 : vector<1x16xf32> to vector<20x16xf32>
    %105 = arith.addf %102, %104 : vector<20x16xf32>
    %cst_75 = arith.constant 0.000000e+00 : f32
    %106 = vector.broadcast %cst_75 : f32 to vector<20x16xf32>
    %107 = arith.maximumf %105, %106 : vector<20x16xf32>
    %c0_76 = arith.constant 0 : index
    %c0_77 = arith.constant 0 : index
    %108 = vector.load %arg33[%c0_76, %c0_77] : memref<20x16xf32, #tpu.memory_space<vmem>>, vector<20x16xf32>
    tpu.vector_store %arg33[%c0_76, %c0_77], %107 {strides = array<i32>} : memref<20x16xf32, #tpu.memory_space<vmem>>, vector<20x16xf32>,
    %cst_78 = arith.constant 0.000000e+00 : f32
    %109 = vector.broadcast %cst_78 : f32 to vector<9x16xf32>
    %c0_79 = arith.constant 0 : index
    %c0_80 = arith.constant 0 : index
    %110 = tpu.strided_load %arg33[%c0_79, %c0_80] {strides = array<i32: 2, 1>} : memref<20x16xf32, #tpu.memory_space<vmem>>, vector<9x16xf32>
    %c0_81 = arith.constant 0 : index
    %c0_82 = arith.constant 0 : index
    %c0_83 = arith.constant 0 : index
    %111 = vector.load %arg6[%c0_81, %c0_82, %c0_83] : memref<3x16x16xf32, #tpu.memory_space<vmem>>, vector<1x16x16xf32>
    %112 = vector.shape_cast %111 : vector<1x16x16xf32> to vector<16x16xf32>
    %cst_84 = arith.constant dense<0.000000e+00> : vector<9x16xf32>
    %113 = tpu.matmul %110, %112, %cst_84 {dimension_numbers = #tpu.dot_dimension_numbers<[1], [0], [0], [1], [0, 0, 1, 1], [], []>} : vector<9x16xf32>, vector<16x16xf32>, vector<9x16xf32> -> vector<9x16xf32>
    %114 = arith.addf %109, %113 : vector<9x16xf32>
    %c1_85 = arith.constant 1 : index
    %c0_86 = arith.constant 0 : index
    %115 = tpu.strided_load %arg33[%c1_85, %c0_86] {strides = array<i32: 2, 1>} : memref<20x16xf32, #tpu.memory_space<vmem>>, vector<9x16xf32>
    %c1_87 = arith.constant 1 : index
    %c0_88 = arith.constant 0 : index
    %c0_89 = arith.constant 0 : index
    %116 = vector.load %arg6[%c1_87, %c0_88, %c0_89] : memref<3x16x16xf32, #tpu.memory_space<vmem>>, vector<1x16x16xf32>
    %117 = vector.shape_cast %116 : vector<1x16x16xf32> to vector<16x16xf32>
    %cst_90 = arith.constant dense<0.000000e+00> : vector<9x16xf32>
    %118 = tpu.matmul %115, %117, %cst_90 {dimension_numbers = #tpu.dot_dimension_numbers<[1], [0], [0], [1], [0, 0, 1, 1], [], []>} : vector<9x16xf32>, vector<16x16xf32>, vector<9x16xf32> -> vector<9x16xf32>
    %119 = arith.addf %114, %118 : vector<9x16xf32>
    %c2_91 = arith.constant 2 : index
    %c0_92 = arith.constant 0 : index
    %120 = tpu.strided_load %arg33[%c2_91, %c0_92] {strides = array<i32: 2, 1>} : memref<20x16xf32, #tpu.memory_space<vmem>>, vector<9x16xf32>
    %c2_93 = arith.constant 2 : index
    %c0_94 = arith.constant 0 : index
    %c0_95 = arith.constant 0 : index
    %121 = vector.load %arg6[%c2_93, %c0_94, %c0_95] : memref<3x16x16xf32, #tpu.memory_space<vmem>>, vector<1x16x16xf32>
    %122 = vector.shape_cast %121 : vector<1x16x16xf32> to vector<16x16xf32>
    %cst_96 = arith.constant dense<0.000000e+00> : vector<9x16xf32>
    %123 = tpu.matmul %120, %122, %cst_96 {dimension_numbers = #tpu.dot_dimension_numbers<[1], [0], [0], [1], [0, 0, 1, 1], [], []>} : vector<9x16xf32>, vector<16x16xf32>, vector<9x16xf32> -> vector<9x16xf32>
    %124 = arith.addf %119, %123 : vector<9x16xf32>
    %c0_97 = arith.constant 0 : index
    %c0_98 = arith.constant 0 : index
    %125 = vector.load %arg7[%c0_97, %c0_98] : memref<1x16xf32, #tpu.memory_space<vmem>>, vector<1x16xf32>
    %126 = vector.broadcast %125 : vector<1x16xf32> to vector<9x16xf32>
    %127 = arith.addf %124, %126 : vector<9x16xf32>
    %cst_99 = arith.constant 0.000000e+00 : f32
    %128 = vector.broadcast %cst_99 : f32 to vector<9x16xf32>
    %129 = arith.maximumf %127, %128 : vector<9x16xf32>
    %cst_100 = arith.constant 0.000000e+00 : f32
    %130 = vector.broadcast %cst_100 : f32 to vector<1x16xf32>
    %c0_101 = arith.constant 0 : index
    %c0_102 = arith.constant 0 : index
    %131 = vector.load %arg34[%c0_101, %c0_102] : memref<11x16xf32, #tpu.memory_space<vmem>>, vector<1x16xf32>
    tpu.vector_store %arg34[%c0_101, %c0_102], %130 {strides = array<i32>} : memref<11x16xf32, #tpu.memory_space<vmem>>, vector<1x16xf32>,
    %c10_103 = arith.constant 10 : index
    %c0_104 = arith.constant 0 : index
    %132 = vector.load %arg34[%c10_103, %c0_104] : memref<11x16xf32, #tpu.memory_space<vmem>>, vector<1x16xf32>
    tpu.vector_store %arg34[%c10_103, %c0_104], %130 {strides = array<i32>} : memref<11x16xf32, #tpu.memory_space<vmem>>, vector<1x16xf32>,
    %c1_105 = arith.constant 1 : index
    %c0_106 = arith.constant 0 : index
    %133 = vector.load %arg34[%c1_105, %c0_106] : memref<11x16xf32, #tpu.memory_space<vmem>>, vector<9x16xf32>
    tpu.vector_store %arg34[%c1_105, %c0_106], %129 {strides = array<i32>} : memref<11x16xf32, #tpu.memory_space<vmem>>, vector<9x16xf32>,
    %cst_107 = arith.constant 0.000000e+00 : f32
    %134 = vector.broadcast %cst_107 : f32 to vector<9x32xf32>
    %c0_108 = arith.constant 0 : index
    %c0_109 = arith.constant 0 : index
    %135 = vector.load %arg34[%c0_108, %c0_109] : memref<11x16xf32, #tpu.memory_space<vmem>>, vector<9x16xf32>
    %c0_110 = arith.constant 0 : index
    %c0_111 = arith.constant 0 : index
    %c0_112 = arith.constant 0 : index
    %136 = vector.load %arg8[%c0_110, %c0_111, %c0_112] : memref<3x16x32xf32, #tpu.memory_space<vmem>>, vector<1x16x32xf32>
    %137 = vector.shape_cast %136 : vector<1x16x32xf32> to vector<16x32xf32>
    %cst_113 = arith.constant dense<0.000000e+00> : vector<9x32xf32>
    %138 = tpu.matmul %135, %137, %cst_113 {dimension_numbers = #tpu.dot_dimension_numbers<[1], [0], [0], [1], [0, 0, 1, 1], [], []>} : vector<9x16xf32>, vector<16x32xf32>, vector<9x32xf32> -> vector<9x32xf32>
    %139 = arith.addf %134, %138 : vector<9x32xf32>
    %c1_114 = arith.constant 1 : index
    %c0_115 = arith.constant 0 : index
    %140 = vector.load %arg34[%c1_114, %c0_115] : memref<11x16xf32, #tpu.memory_space<vmem>>, vector<9x16xf32>
    %c1_116 = arith.constant 1 : index
    %c0_117 = arith.constant 0 : index
    %c0_118 = arith.constant 0 : index
    %141 = vector.load %arg8[%c1_116, %c0_117, %c0_118] : memref<3x16x32xf32, #tpu.memory_space<vmem>>, vector<1x16x32xf32>
    %142 = vector.shape_cast %141 : vector<1x16x32xf32> to vector<16x32xf32>
    %cst_119 = arith.constant dense<0.000000e+00> : vector<9x32xf32>
    %143 = tpu.matmul %140, %142, %cst_119 {dimension_numbers = #tpu.dot_dimension_numbers<[1], [0], [0], [1], [0, 0, 1, 1], [], []>} : vector<9x16xf32>, vector<16x32xf32>, vector<9x32xf32> -> vector<9x32xf32>
    %144 = arith.addf %139, %143 : vector<9x32xf32>
    %c2_120 = arith.constant 2 : index
    %c0_121 = arith.constant 0 : index
    %145 = vector.load %arg34[%c2_120, %c0_121] : memref<11x16xf32, #tpu.memory_space<vmem>>, vector<9x16xf32>
    %c2_122 = arith.constant 2 : index
    %c0_123 = arith.constant 0 : index
    %c0_124 = arith.constant 0 : index
    %146 = vector.load %arg8[%c2_122, %c0_123, %c0_124] : memref<3x16x32xf32, #tpu.memory_space<vmem>>, vector<1x16x32xf32>
    %147 = vector.shape_cast %146 : vector<1x16x32xf32> to vector<16x32xf32>
    %cst_125 = arith.constant dense<0.000000e+00> : vector<9x32xf32>
    %148 = tpu.matmul %145, %147, %cst_125 {dimension_numbers = #tpu.dot_dimension_numbers<[1], [0], [0], [1], [0, 0, 1, 1], [], []>} : vector<9x16xf32>, vector<16x32xf32>, vector<9x32xf32> -> vector<9x32xf32>
    %149 = arith.addf %144, %148 : vector<9x32xf32>
    %c0_126 = arith.constant 0 : index
    %c0_127 = arith.constant 0 : index
    %150 = vector.load %arg9[%c0_126, %c0_127] : memref<1x32xf32, #tpu.memory_space<vmem>>, vector<1x32xf32>
    %151 = vector.broadcast %150 : vector<1x32xf32> to vector<9x32xf32>
    %152 = arith.addf %149, %151 : vector<9x32xf32>
    %cst_128 = arith.constant 0.000000e+00 : f32
    %153 = vector.broadcast %cst_128 : f32 to vector<9x32xf32>
    %154 = arith.maximumf %152, %153 : vector<9x32xf32>
    %cst_129 = arith.constant 0.000000e+00 : f32
    %155 = vector.broadcast %cst_129 : f32 to vector<1x32xf32>
    %c0_130 = arith.constant 0 : index
    %c0_131 = arith.constant 0 : index
    %156 = vector.load %arg35[%c0_130, %c0_131] : memref<11x32xf32, #tpu.memory_space<vmem>>, vector<1x32xf32>
    tpu.vector_store %arg35[%c0_130, %c0_131], %155 {strides = array<i32>} : memref<11x32xf32, #tpu.memory_space<vmem>>, vector<1x32xf32>,
    %c10_132 = arith.constant 10 : index
    %c0_133 = arith.constant 0 : index
    %157 = vector.load %arg35[%c10_132, %c0_133] : memref<11x32xf32, #tpu.memory_space<vmem>>, vector<1x32xf32>
    tpu.vector_store %arg35[%c10_132, %c0_133], %155 {strides = array<i32>} : memref<11x32xf32, #tpu.memory_space<vmem>>, vector<1x32xf32>,
    %c1_134 = arith.constant 1 : index
    %c0_135 = arith.constant 0 : index
    %158 = vector.load %arg35[%c1_134, %c0_135] : memref<11x32xf32, #tpu.memory_space<vmem>>, vector<9x32xf32>
    tpu.vector_store %arg35[%c1_134, %c0_135], %154 {strides = array<i32>} : memref<11x32xf32, #tpu.memory_space<vmem>>, vector<9x32xf32>,
    %cst_136 = arith.constant 0.000000e+00 : f32
    %159 = vector.broadcast %cst_136 : f32 to vector<9x32xf32>
    %c0_137 = arith.constant 0 : index
    %c0_138 = arith.constant 0 : index
    %160 = vector.load %arg35[%c0_137, %c0_138] : memref<11x32xf32, #tpu.memory_space<vmem>>, vector<9x32xf32>
    %c0_139 = arith.constant 0 : index
    %c0_140 = arith.constant 0 : index
    %c0_141 = arith.constant 0 : index
    %161 = vector.load %arg10[%c0_139, %c0_140, %c0_141] : memref<3x32x32xf32, #tpu.memory_space<vmem>>, vector<1x32x32xf32>
    %162 = vector.shape_cast %161 : vector<1x32x32xf32> to vector<32x32xf32>
    %cst_142 = arith.constant dense<0.000000e+00> : vector<9x32xf32>
    %163 = tpu.matmul %160, %162, %cst_142 {dimension_numbers = #tpu.dot_dimension_numbers<[1], [0], [0], [1], [0, 0, 1, 1], [], []>} : vector<9x32xf32>, vector<32x32xf32>, vector<9x32xf32> -> vector<9x32xf32>
    %164 = arith.addf %159, %163 : vector<9x32xf32>
    %c1_143 = arith.constant 1 : index
    %c0_144 = arith.constant 0 : index
    %165 = vector.load %arg35[%c1_143, %c0_144] : memref<11x32xf32, #tpu.memory_space<vmem>>, vector<9x32xf32>
    %c1_145 = arith.constant 1 : index
    %c0_146 = arith.constant 0 : index
    %c0_147 = arith.constant 0 : index
    %166 = vector.load %arg10[%c1_145, %c0_146, %c0_147] : memref<3x32x32xf32, #tpu.memory_space<vmem>>, vector<1x32x32xf32>
    %167 = vector.shape_cast %166 : vector<1x32x32xf32> to vector<32x32xf32>
    %cst_148 = arith.constant dense<0.000000e+00> : vector<9x32xf32>
    %168 = tpu.matmul %165, %167, %cst_148 {dimension_numbers = #tpu.dot_dimension_numbers<[1], [0], [0], [1], [0, 0, 1, 1], [], []>} : vector<9x32xf32>, vector<32x32xf32>, vector<9x32xf32> -> vector<9x32xf32>
    %169 = arith.addf %164, %168 : vector<9x32xf32>
    %c2_149 = arith.constant 2 : index
    %c0_150 = arith.constant 0 : index
    %170 = vector.load %arg35[%c2_149, %c0_150] : memref<11x32xf32, #tpu.memory_space<vmem>>, vector<9x32xf32>
    %c2_151 = arith.constant 2 : index
    %c0_152 = arith.constant 0 : index
    %c0_153 = arith.constant 0 : index
    %171 = vector.load %arg10[%c2_151, %c0_152, %c0_153] : memref<3x32x32xf32, #tpu.memory_space<vmem>>, vector<1x32x32xf32>
    %172 = vector.shape_cast %171 : vector<1x32x32xf32> to vector<32x32xf32>
    %cst_154 = arith.constant dense<0.000000e+00> : vector<9x32xf32>
    %173 = tpu.matmul %170, %172, %cst_154 {dimension_numbers = #tpu.dot_dimension_numbers<[1], [0], [0], [1], [0, 0, 1, 1], [], []>} : vector<9x32xf32>, vector<32x32xf32>, vector<9x32xf32> -> vector<9x32xf32>
    %174 = arith.addf %169, %173 : vector<9x32xf32>
    %c0_155 = arith.constant 0 : index
    %c0_156 = arith.constant 0 : index
    %175 = vector.load %arg11[%c0_155, %c0_156] : memref<1x32xf32, #tpu.memory_space<vmem>>, vector<1x32xf32>
    %176 = vector.broadcast %175 : vector<1x32xf32> to vector<9x32xf32>
    %177 = arith.addf %174, %176 : vector<9x32xf32>
    %cst_157 = arith.constant 0.000000e+00 : f32
    %178 = vector.broadcast %cst_157 : f32 to vector<9x32xf32>
    %179 = arith.maximumf %177, %178 : vector<9x32xf32>
    %cst_158 = arith.constant 0.000000e+00 : f32
    %180 = vector.broadcast %cst_158 : f32 to vector<1x32xf32>
    %c0_159 = arith.constant 0 : index
    %c0_160 = arith.constant 0 : index
    %181 = vector.load %arg36[%c0_159, %c0_160] : memref<11x32xf32, #tpu.memory_space<vmem>>, vector<1x32xf32>
    tpu.vector_store %arg36[%c0_159, %c0_160], %180 {strides = array<i32>} : memref<11x32xf32, #tpu.memory_space<vmem>>, vector<1x32xf32>,
    %c10_161 = arith.constant 10 : index
    %c0_162 = arith.constant 0 : index
    %182 = vector.load %arg36[%c10_161, %c0_162] : memref<11x32xf32, #tpu.memory_space<vmem>>, vector<1x32xf32>
    tpu.vector_store %arg36[%c10_161, %c0_162], %180 {strides = array<i32>} : memref<11x32xf32, #tpu.memory_space<vmem>>, vector<1x32xf32>,
    %c1_163 = arith.constant 1 : index
    %c0_164 = arith.constant 0 : index
    %183 = vector.load %arg36[%c1_163, %c0_164] : memref<11x32xf32, #tpu.memory_space<vmem>>, vector<9x32xf32>
    tpu.vector_store %arg36[%c1_163, %c0_164], %179 {strides = array<i32>} : memref<11x32xf32, #tpu.memory_space<vmem>>, vector<9x32xf32>,
    %cst_165 = arith.constant 0.000000e+00 : f32
    %184 = vector.broadcast %cst_165 : f32 to vector<5x32xf32>
    %c0_166 = arith.constant 0 : index
    %c0_167 = arith.constant 0 : index
    %185 = tpu.strided_load %arg36[%c0_166, %c0_167] {strides = array<i32: 2, 1>} : memref<11x32xf32, #tpu.memory_space<vmem>>, vector<5x32xf32>
    %c0_168 = arith.constant 0 : index
    %c0_169 = arith.constant 0 : index
    %c0_170 = arith.constant 0 : index
    %186 = vector.load %arg12[%c0_168, %c0_169, %c0_170] : memref<2x32x32xf32, #tpu.memory_space<vmem>>, vector<1x32x32xf32>
    %187 = vector.shape_cast %186 : vector<1x32x32xf32> to vector<32x32xf32>
    %cst_171 = arith.constant dense<0.000000e+00> : vector<5x32xf32>
    %188 = tpu.matmul %185, %187, %cst_171 {dimension_numbers = #tpu.dot_dimension_numbers<[1], [0], [0], [1], [0, 0, 1, 1], [], []>} : vector<5x32xf32>, vector<32x32xf32>, vector<5x32xf32> -> vector<5x32xf32>
    %189 = arith.addf %184, %188 : vector<5x32xf32>
    %c1_172 = arith.constant 1 : index
    %c0_173 = arith.constant 0 : index
    %190 = tpu.strided_load %arg36[%c1_172, %c0_173] {strides = array<i32: 2, 1>} : memref<11x32xf32, #tpu.memory_space<vmem>>, vector<5x32xf32>
    %c1_174 = arith.constant 1 : index
    %c0_175 = arith.constant 0 : index
    %c0_176 = arith.constant 0 : index
    %191 = vector.load %arg12[%c1_174, %c0_175, %c0_176] : memref<2x32x32xf32, #tpu.memory_space<vmem>>, vector<1x32x32xf32>
    %192 = vector.shape_cast %191 : vector<1x32x32xf32> to vector<32x32xf32>
    %cst_177 = arith.constant dense<0.000000e+00> : vector<5x32xf32>
    %193 = tpu.matmul %190, %192, %cst_177 {dimension_numbers = #tpu.dot_dimension_numbers<[1], [0], [0], [1], [0, 0, 1, 1], [], []>} : vector<5x32xf32>, vector<32x32xf32>, vector<5x32xf32> -> vector<5x32xf32>
    %194 = arith.addf %189, %193 : vector<5x32xf32>
    %c0_178 = arith.constant 0 : index
    %c0_179 = arith.constant 0 : index
    %195 = vector.load %arg13[%c0_178, %c0_179] : memref<1x32xf32, #tpu.memory_space<vmem>>, vector<1x32xf32>
    %196 = vector.broadcast %195 : vector<1x32xf32> to vector<5x32xf32>
    %197 = arith.addf %194, %196 : vector<5x32xf32>
    %cst_180 = arith.constant 0.000000e+00 : f32
    %198 = vector.broadcast %cst_180 : f32 to vector<5x32xf32>
    %199 = arith.maximumf %197, %198 : vector<5x32xf32>
    %cst_181 = arith.constant 0.000000e+00 : f32
    %200 = vector.broadcast %cst_181 : f32 to vector<1x32xf32>
    %c0_182 = arith.constant 0 : index
    %c0_183 = arith.constant 0 : index
    %201 = vector.load %arg37[%c0_182, %c0_183] : memref<7x32xf32, #tpu.memory_space<vmem>>, vector<1x32xf32>
    tpu.vector_store %arg37[%c0_182, %c0_183], %200 {strides = array<i32>} : memref<7x32xf32, #tpu.memory_space<vmem>>, vector<1x32xf32>,
    %c6_184 = arith.constant 6 : index
    %c0_185 = arith.constant 0 : index
    %202 = vector.load %arg37[%c6_184, %c0_185] : memref<7x32xf32, #tpu.memory_space<vmem>>, vector<1x32xf32>
    tpu.vector_store %arg37[%c6_184, %c0_185], %200 {strides = array<i32>} : memref<7x32xf32, #tpu.memory_space<vmem>>, vector<1x32xf32>,
    %c1_186 = arith.constant 1 : index
    %c0_187 = arith.constant 0 : index
    %203 = vector.load %arg37[%c1_186, %c0_187] : memref<7x32xf32, #tpu.memory_space<vmem>>, vector<5x32xf32>
    tpu.vector_store %arg37[%c1_186, %c0_187], %199 {strides = array<i32>} : memref<7x32xf32, #tpu.memory_space<vmem>>, vector<5x32xf32>,
    %cst_188 = arith.constant 0.000000e+00 : f32
    %204 = vector.broadcast %cst_188 : f32 to vector<5x64xf32>
    %c0_189 = arith.constant 0 : index
    %c0_190 = arith.constant 0 : index
    %205 = vector.load %arg37[%c0_189, %c0_190] : memref<7x32xf32, #tpu.memory_space<vmem>>, vector<5x32xf32>
    %c0_191 = arith.constant 0 : index
    %c0_192 = arith.constant 0 : index
    %c0_193 = arith.constant 0 : index
    %206 = vector.load %arg14[%c0_191, %c0_192, %c0_193] : memref<3x32x64xf32, #tpu.memory_space<vmem>>, vector<1x32x64xf32>
    %207 = vector.shape_cast %206 : vector<1x32x64xf32> to vector<32x64xf32>
    %cst_194 = arith.constant dense<0.000000e+00> : vector<5x64xf32>
    %208 = tpu.matmul %205, %207, %cst_194 {dimension_numbers = #tpu.dot_dimension_numbers<[1], [0], [0], [1], [0, 0, 1, 1], [], []>} : vector<5x32xf32>, vector<32x64xf32>, vector<5x64xf32> -> vector<5x64xf32>
    %209 = arith.addf %204, %208 : vector<5x64xf32>
    %c1_195 = arith.constant 1 : index
    %c0_196 = arith.constant 0 : index
    %210 = vector.load %arg37[%c1_195, %c0_196] : memref<7x32xf32, #tpu.memory_space<vmem>>, vector<5x32xf32>
    %c1_197 = arith.constant 1 : index
    %c0_198 = arith.constant 0 : index
    %c0_199 = arith.constant 0 : index
    %211 = vector.load %arg14[%c1_197, %c0_198, %c0_199] : memref<3x32x64xf32, #tpu.memory_space<vmem>>, vector<1x32x64xf32>
    %212 = vector.shape_cast %211 : vector<1x32x64xf32> to vector<32x64xf32>
    %cst_200 = arith.constant dense<0.000000e+00> : vector<5x64xf32>
    %213 = tpu.matmul %210, %212, %cst_200 {dimension_numbers = #tpu.dot_dimension_numbers<[1], [0], [0], [1], [0, 0, 1, 1], [], []>} : vector<5x32xf32>, vector<32x64xf32>, vector<5x64xf32> -> vector<5x64xf32>
    %214 = arith.addf %209, %213 : vector<5x64xf32>
    %c2_201 = arith.constant 2 : index
    %c0_202 = arith.constant 0 : index
    %215 = vector.load %arg37[%c2_201, %c0_202] : memref<7x32xf32, #tpu.memory_space<vmem>>, vector<5x32xf32>
    %c2_203 = arith.constant 2 : index
    %c0_204 = arith.constant 0 : index
    %c0_205 = arith.constant 0 : index
    %216 = vector.load %arg14[%c2_203, %c0_204, %c0_205] : memref<3x32x64xf32, #tpu.memory_space<vmem>>, vector<1x32x64xf32>
    %217 = vector.shape_cast %216 : vector<1x32x64xf32> to vector<32x64xf32>
    %cst_206 = arith.constant dense<0.000000e+00> : vector<5x64xf32>
    %218 = tpu.matmul %215, %217, %cst_206 {dimension_numbers = #tpu.dot_dimension_numbers<[1], [0], [0], [1], [0, 0, 1, 1], [], []>} : vector<5x32xf32>, vector<32x64xf32>, vector<5x64xf32> -> vector<5x64xf32>
    %219 = arith.addf %214, %218 : vector<5x64xf32>
    %c0_207 = arith.constant 0 : index
    %c0_208 = arith.constant 0 : index
    %220 = vector.load %arg15[%c0_207, %c0_208] : memref<1x64xf32, #tpu.memory_space<vmem>>, vector<1x64xf32>
    %221 = vector.broadcast %220 : vector<1x64xf32> to vector<5x64xf32>
    %222 = arith.addf %219, %221 : vector<5x64xf32>
    %cst_209 = arith.constant 0.000000e+00 : f32
    %223 = vector.broadcast %cst_209 : f32 to vector<5x64xf32>
    %224 = arith.maximumf %222, %223 : vector<5x64xf32>
    %cst_210 = arith.constant 0.000000e+00 : f32
    %225 = vector.broadcast %cst_210 : f32 to vector<1x64xf32>
    %c0_211 = arith.constant 0 : index
    %c0_212 = arith.constant 0 : index
    %226 = vector.load %arg38[%c0_211, %c0_212] : memref<7x64xf32, #tpu.memory_space<vmem>>, vector<1x64xf32>
    tpu.vector_store %arg38[%c0_211, %c0_212], %225 {strides = array<i32>} : memref<7x64xf32, #tpu.memory_space<vmem>>, vector<1x64xf32>,
    %c6_213 = arith.constant 6 : index
    %c0_214 = arith.constant 0 : index
    %227 = vector.load %arg38[%c6_213, %c0_214] : memref<7x64xf32, #tpu.memory_space<vmem>>, vector<1x64xf32>
    tpu.vector_store %arg38[%c6_213, %c0_214], %225 {strides = array<i32>} : memref<7x64xf32, #tpu.memory_space<vmem>>, vector<1x64xf32>,
    %c1_215 = arith.constant 1 : index
    %c0_216 = arith.constant 0 : index
    %228 = vector.load %arg38[%c1_215, %c0_216] : memref<7x64xf32, #tpu.memory_space<vmem>>, vector<5x64xf32>
    tpu.vector_store %arg38[%c1_215, %c0_216], %224 {strides = array<i32>} : memref<7x64xf32, #tpu.memory_space<vmem>>, vector<5x64xf32>,
    %cst_217 = arith.constant 0.000000e+00 : f32
    %229 = vector.broadcast %cst_217 : f32 to vector<5x64xf32>
    %c0_218 = arith.constant 0 : index
    %c0_219 = arith.constant 0 : index
    %230 = vector.load %arg38[%c0_218, %c0_219] : memref<7x64xf32, #tpu.memory_space<vmem>>, vector<5x64xf32>
    %c0_220 = arith.constant 0 : index
    %c0_221 = arith.constant 0 : index
    %c0_222 = arith.constant 0 : index
    %231 = vector.load %arg16[%c0_220, %c0_221, %c0_222] : memref<3x64x64xf32, #tpu.memory_space<vmem>>, vector<1x64x64xf32>
    %232 = vector.shape_cast %231 : vector<1x64x64xf32> to vector<64x64xf32>
    %cst_223 = arith.constant dense<0.000000e+00> : vector<5x64xf32>
    %233 = tpu.matmul %230, %232, %cst_223 {dimension_numbers = #tpu.dot_dimension_numbers<[1], [0], [0], [1], [0, 0, 1, 1], [], []>} : vector<5x64xf32>, vector<64x64xf32>, vector<5x64xf32> -> vector<5x64xf32>
    %234 = arith.addf %229, %233 : vector<5x64xf32>
    %c1_224 = arith.constant 1 : index
    %c0_225 = arith.constant 0 : index
    %235 = vector.load %arg38[%c1_224, %c0_225] : memref<7x64xf32, #tpu.memory_space<vmem>>, vector<5x64xf32>
    %c1_226 = arith.constant 1 : index
    %c0_227 = arith.constant 0 : index
    %c0_228 = arith.constant 0 : index
    %236 = vector.load %arg16[%c1_226, %c0_227, %c0_228] : memref<3x64x64xf32, #tpu.memory_space<vmem>>, vector<1x64x64xf32>
    %237 = vector.shape_cast %236 : vector<1x64x64xf32> to vector<64x64xf32>
    %cst_229 = arith.constant dense<0.000000e+00> : vector<5x64xf32>
    %238 = tpu.matmul %235, %237, %cst_229 {dimension_numbers = #tpu.dot_dimension_numbers<[1], [0], [0], [1], [0, 0, 1, 1], [], []>} : vector<5x64xf32>, vector<64x64xf32>, vector<5x64xf32> -> vector<5x64xf32>
    %239 = arith.addf %234, %238 : vector<5x64xf32>
    %c2_230 = arith.constant 2 : index
    %c0_231 = arith.constant 0 : index
    %240 = vector.load %arg38[%c2_230, %c0_231] : memref<7x64xf32, #tpu.memory_space<vmem>>, vector<5x64xf32>
    %c2_232 = arith.constant 2 : index
    %c0_233 = arith.constant 0 : index
    %c0_234 = arith.constant 0 : index
    %241 = vector.load %arg16[%c2_232, %c0_233, %c0_234] : memref<3x64x64xf32, #tpu.memory_space<vmem>>, vector<1x64x64xf32>
    %242 = vector.shape_cast %241 : vector<1x64x64xf32> to vector<64x64xf32>
    %cst_235 = arith.constant dense<0.000000e+00> : vector<5x64xf32>
    %243 = tpu.matmul %240, %242, %cst_235 {dimension_numbers = #tpu.dot_dimension_numbers<[1], [0], [0], [1], [0, 0, 1, 1], [], []>} : vector<5x64xf32>, vector<64x64xf32>, vector<5x64xf32> -> vector<5x64xf32>
    %244 = arith.addf %239, %243 : vector<5x64xf32>
    %c0_236 = arith.constant 0 : index
    %c0_237 = arith.constant 0 : index
    %245 = vector.load %arg17[%c0_236, %c0_237] : memref<1x64xf32, #tpu.memory_space<vmem>>, vector<1x64xf32>
    %246 = vector.broadcast %245 : vector<1x64xf32> to vector<5x64xf32>
    %247 = arith.addf %244, %246 : vector<5x64xf32>
    %cst_238 = arith.constant 0.000000e+00 : f32
    %248 = vector.broadcast %cst_238 : f32 to vector<5x64xf32>
    %249 = arith.maximumf %247, %248 : vector<5x64xf32>
    %cst_239 = arith.constant 0.000000e+00 : f32
    %250 = vector.broadcast %cst_239 : f32 to vector<1x64xf32>
    %c0_240 = arith.constant 0 : index
    %c0_241 = arith.constant 0 : index
    %251 = vector.load %arg39[%c0_240, %c0_241] : memref<7x64xf32, #tpu.memory_space<vmem>>, vector<1x64xf32>
    tpu.vector_store %arg39[%c0_240, %c0_241], %250 {strides = array<i32>} : memref<7x64xf32, #tpu.memory_space<vmem>>, vector<1x64xf32>,
    %c6_242 = arith.constant 6 : index
    %c0_243 = arith.constant 0 : index
    %252 = vector.load %arg39[%c6_242, %c0_243] : memref<7x64xf32, #tpu.memory_space<vmem>>, vector<1x64xf32>
    tpu.vector_store %arg39[%c6_242, %c0_243], %250 {strides = array<i32>} : memref<7x64xf32, #tpu.memory_space<vmem>>, vector<1x64xf32>,
    %c1_244 = arith.constant 1 : index
    %c0_245 = arith.constant 0 : index
    %253 = vector.load %arg39[%c1_244, %c0_245] : memref<7x64xf32, #tpu.memory_space<vmem>>, vector<5x64xf32>
    tpu.vector_store %arg39[%c1_244, %c0_245], %249 {strides = array<i32>} : memref<7x64xf32, #tpu.memory_space<vmem>>, vector<5x64xf32>,
    %cst_246 = arith.constant 0.000000e+00 : f32
    %254 = vector.broadcast %cst_246 : f32 to vector<3x64xf32>
    %c0_247 = arith.constant 0 : index
    %c0_248 = arith.constant 0 : index
    %255 = tpu.strided_load %arg39[%c0_247, %c0_248] {strides = array<i32: 2, 1>} : memref<7x64xf32, #tpu.memory_space<vmem>>, vector<3x64xf32>
    %c0_249 = arith.constant 0 : index
    %c0_250 = arith.constant 0 : index
    %c0_251 = arith.constant 0 : index
    %256 = vector.load %arg18[%c0_249, %c0_250, %c0_251] : memref<2x64x64xf32, #tpu.memory_space<vmem>>, vector<1x64x64xf32>
    %257 = vector.shape_cast %256 : vector<1x64x64xf32> to vector<64x64xf32>
    %cst_252 = arith.constant dense<0.000000e+00> : vector<3x64xf32>
    %258 = tpu.matmul %255, %257, %cst_252 {dimension_numbers = #tpu.dot_dimension_numbers<[1], [0], [0], [1], [0, 0, 1, 1], [], []>} : vector<3x64xf32>, vector<64x64xf32>, vector<3x64xf32> -> vector<3x64xf32>
    %259 = arith.addf %254, %258 : vector<3x64xf32>
    %c1_253 = arith.constant 1 : index
    %c0_254 = arith.constant 0 : index
    %260 = tpu.strided_load %arg39[%c1_253, %c0_254] {strides = array<i32: 2, 1>} : memref<7x64xf32, #tpu.memory_space<vmem>>, vector<3x64xf32>
    %c1_255 = arith.constant 1 : index
    %c0_256 = arith.constant 0 : index
    %c0_257 = arith.constant 0 : index
    %261 = vector.load %arg18[%c1_255, %c0_256, %c0_257] : memref<2x64x64xf32, #tpu.memory_space<vmem>>, vector<1x64x64xf32>
    %262 = vector.shape_cast %261 : vector<1x64x64xf32> to vector<64x64xf32>
    %cst_258 = arith.constant dense<0.000000e+00> : vector<3x64xf32>
    %263 = tpu.matmul %260, %262, %cst_258 {dimension_numbers = #tpu.dot_dimension_numbers<[1], [0], [0], [1], [0, 0, 1, 1], [], []>} : vector<3x64xf32>, vector<64x64xf32>, vector<3x64xf32> -> vector<3x64xf32>
    %264 = arith.addf %259, %263 : vector<3x64xf32>
    %c0_259 = arith.constant 0 : index
    %c0_260 = arith.constant 0 : index
    %265 = vector.load %arg19[%c0_259, %c0_260] : memref<1x64xf32, #tpu.memory_space<vmem>>, vector<1x64xf32>
    %266 = vector.broadcast %265 : vector<1x64xf32> to vector<3x64xf32>
    %267 = arith.addf %264, %266 : vector<3x64xf32>
    %cst_261 = arith.constant 0.000000e+00 : f32
    %268 = vector.broadcast %cst_261 : f32 to vector<3x64xf32>
    %269 = arith.maximumf %267, %268 : vector<3x64xf32>
    %cst_262 = arith.constant 0.000000e+00 : f32
    %270 = vector.broadcast %cst_262 : f32 to vector<1x64xf32>
    %c0_263 = arith.constant 0 : index
    %c0_264 = arith.constant 0 : index
    %271 = vector.load %arg40[%c0_263, %c0_264] : memref<5x64xf32, #tpu.memory_space<vmem>>, vector<1x64xf32>
    tpu.vector_store %arg40[%c0_263, %c0_264], %270 {strides = array<i32>} : memref<5x64xf32, #tpu.memory_space<vmem>>, vector<1x64xf32>,
    %c4_265 = arith.constant 4 : index
    %c0_266 = arith.constant 0 : index
    %272 = vector.load %arg40[%c4_265, %c0_266] : memref<5x64xf32, #tpu.memory_space<vmem>>, vector<1x64xf32>
    tpu.vector_store %arg40[%c4_265, %c0_266], %270 {strides = array<i32>} : memref<5x64xf32, #tpu.memory_space<vmem>>, vector<1x64xf32>,
    %c1_267 = arith.constant 1 : index
    %c0_268 = arith.constant 0 : index
    %273 = vector.load %arg40[%c1_267, %c0_268] : memref<5x64xf32, #tpu.memory_space<vmem>>, vector<3x64xf32>
    tpu.vector_store %arg40[%c1_267, %c0_268], %269 {strides = array<i32>} : memref<5x64xf32, #tpu.memory_space<vmem>>, vector<3x64xf32>,
    %cst_269 = arith.constant 0.000000e+00 : f32
    %274 = vector.broadcast %cst_269 : f32 to vector<3x64xf32>
    %c0_270 = arith.constant 0 : index
    %c0_271 = arith.constant 0 : index
    %275 = vector.load %arg40[%c0_270, %c0_271] : memref<5x64xf32, #tpu.memory_space<vmem>>, vector<3x64xf32>
    %c0_272 = arith.constant 0 : index
    %c0_273 = arith.constant 0 : index
    %c0_274 = arith.constant 0 : index
    %276 = vector.load %arg20[%c0_272, %c0_273, %c0_274] : memref<3x64x64xf32, #tpu.memory_space<vmem>>, vector<1x64x64xf32>
    %277 = vector.shape_cast %276 : vector<1x64x64xf32> to vector<64x64xf32>
    %cst_275 = arith.constant dense<0.000000e+00> : vector<3x64xf32>
    %278 = tpu.matmul %275, %277, %cst_275 {dimension_numbers = #tpu.dot_dimension_numbers<[1], [0], [0], [1], [0, 0, 1, 1], [], []>} : vector<3x64xf32>, vector<64x64xf32>, vector<3x64xf32> -> vector<3x64xf32>
    %279 = arith.addf %274, %278 : vector<3x64xf32>
    %c1_276 = arith.constant 1 : index
    %c0_277 = arith.constant 0 : index
    %280 = vector.load %arg40[%c1_276, %c0_277] : memref<5x64xf32, #tpu.memory_space<vmem>>, vector<3x64xf32>
    %c1_278 = arith.constant 1 : index
    %c0_279 = arith.constant 0 : index
    %c0_280 = arith.constant 0 : index
    %281 = vector.load %arg20[%c1_278, %c0_279, %c0_280] : memref<3x64x64xf32, #tpu.memory_space<vmem>>, vector<1x64x64xf32>
    %282 = vector.shape_cast %281 : vector<1x64x64xf32> to vector<64x64xf32>
    %cst_281 = arith.constant dense<0.000000e+00> : vector<3x64xf32>
    %283 = tpu.matmul %280, %282, %cst_281 {dimension_numbers = #tpu.dot_dimension_numbers<[1], [0], [0], [1], [0, 0, 1, 1], [], []>} : vector<3x64xf32>, vector<64x64xf32>, vector<3x64xf32> -> vector<3x64xf32>
    %284 = arith.addf %279, %283 : vector<3x64xf32>
    %c2_282 = arith.constant 2 : index
    %c0_283 = arith.constant 0 : index
    %285 = vector.load %arg40[%c2_282, %c0_283] : memref<5x64xf32, #tpu.memory_space<vmem>>, vector<3x64xf32>
    %c2_284 = arith.constant 2 : index
    %c0_285 = arith.constant 0 : index
    %c0_286 = arith.constant 0 : index
    %286 = vector.load %arg20[%c2_284, %c0_285, %c0_286] : memref<3x64x64xf32, #tpu.memory_space<vmem>>, vector<1x64x64xf32>
    %287 = vector.shape_cast %286 : vector<1x64x64xf32> to vector<64x64xf32>
    %cst_287 = arith.constant dense<0.000000e+00> : vector<3x64xf32>
    %288 = tpu.matmul %285, %287, %cst_287 {dimension_numbers = #tpu.dot_dimension_numbers<[1], [0], [0], [1], [0, 0, 1, 1], [], []>} : vector<3x64xf32>, vector<64x64xf32>, vector<3x64xf32> -> vector<3x64xf32>
    %289 = arith.addf %284, %288 : vector<3x64xf32>
    %c0_288 = arith.constant 0 : index
    %c0_289 = arith.constant 0 : index
    %290 = vector.load %arg21[%c0_288, %c0_289] : memref<1x64xf32, #tpu.memory_space<vmem>>, vector<1x64xf32>
    %291 = vector.broadcast %290 : vector<1x64xf32> to vector<3x64xf32>
    %292 = arith.addf %289, %291 : vector<3x64xf32>
    %cst_290 = arith.constant 0.000000e+00 : f32
    %293 = vector.broadcast %cst_290 : f32 to vector<3x64xf32>
    %294 = arith.maximumf %292, %293 : vector<3x64xf32>
    %cst_291 = arith.constant 0.000000e+00 : f32
    %295 = vector.broadcast %cst_291 : f32 to vector<1x64xf32>
    %c0_292 = arith.constant 0 : index
    %c0_293 = arith.constant 0 : index
    %296 = vector.load %arg41[%c0_292, %c0_293] : memref<5x64xf32, #tpu.memory_space<vmem>>, vector<1x64xf32>
    tpu.vector_store %arg41[%c0_292, %c0_293], %295 {strides = array<i32>} : memref<5x64xf32, #tpu.memory_space<vmem>>, vector<1x64xf32>,
    %c4_294 = arith.constant 4 : index
    %c0_295 = arith.constant 0 : index
    %297 = vector.load %arg41[%c4_294, %c0_295] : memref<5x64xf32, #tpu.memory_space<vmem>>, vector<1x64xf32>
    tpu.vector_store %arg41[%c4_294, %c0_295], %295 {strides = array<i32>} : memref<5x64xf32, #tpu.memory_space<vmem>>, vector<1x64xf32>,
    %c1_296 = arith.constant 1 : index
    %c0_297 = arith.constant 0 : index
    %298 = vector.load %arg41[%c1_296, %c0_297] : memref<5x64xf32, #tpu.memory_space<vmem>>, vector<3x64xf32>
    tpu.vector_store %arg41[%c1_296, %c0_297], %294 {strides = array<i32>} : memref<5x64xf32, #tpu.memory_space<vmem>>, vector<3x64xf32>,
    %cst_298 = arith.constant 0.000000e+00 : f32
    %299 = vector.broadcast %cst_298 : f32 to vector<3x64xf32>
    %c0_299 = arith.constant 0 : index
    %c0_300 = arith.constant 0 : index
    %300 = vector.load %arg41[%c0_299, %c0_300] : memref<5x64xf32, #tpu.memory_space<vmem>>, vector<3x64xf32>
    %c0_301 = arith.constant 0 : index
    %c0_302 = arith.constant 0 : index
    %c0_303 = arith.constant 0 : index
    %301 = vector.load %arg22[%c0_301, %c0_302, %c0_303] : memref<3x64x64xf32, #tpu.memory_space<vmem>>, vector<1x64x64xf32>
    %302 = vector.shape_cast %301 : vector<1x64x64xf32> to vector<64x64xf32>
    %cst_304 = arith.constant dense<0.000000e+00> : vector<3x64xf32>
    %303 = tpu.matmul %300, %302, %cst_304 {dimension_numbers = #tpu.dot_dimension_numbers<[1], [0], [0], [1], [0, 0, 1, 1], [], []>} : vector<3x64xf32>, vector<64x64xf32>, vector<3x64xf32> -> vector<3x64xf32>
    %304 = arith.addf %299, %303 : vector<3x64xf32>
    %c1_305 = arith.constant 1 : index
    %c0_306 = arith.constant 0 : index
    %305 = vector.load %arg41[%c1_305, %c0_306] : memref<5x64xf32, #tpu.memory_space<vmem>>, vector<3x64xf32>
    %c1_307 = arith.constant 1 : index
    %c0_308 = arith.constant 0 : index
    %c0_309 = arith.constant 0 : index
    %306 = vector.load %arg22[%c1_307, %c0_308, %c0_309] : memref<3x64x64xf32, #tpu.memory_space<vmem>>, vector<1x64x64xf32>
    %307 = vector.shape_cast %306 : vector<1x64x64xf32> to vector<64x64xf32>
    %cst_310 = arith.constant dense<0.000000e+00> : vector<3x64xf32>
    %308 = tpu.matmul %305, %307, %cst_310 {dimension_numbers = #tpu.dot_dimension_numbers<[1], [0], [0], [1], [0, 0, 1, 1], [], []>} : vector<3x64xf32>, vector<64x64xf32>, vector<3x64xf32> -> vector<3x64xf32>
    %309 = arith.addf %304, %308 : vector<3x64xf32>
    %c2_311 = arith.constant 2 : index
    %c0_312 = arith.constant 0 : index
    %310 = vector.load %arg41[%c2_311, %c0_312] : memref<5x64xf32, #tpu.memory_space<vmem>>, vector<3x64xf32>
    %c2_313 = arith.constant 2 : index
    %c0_314 = arith.constant 0 : index
    %c0_315 = arith.constant 0 : index
    %311 = vector.load %arg22[%c2_313, %c0_314, %c0_315] : memref<3x64x64xf32, #tpu.memory_space<vmem>>, vector<1x64x64xf32>
    %312 = vector.shape_cast %311 : vector<1x64x64xf32> to vector<64x64xf32>
    %cst_316 = arith.constant dense<0.000000e+00> : vector<3x64xf32>
    %313 = tpu.matmul %310, %312, %cst_316 {dimension_numbers = #tpu.dot_dimension_numbers<[1], [0], [0], [1], [0, 0, 1, 1], [], []>} : vector<3x64xf32>, vector<64x64xf32>, vector<3x64xf32> -> vector<3x64xf32>
    %314 = arith.addf %309, %313 : vector<3x64xf32>
    %c0_317 = arith.constant 0 : index
    %c0_318 = arith.constant 0 : index
    %315 = vector.load %arg23[%c0_317, %c0_318] : memref<1x64xf32, #tpu.memory_space<vmem>>, vector<1x64xf32>
    %316 = vector.broadcast %315 : vector<1x64xf32> to vector<3x64xf32>
    %317 = arith.addf %314, %316 : vector<3x64xf32>
    %cst_319 = arith.constant 0.000000e+00 : f32
    %318 = vector.broadcast %cst_319 : f32 to vector<3x64xf32>
    %319 = arith.maximumf %317, %318 : vector<3x64xf32>
    %cst_320 = arith.constant 0.000000e+00 : f32
    %320 = vector.broadcast %cst_320 : f32 to vector<1x64xf32>
    %c0_321 = arith.constant 0 : index
    %c0_322 = arith.constant 0 : index
    %321 = vector.load %arg42[%c0_321, %c0_322] : memref<5x64xf32, #tpu.memory_space<vmem>>, vector<1x64xf32>
    tpu.vector_store %arg42[%c0_321, %c0_322], %320 {strides = array<i32>} : memref<5x64xf32, #tpu.memory_space<vmem>>, vector<1x64xf32>,
    %c4_323 = arith.constant 4 : index
    %c0_324 = arith.constant 0 : index
    %322 = vector.load %arg42[%c4_323, %c0_324] : memref<5x64xf32, #tpu.memory_space<vmem>>, vector<1x64xf32>
    tpu.vector_store %arg42[%c4_323, %c0_324], %320 {strides = array<i32>} : memref<5x64xf32, #tpu.memory_space<vmem>>, vector<1x64xf32>,
    %c1_325 = arith.constant 1 : index
    %c0_326 = arith.constant 0 : index
    %323 = vector.load %arg42[%c1_325, %c0_326] : memref<5x64xf32, #tpu.memory_space<vmem>>, vector<3x64xf32>
    tpu.vector_store %arg42[%c1_325, %c0_326], %319 {strides = array<i32>} : memref<5x64xf32, #tpu.memory_space<vmem>>, vector<3x64xf32>,
    %cst_327 = arith.constant 0.000000e+00 : f32
    %324 = vector.broadcast %cst_327 : f32 to vector<2x64xf32>
    %c0_328 = arith.constant 0 : index
    %c0_329 = arith.constant 0 : index
    %325 = tpu.strided_load %arg42[%c0_328, %c0_329] {strides = array<i32: 2, 1>} : memref<5x64xf32, #tpu.memory_space<vmem>>, vector<2x64xf32>
    %c0_330 = arith.constant 0 : index
    %c0_331 = arith.constant 0 : index
    %c0_332 = arith.constant 0 : index
    %326 = vector.load %arg24[%c0_330, %c0_331, %c0_332] : memref<2x64x64xf32, #tpu.memory_space<vmem>>, vector<1x64x64xf32>
    %327 = vector.shape_cast %326 : vector<1x64x64xf32> to vector<64x64xf32>
    %cst_333 = arith.constant dense<0.000000e+00> : vector<2x64xf32>
    %328 = tpu.matmul %325, %327, %cst_333 {dimension_numbers = #tpu.dot_dimension_numbers<[1], [0], [0], [1], [0, 0, 1, 1], [], []>} : vector<2x64xf32>, vector<64x64xf32>, vector<2x64xf32> -> vector<2x64xf32>
    %329 = arith.addf %324, %328 : vector<2x64xf32>
    %c1_334 = arith.constant 1 : index
    %c0_335 = arith.constant 0 : index
    %330 = tpu.strided_load %arg42[%c1_334, %c0_335] {strides = array<i32: 2, 1>} : memref<5x64xf32, #tpu.memory_space<vmem>>, vector<2x64xf32>
    %c1_336 = arith.constant 1 : index
    %c0_337 = arith.constant 0 : index
    %c0_338 = arith.constant 0 : index
    %331 = vector.load %arg24[%c1_336, %c0_337, %c0_338] : memref<2x64x64xf32, #tpu.memory_space<vmem>>, vector<1x64x64xf32>
    %332 = vector.shape_cast %331 : vector<1x64x64xf32> to vector<64x64xf32>
    %cst_339 = arith.constant dense<0.000000e+00> : vector<2x64xf32>
    %333 = tpu.matmul %330, %332, %cst_339 {dimension_numbers = #tpu.dot_dimension_numbers<[1], [0], [0], [1], [0, 0, 1, 1], [], []>} : vector<2x64xf32>, vector<64x64xf32>, vector<2x64xf32> -> vector<2x64xf32>
    %334 = arith.addf %329, %333 : vector<2x64xf32>
    %c0_340 = arith.constant 0 : index
    %c0_341 = arith.constant 0 : index
    %335 = vector.load %arg25[%c0_340, %c0_341] : memref<1x64xf32, #tpu.memory_space<vmem>>, vector<1x64xf32>
    %336 = vector.broadcast %335 : vector<1x64xf32> to vector<2x64xf32>
    %337 = arith.addf %334, %336 : vector<2x64xf32>
    %cst_342 = arith.constant 0.000000e+00 : f32
    %338 = vector.broadcast %cst_342 : f32 to vector<2x64xf32>
    %339 = arith.maximumf %337, %338 : vector<2x64xf32>
    %c0_343 = arith.constant 0 : index
    %c0_344 = arith.constant 0 : index
    %340 = vector.load %arg43[%c0_343, %c0_344] : memref<2x64xf32, #tpu.memory_space<vmem>>, vector<2x64xf32>
    tpu.vector_store %arg43[%c0_343, %c0_344], %339 {strides = array<i32>} : memref<2x64xf32, #tpu.memory_space<vmem>>, vector<2x64xf32>,
    %c0_345 = arith.constant 0 : index
    %c0_346 = arith.constant 0 : index
    %341 = vector.load %arg43[%c0_345, %c0_346] : memref<2x64xf32, #tpu.memory_space<vmem>>, vector<1x64xf32>
    %c1_347 = arith.constant 1 : index
    %c0_348 = arith.constant 0 : index
    %342 = vector.load %arg43[%c1_347, %c0_348] : memref<2x64xf32, #tpu.memory_space<vmem>>, vector<1x64xf32>
    %343 = arith.addf %341, %342 : vector<1x64xf32>
    %cst_349 = arith.constant 5.000000e-01 : f32
    %344 = vector.broadcast %cst_349 : f32 to vector<1x64xf32>
    %345 = arith.mulf %343, %344 : vector<1x64xf32>
    %c0_350 = arith.constant 0 : index
    %c0_351 = arith.constant 0 : index
    %346 = vector.load %arg26[%c0_350, %c0_351] : memref<64x16xf32, #tpu.memory_space<vmem>>, vector<64x16xf32>
    %cst_352 = arith.constant dense<0.000000e+00> : vector<1x16xf32>
    %347 = tpu.matmul %345, %346, %cst_352 {dimension_numbers = #tpu.dot_dimension_numbers<[1], [0], [0], [1], [0, 0, 1, 1], [], []>} : vector<1x64xf32>, vector<64x16xf32>, vector<1x16xf32> -> vector<1x16xf32>
    %c0_353 = arith.constant 0 : index
    %c0_354 = arith.constant 0 : index
    %348 = vector.load %arg27[%c0_353, %c0_354] : memref<1x16xf32, #tpu.memory_space<vmem>>, vector<1x16xf32>
    %349 = arith.addf %347, %348 : vector<1x16xf32>
    %350 = arith.negf %349 : vector<1x16xf32>
    %351 = math.exp %350 : vector<1x16xf32>
    %cst_355 = arith.constant 1.000000e+00 : f32
    %352 = vector.broadcast %cst_355 : f32 to vector<1x16xf32>
    %353 = arith.addf %352, %351 : vector<1x16xf32>
    %354 = arith.divf %352, %353 : vector<1x16xf32>
    %c0_356 = arith.constant 0 : index
    %c0_357 = arith.constant 0 : index
    %355 = vector.load %arg28[%c0_356, %c0_357] : memref<1x16xf32, #tpu.memory_space<vmem>>, vector<1x16xf32>
    %356 = arith.mulf %354, %355 : vector<1x16xf32>
    %cst_358 = arith.constant dense<0.000000e+00> : vector<1xf32>
    %357 = vector.multi_reduction <add>, %356, %cst_358 [1] : vector<1x16xf32> to vector<1xf32>
    %358 = vector.shape_cast %357 : vector<1xf32> to vector<1x1xf32>
    %c0_359 = arith.constant 0 : index
    %c0_360 = arith.constant 0 : index
    %359 = vector.load %arg29[%c0_359, %c0_360] : memref<1x1xf32, #tpu.memory_space<vmem>>, vector<1x1xf32>
    %360 = arith.addf %358, %359 : vector<1x1xf32>
    %cst_361 = arith.constant 0.000000e+00 : f32
    %361 = vector.broadcast %cst_361 : f32 to vector<1x1xf32>
    %362 = arith.maximumf %360, %361 : vector<1x1xf32>
    %cst_362 = arith.constant 1.000000e+00 : f32
    %363 = vector.broadcast %cst_362 : f32 to vector<1x1xf32>
    %364 = arith.minimumf %362, %363 : vector<1x1xf32>
    %c0_363 = arith.constant 0 : index
    %c0_364 = arith.constant 0 : index
    %c0_365 = arith.constant 0 : index
    %365 = vector.load %arg30[%c0_363, %c0_364, %c0_365] : memref<1x1x1xf32, #tpu.memory_space<vmem>>, vector<1x1x1xf32>
    %366 = vector.shape_cast %365 : vector<1x1x1xf32> to vector<1x1xf32>
    %367 = vector.shape_cast %364 : vector<1x1xf32> to vector<1x1x1xf32>
    tpu.vector_store %arg30[%c0_363, %c0_364, %c0_365], %367 {strides = array<i32>} : memref<1x1x1xf32, #tpu.memory_space<vmem>>, vector<1x1x1xf32>,
    return
  }
  func.func @transform_0(%arg0: i32) -> (i32, i32, i32) {
    %c0_i32 = arith.constant 0 : i32
    %c0_i32_0 = arith.constant 0 : i32
    %c0_i32_1 = arith.constant 0 : i32
    return %arg0, %c0_i32, %c0_i32_0 : i32, i32, i32
  }
  func.func @transform_1(%arg0: i32) -> (i32, i32, i32) {
    %c0_i32 = arith.constant 0 : i32
    %c0_i32_0 = arith.constant 0 : i32
    %c0_i32_1 = arith.constant 0 : i32
    %c0_i32_2 = arith.constant 0 : i32
    return %c0_i32, %c0_i32_0, %c0_i32_1 : i32, i32, i32
  }
  func.func @transform_2(%arg0: i32) -> (i32, i32) {
    %c0_i32 = arith.constant 0 : i32
    %c0_i32_0 = arith.constant 0 : i32
    %c0_i32_1 = arith.constant 0 : i32
    return %c0_i32, %c0_i32_0 : i32, i32
  }
  func.func @transform_3(%arg0: i32) -> (i32, i32, i32) {
    %c0_i32 = arith.constant 0 : i32
    %c0_i32_0 = arith.constant 0 : i32
    %c0_i32_1 = arith.constant 0 : i32
    %c0_i32_2 = arith.constant 0 : i32
    return %c0_i32, %c0_i32_0, %c0_i32_1 : i32, i32, i32
  }
  func.func @transform_4(%arg0: i32) -> (i32, i32) {
    %c0_i32 = arith.constant 0 : i32
    %c0_i32_0 = arith.constant 0 : i32
    %c0_i32_1 = arith.constant 0 : i32
    return %c0_i32, %c0_i32_0 : i32, i32
  }
  func.func @transform_5(%arg0: i32) -> (i32, i32, i32) {
    %c0_i32 = arith.constant 0 : i32
    %c0_i32_0 = arith.constant 0 : i32
    %c0_i32_1 = arith.constant 0 : i32
    %c0_i32_2 = arith.constant 0 : i32
    return %c0_i32, %c0_i32_0, %c0_i32_1 : i32, i32, i32
  }
  func.func @transform_6(%arg0: i32) -> (i32, i32) {
    %c0_i32 = arith.constant 0 : i32
    %c0_i32_0 = arith.constant 0 : i32
    %c0_i32_1 = arith.constant 0 : i32
    return %c0_i32, %c0_i32_0 : i32, i32
  }
  func.func @transform_7(%arg0: i32) -> (i32, i32, i32) {
    %c0_i32 = arith.constant 0 : i32
    %c0_i32_0 = arith.constant 0 : i32
    %c0_i32_1 = arith.constant 0 : i32
    %c0_i32_2 = arith.constant 0 : i32
    return %c0_i32, %c0_i32_0, %c0_i32_1 : i32, i32, i32
  }
  func.func @transform_8(%arg0: i32) -> (i32, i32) {
    %c0_i32 = arith.constant 0 : i32
    %c0_i32_0 = arith.constant 0 : i32
    %c0_i32_1 = arith.constant 0 : i32
    return %c0_i32, %c0_i32_0 : i32, i32
  }
  func.func @transform_9(%arg0: i32) -> (i32, i32, i32) {
    %c0_i32 = arith.constant 0 : i32
    %c0_i32_0 = arith.constant 0 : i32
    %c0_i32_1 = arith.constant 0 : i32
    %c0_i32_2 = arith.constant 0 : i32
    return %c0_i32, %c0_i32_0, %c0_i32_1 : i32, i32, i32
  }
  func.func @transform_10(%arg0: i32) -> (i32, i32) {
    %c0_i32 = arith.constant 0 : i32
    %c0_i32_0 = arith.constant 0 : i32
    %c0_i32_1 = arith.constant 0 : i32
    return %c0_i32, %c0_i32_0 : i32, i32
  }
  func.func @transform_11(%arg0: i32) -> (i32, i32, i32) {
    %c0_i32 = arith.constant 0 : i32
    %c0_i32_0 = arith.constant 0 : i32
    %c0_i32_1 = arith.constant 0 : i32
    %c0_i32_2 = arith.constant 0 : i32
    return %c0_i32, %c0_i32_0, %c0_i32_1 : i32, i32, i32
  }
  func.func @transform_12(%arg0: i32) -> (i32, i32) {
    %c0_i32 = arith.constant 0 : i32
    %c0_i32_0 = arith.constant 0 : i32
    %c0_i32_1 = arith.constant 0 : i32
    return %c0_i32, %c0_i32_0 : i32, i32
  }
  func.func @transform_13(%arg0: i32) -> (i32, i32, i32) {
    %c0_i32 = arith.constant 0 : i32
    %c0_i32_0 = arith.constant 0 : i32
    %c0_i32_1 = arith.constant 0 : i32
    %c0_i32_2 = arith.constant 0 : i32
    return %c0_i32, %c0_i32_0, %c0_i32_1 : i32, i32, i32
  }
  func.func @transform_14(%arg0: i32) -> (i32, i32) {
    %c0_i32 = arith.constant 0 : i32
    %c0_i32_0 = arith.constant 0 : i32
    %c0_i32_1 = arith.constant 0 : i32
    return %c0_i32, %c0_i32_0 : i32, i32
  }
  func.func @transform_15(%arg0: i32) -> (i32, i32, i32) {
    %c0_i32 = arith.constant 0 : i32
    %c0_i32_0 = arith.constant 0 : i32
    %c0_i32_1 = arith.constant 0 : i32
    %c0_i32_2 = arith.constant 0 : i32
    return %c0_i32, %c0_i32_0, %c0_i32_1 : i32, i32, i32
  }
  func.func @transform_16(%arg0: i32) -> (i32, i32) {
    %c0_i32 = arith.constant 0 : i32
    %c0_i32_0 = arith.constant 0 : i32
    %c0_i32_1 = arith.constant 0 : i32
    return %c0_i32, %c0_i32_0 : i32, i32
  }
  func.func @transform_17(%arg0: i32) -> (i32, i32, i32) {
    %c0_i32 = arith.constant 0 : i32
    %c0_i32_0 = arith.constant 0 : i32
    %c0_i32_1 = arith.constant 0 : i32
    %c0_i32_2 = arith.constant 0 : i32
    return %c0_i32, %c0_i32_0, %c0_i32_1 : i32, i32, i32
  }
  func.func @transform_18(%arg0: i32) -> (i32, i32) {
    %c0_i32 = arith.constant 0 : i32
    %c0_i32_0 = arith.constant 0 : i32
    %c0_i32_1 = arith.constant 0 : i32
    return %c0_i32, %c0_i32_0 : i32, i32
  }
  func.func @transform_19(%arg0: i32) -> (i32, i32, i32) {
    %c0_i32 = arith.constant 0 : i32
    %c0_i32_0 = arith.constant 0 : i32
    %c0_i32_1 = arith.constant 0 : i32
    %c0_i32_2 = arith.constant 0 : i32
    return %c0_i32, %c0_i32_0, %c0_i32_1 : i32, i32, i32
  }
  func.func @transform_20(%arg0: i32) -> (i32, i32) {
    %c0_i32 = arith.constant 0 : i32
    %c0_i32_0 = arith.constant 0 : i32
    %c0_i32_1 = arith.constant 0 : i32
    return %c0_i32, %c0_i32_0 : i32, i32
  }
  func.func @transform_21(%arg0: i32) -> (i32, i32, i32) {
    %c0_i32 = arith.constant 0 : i32
    %c0_i32_0 = arith.constant 0 : i32
    %c0_i32_1 = arith.constant 0 : i32
    %c0_i32_2 = arith.constant 0 : i32
    return %c0_i32, %c0_i32_0, %c0_i32_1 : i32, i32, i32
  }
  func.func @transform_22(%arg0: i32) -> (i32, i32) {
    %c0_i32 = arith.constant 0 : i32
    %c0_i32_0 = arith.constant 0 : i32
    %c0_i32_1 = arith.constant 0 : i32
    return %c0_i32, %c0_i32_0 : i32, i32
  }
  func.func @transform_23(%arg0: i32) -> (i32, i32, i32) {
    %c0_i32 = arith.constant 0 : i32
    %c0_i32_0 = arith.constant 0 : i32
    %c0_i32_1 = arith.constant 0 : i32
    %c0_i32_2 = arith.constant 0 : i32
    return %c0_i32, %c0_i32_0, %c0_i32_1 : i32, i32, i32
  }
  func.func @transform_24(%arg0: i32) -> (i32, i32) {
    %c0_i32 = arith.constant 0 : i32
    %c0_i32_0 = arith.constant 0 : i32
    %c0_i32_1 = arith.constant 0 : i32
    return %c0_i32, %c0_i32_0 : i32, i32
  }
  func.func @transform_25(%arg0: i32) -> (i32, i32) {
    %c0_i32 = arith.constant 0 : i32
    %c0_i32_0 = arith.constant 0 : i32
    %c0_i32_1 = arith.constant 0 : i32
    return %c0_i32, %c0_i32_0 : i32, i32
  }
  func.func @transform_26(%arg0: i32) -> (i32, i32) {
    %c0_i32 = arith.constant 0 : i32
    %c0_i32_0 = arith.constant 0 : i32
    %c0_i32_1 = arith.constant 0 : i32
    return %c0_i32, %c0_i32_0 : i32, i32
  }
  func.func @transform_27(%arg0: i32) -> (i32, i32) {
    %c0_i32 = arith.constant 0 : i32
    %c0_i32_0 = arith.constant 0 : i32
    %c0_i32_1 = arith.constant 0 : i32
    return %c0_i32, %c0_i32_0 : i32, i32
  }
  func.func @transform_28(%arg0: i32) -> (i32, i32) {
    %c0_i32 = arith.constant 0 : i32
    %c0_i32_0 = arith.constant 0 : i32
    %c0_i32_1 = arith.constant 0 : i32
    return %c0_i32, %c0_i32_0 : i32, i32
  }
  func.func @transform_29(%arg0: i32) -> (i32, i32, i32) {
    %c0_i32 = arith.constant 0 : i32
    %c0_i32_0 = arith.constant 0 : i32
    %c0_i32_1 = arith.constant 0 : i32
    return %arg0, %c0_i32, %c0_i32_0 : i32, i32, i32
  }
}

</mosaic_0001>

<bundles_post_ra>
// kernel: model_forward.1
= control target key start
LH: loop header
LB: loop body
LE: loop exit
PB: predicated region body
PF: predicated region fallthrough
CT: control target
= control target key end

     0   :  { %s6718_s6 = smov 1   ;;  %s6719_s10 = smov 2   ;;  %s7755_s0 = inlined_call_operand.smem [shape: u32[30], index: -1, kind: input, shape index: {}] }
   0x1   :  { %s6783_s5 = sld [smem:[%s7755_s0]]   ;;  %s6720_s14 = smov 3  }
   0x2   :  { %s6788_s9 = sld [smem:[%s7755_s0 + %s6718_s6]]   ;;  %s6721_s18 = smov 4  }
   0x3   :  { %s6793_s13 = sld [smem:[%s7755_s0 + %s6719_s10]]   ;;  %s6722_s22 = smov 5  }
   0x4   :  { %s6798_s17 = sld [smem:[%s7755_s0 + %s6720_s14]]   ;;  %s6723_s26 = smov 6  }
   0x5   :  { %s6803_s21 = sld [smem:[%s7755_s0 + %s6721_s18]]   ;;  %s6724_s30 = smov 7  }
   0x6   :  { %s6808_s25 = sld [smem:[%s7755_s0 + %s6722_s22]]   ;;  %s6725_s4 = smov 8  }
   0x7   :  { %7767 = sst [smem:[#allocation59_spill]] %s6783_s5  ;;  %s6726_s10 = smov 9  }
   0x8   :  { %s6813_s29 = sld [smem:[%s7755_s0 + %s6723_s26]]   ;;  %s6727_s15 = smov 10  }
   0x9   :  { %7768 = sst [smem:[#allocation60_spill]] %s6793_s13  ;;  %s6728_s20 = smov 11  }
   0xa   :  { %7769 = sst [smem:[#allocation61_spill]] %s6798_s17  ;;  %s6729_s26 = smov 12  }
   0xb   :  { %s6818_s3 = sld [smem:[%s7755_s0 + %s6724_s30]]   ;;  %s6730_s1 = smov 13  }
   0xc   :  { %s6823_s8 = sld [smem:[%s7755_s0 + %s6725_s4]]   ;;  %s6731_s7 = smov 14  }
   0xd   :  { %s6828_s14 = sld [smem:[%s7755_s0 + %s6726_s10]]   ;;  %s6733_s22 = smov 16  }
   0xe   :  { %s6833_s19 = sld [smem:[%s7755_s0 + %s6727_s15]]   ;;  %s6732_s15 = smov 15  }
   0xf   :  { %s6838_s24 = sld [smem:[%s7755_s0 + %s6728_s20]]   ;;  %s6734_s28 = smov 17  }
  0x10   :  { %s6843_s30 = sld [smem:[%s7755_s0 + %s6729_s26]]  }
  0x11   :  { %s6848_s6 = sld [smem:[%s7755_s0 + %s6730_s1]]   ;;  %s6746_s1 = smov 29  }
  0x12   :  { %7770 = sst [smem:[#allocation62_spill]] %s6823_s8 }
  0x13   :  { %s6853_s12 = sld [smem:[%s7755_s0 + %s6731_s7]]   ;;  %s6735_s7 = smov 18  }
  0x14   :  { %s6858_s20 = sld [smem:[%s7755_s0 + %s6732_s15]]   ;;  %s6736_s15 = smov 19  }
  0x15   :  { %s6863_s27 = sld [smem:[%s7755_s0 + %s6733_s22]]   ;;  %s6737_s22 = smov 20  }
  0x16   :  { %s6868_s4 = sld [smem:[%s7755_s0 + %s6734_s28]]   ;;  %s6738_s28 = smov 21  }
  0x17   :  { %7771 = sst [smem:[#allocation63_spill]] %s6848_s6 }
  0x18   :  { %s6873_s13 = sld [smem:[%s7755_s0 + %s6735_s7]]   ;;  %s6739_s7 = smov 22  }
  0x19   :  { %s6883_s17 = sld [smem:[%s7755_s0 + %s6737_s22]]   ;;  %s6741_s22 = smov 24  }
  0x1a   :  { %7772 = sst [smem:[#allocation64_spill]] %s6858_s20 }
  0x1b   :  { %7773 = sst [smem:[#allocation65_spill]] %s6863_s27 }
  0x1c   :  { %7774 = sst [smem:[#allocation66_spill]] %s6868_s4 }
  0x1d   :  { %s6878_s20 = sld [smem:[%s7755_s0 + %s6736_s15]]   ;;  %s6740_s15 = smov 23  }
  0x1e   :  { %7775 = sst [smem:[#allocation67_spill]] %s6873_s13 }
  0x1f   :  { %s6888_s5 = sld [smem:[%s7755_s0 + %s6738_s28]]   ;;  %s6742_s28 = smov 25  }
  0x20   :  { %s6893_s13 = sld [smem:[%s7755_s0 + %s6739_s7]]   ;;  %s6743_s7 = smov 26  }
  0x21   :  { %s6903_s27 = sld [smem:[%s7755_s0 + %s6741_s22]]   ;;  %s6745_s22 = smov 28  }
  0x23   :  { %7776 = sst [smem:[#allocation68_spill]] %s6878_s20 }
  0x24   :  { %s6898_s20 = sld [smem:[%s7755_s0 + %s6740_s15]]   ;;  %s6744_s15 = smov 27  }
  0x25   :  { %7777 = sst [smem:[#allocation69_spill]] %s6888_s5 }
  0x26   :  { %7778 = sst [smem:[#allocation70_spill]] %s6893_s13 }
  0x27   :  { %7779 = sst [smem:[#allocation71_spill]] %s6903_s27 }
  0x28   :  { %s6908_s5 = sld [smem:[%s7755_s0 + %s6742_s28]]  }
  0x29   :  { %s6913_s13 = sld [smem:[%s7755_s0 + %s6743_s7]]  }
  0x2a   :  { %s6918_s6 = sld [smem:[%s7755_s0 + %s6744_s15]]  }
  0x2b   :  { %s5040_s27 = sld [smem:[%s7755_s0 + %s6745_s22]]  }
  0x2e   :  { %7780 = sst [smem:[#allocation72_spill]] %s6908_s5 }
  0x2f   :  { %s6926_s5 = sld [smem:[%s7755_s0 + %s6746_s1]]  }
  0x31   :  { %v64_v0 = vstv %s5040_s27 }
  0x32   :  { %65 = vst [vmem:[#allocation15] sm:$0x1] %v64_v0 }
  0x33   :  { %66 = vsyncpa [#allocation17], 0 }
  0x34   :  { %67 = vsyncpa [#allocation19], 0 }
  0x35   :  { %68 = vsyncpa [#allocation22], 0 }
  0x36   :  { %69 = vsyncpa [#allocation25], 0 }
  0x37   :  { %70 = vsyncpa [#allocation28], 0 }
  0x38   :  { %71 = vsyncpa [#allocation31], 0 }
  0x39   :  { %72 = vsyncpa [#allocation34], 0 }
  0x3a   :  { %73 = vsyncpa [#allocation37], 0 }
  0x3b   :  { %74 = vsyncpa [#allocation40], 0 }
  0x3c   :  { %75 = vsyncpa [#allocation43], 0 }
  0x3d   :  { %76 = vsyncpa [#allocation46], 0  ;;  %s6928_s7 = smov 0  }
  0x3e LB: > { %s6747_s0 = smov [#allocation18]   ;;  %s6934_s10 = sadd.s32 4294967295, %s6716_s7   ;;  %s6716_s7 = sphi %s6928_s7, %s82_s7  }
  0x3f   : > { %s759_s27 = sshll.u32 %s6747_s0, 4  ;;  %p5044_p0 = scmp.ge.s32.totalorder %s6716_s7, 1  ;;  %s760_s27 = int_to_ptr.vmem [resolvable:$true] %s759_s27 }
  0x40   : > { %p727_p1 = scmp.lt.s32.totalorder %s6716_s7, 3  ;;  %p7761_p2 = scmp.eq.s32.totalorder %s6934_s10, 0 }
  0x41   : > { %s6748_s15 = smov [#allocation21]   ;;  %s6749_s18 = smov [#allocation24]  }
  0x42   : > { %p6939_p3 = pnand %p5044_p0, %p727_p1  ;;  %s783_s16 = sshll.u32 %s6748_s15, 4  ;;  %s6945_s16 = int_to_ptr.vmem [resolvable:$true] %s783_s16 }
  0x43   : > { %s807_s22 = sshll.u32 %s6749_s18, 4  ;;  %s6750_s26 = smov [#allocation27]   ;;  %s6953_s22 = int_to_ptr.vmem [resolvable:$true] %s807_s22 }
  0x44   : > { %s7781_s11 = scalar_select %p6939_p3, 1, 0 }
  0x45   : > { %p5943_p4 = pneg %p6939_p3  ;;  %s831_s1 = sshll.u32 %s6750_s26, 4  ;;  %s6955_s1 = int_to_ptr.vmem [resolvable:$true] %s831_s1 }
  0x46   : > { %s6131_s2 = scalar_lea.vmem %s760_s27, 16  ;;  %s6138_s0 = scalar_lea.vmem %s760_s27, 32 }
  0x47   : > { %p6949_p5 = pnand %p7761_p2, %p5943_p4  ;;  %p6132_p7 = scmp.ne.s32.totalorder %s760_s27, %s6131_s2 }
  0x48   : > { %p6139_p10 = scmp.lt.s32.totalorder %s760_s27, %s760_s27  ;;  %p6140_p11 = scmp.lt.s32.totalorder %s6138_s0, %s6131_s2 }
  0x49   : > { %p6959_p6 = pneg %p6949_p5 }
  0x4a   : > { %p6141_p12 = por %p6140_p11, %p6139_p10 }
  0x4b   : > { %p6134_p8 = pnand %p6132_p7, %p6959_p6 }
  0x4d   : > { %p6135_p9 = pneg %p6134_p8 }
  0x4f   : > { %p6142_p13 = pnand %p6141_p12, %p6135_p9 }
  0x51   : > { %6145 = shalt.err (!%p6142_p13)
}
  0x52   : > { %5949 = dma.hbm_to_vmem [thread:$0]  (!%p6949_p5), %s6803_s21, 16, %s760_s27, [#allocation19]  }
  0x53   : > { %s6157_s15 = scalar_lea.vmem %s6945_s16, 16  ;;  %s6164_s18 = scalar_lea.vmem %s6945_s16, 32 }
  0x54   : > { %p6158_p0 = scmp.ne.s32.totalorder %s6945_s16, %s6157_s15  ;;  %p6165_p7 = scmp.lt.s32.totalorder %s6945_s16, %s6945_s16 }
  0x55   : > { %p6166_p8 = scmp.lt.s32.totalorder %s6164_s18, %s6157_s15 }
  0x56   : > { %p6160_p1 = pnand %p6158_p0, %p6959_p6 }
  0x57   : > { %p6167_p9 = por %p6166_p8, %p6165_p7 }
  0x58   : > { %p6161_p4 = pneg %p6160_p1 }
  0x5a   : > { %p6168_p10 = pnand %p6167_p9, %p6161_p4 }
  0x5c   : > { %6171 = shalt.err (!%p6168_p10)
}
  0x5d   : > { %5955 = dma.hbm_to_vmem [thread:$0]  (!%p6949_p5), %s6813_s29, 16, %s6945_s16, [#allocation22]  }
  0x5e   : > { %s6183_s27 = scalar_lea.vmem %s6953_s22, 16  ;;  %s6190_s26 = scalar_lea.vmem %s6953_s22, 32 }
  0x5f   : > { %p6184_p11 = scmp.ne.s32.totalorder %s6953_s22, %s6183_s27  ;;  %p6191_p0 = scmp.lt.s32.totalorder %s6953_s22, %s6953_s22 }
  0x60   : > { %p6192_p1 = scmp.lt.s32.totalorder %s6190_s26, %s6183_s27 }
  0x61   : > { %p6186_p12 = pnand %p6184_p11, %p6959_p6 }
  0x62   : > { %p6193_p4 = por %p6192_p1, %p6191_p0 }
  0x63   : > { %p6187_p13 = pneg %p6186_p12 }
  0x65   : > { %p6194_p7 = pnand %p6193_p4, %p6187_p13 }
  0x67   : > { %6197 = shalt.err (!%p6194_p7)
}
  0x68   : > { %s7784_s8 = sld [smem:[#allocation62_spill]]  ;;  %s6209_s16 = scalar_lea.vmem %s6955_s1, 16 }
  0x69   : > { %p6210_p8 = scmp.ne.s32.totalorder %s6955_s1, %s6209_s16  ;;  %s6216_s2 = scalar_lea.vmem %s6955_s1, 32 }
  0x6a   : > { %p6217_p11 = scmp.lt.s32.totalorder %s6955_s1, %s6955_s1  ;;  %p6218_p12 = scmp.lt.s32.totalorder %s6216_s2, %s6209_s16 }
  0x6b   : > { %p6212_p9 = pnand %p6210_p8, %p6959_p6 }
  0x6c   : > { %p6219_p13 = por %p6218_p12, %p6217_p11 }
  0x6d   : > { %p6213_p10 = pneg %p6212_p9 }
  0x6e   : > { %5961 = dma.hbm_to_vmem [thread:$0]  (!%p6949_p5), %s7784_s8, 16, %s6953_s22, [#allocation25]  }
  0x6f   : > { %p6220_p0 = pnand %p6219_p13, %p6213_p10 }
  0x71   : > { %6223 = shalt.err (!%p6220_p0)
}
  0x72   : > { %5967 = dma.hbm_to_vmem [thread:$0]  (!%p6949_p5), %s6833_s19, 16, %s6955_s1, [#allocation28]  }
  0x73   : > { %s6751_s0 = smov [#allocation30]   ;;  %s6752_s15 = smov [#allocation33]  }
  0x74   : > { %s855_s22 = sshll.u32 %s6751_s0, 4  ;;  %s879_s18 = sshll.u32 %s6752_s15, 4  ;;  %s856_s22 = int_to_ptr.vmem [resolvable:$true] %s855_s22  ;;  %s880_s18 = int_to_ptr.vmem [resolvable:$true] %s879_s18 }
  0x75   : > { %s6235_s27 = scalar_lea.vmem %s856_s22, 16  ;;  %s6242_s26 = scalar_lea.vmem %s856_s22, 32 }
  0x76   : > { %p6236_p1 = scmp.ne.s32.totalorder %s856_s22, %s6235_s27  ;;  %p6243_p8 = scmp.lt.s32.totalorder %s856_s22, %s856_s22 }
  0x77   : > { %p6244_p9 = scmp.lt.s32.totalorder %s6242_s26, %s6235_s27 }
  0x78   : > { %p6238_p4 = pnand %p6236_p1, %p6959_p6 }
  0x79   : > { %p6245_p10 = por %p6244_p9, %p6243_p8 }
  0x7a   : > { %p6239_p7 = pneg %p6238_p4 }
  0x7c   : > { %p6246_p11 = pnand %p6245_p10, %p6239_p7 }
  0x7e   : > { %6249 = shalt.err (!%p6246_p11)
}
  0x7f   : > { %5973 = dma.hbm_to_vmem [thread:$0]  (!%p6949_p5), %s6843_s30, 16, %s856_s22, [#allocation31]  }
  0x80   : > { %s6261_s1 = scalar_lea.vmem %s880_s18, 16  ;;  %s6268_s16 = scalar_lea.vmem %s880_s18, 32 }
  0x81   : > { %p6262_p12 = scmp.ne.s32.totalorder %s880_s18, %s6261_s1  ;;  %p6269_p1 = scmp.lt.s32.totalorder %s880_s18, %s880_s18 }
  0x82   : > { %p6270_p4 = scmp.lt.s32.totalorder %s6268_s16, %s6261_s1 }
  0x83   : > { %p6264_p13 = pnand %p6262_p12, %p6959_p6 }
  0x84   : > { %p6271_p2 = por %p6270_p4, %p6269_p1 }
  0x85   : > { %p6265_p0 = pneg %p6264_p13 }
  0x87   : > { %p6272_p3 = pnand %p6271_p2, %p6265_p0 }
  0x89   : > { %6275 = shalt.err (!%p6272_p3)
}
  0x8a   : > { %5979 = dma.hbm_to_vmem [thread:$0]  (!%p6949_p5), %s6853_s12, 16, %s880_s18, [#allocation34]  }
  0x8b   : > { %s6753_s2 = smov [#allocation36]   ;;  %s6754_s22 = smov [#allocation39]  }
  0x8c   : > { %s903_s0 = sshll.u32 %s6753_s2, 4  ;;  %s931_s15 = sshll.u32 %s6754_s22, 4  ;;  %s904_s0 = int_to_ptr.vmem [resolvable:$true] %s903_s0  ;;  %s932_s15 = int_to_ptr.vmem [resolvable:$true] %s931_s15 }
  0x8d   : > { %s6287_s27 = scalar_lea.vmem %s904_s0, 2048  ;;  %p6295_p10 = scmp.lt.s32.totalorder %s904_s0, %s904_s0 }
  0x8e   : > { %p6288_p7 = scmp.ne.s32.totalorder %s904_s0, %s6287_s27  ;;  %p6296_p11 = scmp.lt.s32.totalorder %s6287_s27, %s6287_s27 }
  0x90   : > { %p6290_p8 = pnand %p6288_p7, %p6959_p6  ;;  %p6297_p12 = por %p6296_p11, %p6295_p10 }
  0x92   : > { %p6291_p9 = pneg %p6290_p8 }
  0x94   : > { %p6298_p2 = pnand %p6297_p12, %p6291_p9 }
  0x96   : > { %6301 = shalt.err (!%p6298_p2)
}
  0x97   : > { %s7763_s26 = smov 128   ;;  %s7785_s4 = sld [smem:[#allocation66_spill]] }
  0x98   : > { %s7765_s18 = smov 8   ;;  %s6313_s1 = scalar_lea.vmem %s932_s15, 16 }
  0x99   : > { %p6314_p3 = scmp.ne.s32.totalorder %s932_s15, %s6313_s1  ;;  %s6320_s16 = scalar_lea.vmem %s932_s15, 32 }
  0x9a   : > { %p6321_p1 = scmp.lt.s32.totalorder %s932_s15, %s932_s15  ;;  %p6322_p4 = scmp.lt.s32.totalorder %s6320_s16, %s6313_s1 }
  0x9b   : > { %p6316_p13 = pnand %p6314_p3, %p6959_p6 }
  0x9c   : > { %p6323_p7 = por %p6322_p4, %p6321_p1 }
  0x9d   : > { %5985 = dma.hbm_to_vmem [thread:$0]  (!%p6949_p5), %s7785_s4, 2048, %s904_s0, [#allocation37], %s7763_s26, %s7763_s26, %s7765_s18  }
  0x9e   : > { %p6317_p0 = pneg %p6316_p13 }
  0xa0   : > { %p6324_p8 = pnand %p6323_p7, %p6317_p0 }
  0xa2   : > { %6327 = shalt.err (!%p6324_p8)
}
  0xa3   : > { %5991 = dma.hbm_to_vmem [thread:$0]  (!%p6949_p5), %s6883_s17, 16, %s932_s15, [#allocation40]  }
  0xa4   : > { %s6757_s2 = smov [#allocation42]   ;;  %s6758_s0 = smov [#allocation45]  }
  0xa5   : > { %s955_s22 = sshll.u32 %s6757_s2, 4  ;;  %s983_s27 = sshll.u32 %s6758_s0, 4  ;;  %s956_s22 = int_to_ptr.vmem [resolvable:$true] %s955_s22  ;;  %s984_s27 = int_to_ptr.vmem [resolvable:$true] %s983_s27 }
  0xa6   : > { %s6339_s26 = scalar_lea.vmem %s956_s22, 2048  ;;  %p6347_p12 = scmp.lt.s32.totalorder %s956_s22, %s956_s22 }
  0xa7   : > { %p6340_p9 = scmp.ne.s32.totalorder %s956_s22, %s6339_s26  ;;  %p6348_p2 = scmp.lt.s32.totalorder %s6339_s26, %s6339_s26 }
  0xa9   : > { %p6342_p10 = pnand %p6340_p9, %p6959_p6  ;;  %p6349_p3 = por %p6348_p2, %p6347_p12 }
  0xab   : > { %p6343_p11 = pneg %p6342_p10 }
  0xad   : > { %p6350_p13 = pnand %p6349_p3, %p6343_p11 }
  0xaf   : > { %6353 = shalt.err (!%p6350_p13)
}
  0xb0   : > { %s7786_s1 = smov 128   ;;  %s6365_s15 = scalar_lea.vmem %s984_s27, 16 }
  0xb1   : > { %5997 = dma.hbm_to_vmem [thread:$0]  (!%p6949_p5), %s6898_s20, 2048, %s956_s22, [#allocation43], %s7786_s1, %s7786_s1, %s7765_s18  }
  0xb2   : > { %p6366_p0 = scmp.ne.s32.totalorder %s984_s27, %s6365_s15  ;;  %s6372_s16 = scalar_lea.vmem %s984_s27, 32 }
  0xb3   : > { %p6373_p7 = scmp.lt.s32.totalorder %s984_s27, %s984_s27  ;;  %p6374_p8 = scmp.lt.s32.totalorder %s6372_s16, %s6365_s15 }
  0xb4   : > { %p6368_p1 = pnand %p6366_p0, %p6959_p6 }
  0xb5   : > { %p6375_p9 = por %p6374_p8, %p6373_p7 }
  0xb6   : > { %p6369_p4 = pneg %p6368_p1 }
  0xb8   : > { %p6376_p10 = pnand %p6375_p9, %p6369_p4 }
  0xba   : > { %6379 = shalt.err (!%p6376_p10)
}
  0xbb   : > { %6003 = dma.hbm_to_vmem [thread:$0]  (!%p6949_p5), %s6913_s13, 16, %s984_s27, [#allocation46]  }
  0xbc   : > { %s6759_s26 = smov [#allocation16]  }
  0xbd   : > { %s739_s2 = sshll.u32 %s6759_s26, 4  ;;  %s740_s2 = int_to_ptr.vmem [resolvable:$true] %s739_s2 }
  0xbe   : > { %s6391_s22 = scalar_lea.vmem %s740_s2, 176  ;;  %s6398_s0 = scalar_lea.vmem %s740_s2, 192 }
  0xbf   : > { %p6392_p11 = scmp.ne.s32.totalorder %s740_s2, %s6391_s22  ;;  %p6399_p3 = scmp.lt.s32.totalorder %s740_s2, %s740_s2 }
  0xc0   : > { %p6400_p13 = scmp.lt.s32.totalorder %s6398_s0, %s6391_s22 }
  0xc1   : > { %p6394_p12 = pnand %p6392_p11, %p6959_p6 }
  0xc2   : > { %p6401_p0 = por %p6400_p13, %p6399_p3 }
  0xc3   : > { %p6395_p2 = pneg %p6394_p12 }
  0xc5   : > { %p6402_p1 = pnand %p6401_p0, %p6395_p2 }
  0xc7   : > { %6405 = shalt.err (!%p6402_p1)
}
  0xc8   : > { %s6760_s15 = smov 16   ;;  %s6761_s16 = smov 1  }
  0xc9   : > { %5946 = dma.hbm_to_vmem [thread:$0]  (!%p6949_p5), %s6788_s9, 176, %s740_s2, [#allocation17], %s6760_s15, %s6760_s15, %s6761_s16  }
  0xca   : > { %s6762_s27 = smov [#allocation20]   ;;  %s6763_s18 = smov [#allocation23]  }
  0xcb   : > { %s769_s26 = sshll.u32 %s6762_s27, 4  ;;  %s793_s4 = sshll.u32 %s6763_s18, 4  ;;  %s770_s26 = int_to_ptr.vmem [resolvable:$true] %s769_s26  ;;  %s794_s4 = int_to_ptr.vmem [resolvable:$true] %s793_s4 }
  0xcc   : > { %s6417_s8 = scalar_lea.vmem %s770_s26, 768  ;;  %p6425_p9 = scmp.lt.s32.totalorder %s770_s26, %s770_s26 }
  0xcd   : > { %p6418_p4 = scmp.ne.s32.totalorder %s770_s26, %s6417_s8  ;;  %p6426_p10 = scmp.lt.s32.totalorder %s6417_s8, %s6417_s8 }
  0xcf   : > { %p6420_p7 = pnand %p6418_p4, %p6959_p6  ;;  %p6427_p11 = por %p6426_p10, %p6425_p9 }
  0xd1   : > { %p6421_p8 = pneg %p6420_p7 }
  0xd3   : > { %p6428_p12 = pnand %p6427_p11, %p6421_p8 }
  0xd5   : > { %6431 = shalt.err (!%p6428_p12)
}
  0xd6   : > { %s7787_s22 = smov 8   ;;  %s6443_s18 = scalar_lea.vmem %s794_s4, 768 }
  0xd7   : > { %5952 = dma.hbm_to_vmem [thread:$0]  (!%p6949_p5), %s6808_s25, 768, %s770_s26, [#allocation19], %s7786_s1, %s7786_s1, %s7787_s22  }
  0xd8   : > { %p6444_p2 = scmp.ne.s32.totalorder %s794_s4, %s6443_s18  ;;  %p6451_p0 = scmp.lt.s32.totalorder %s794_s4, %s794_s4 }
  0xd9   : > { %p6452_p1 = scmp.lt.s32.totalorder %s6443_s18, %s6443_s18 }
  0xda   : > { %p6446_p3 = pnand %p6444_p2, %p6959_p6 }
  0xdb   : > { %p6453_p4 = por %p6452_p1, %p6451_p0 }
  0xdc   : > { %p6447_p13 = pneg %p6446_p3 }
  0xde   : > { %p6454_p7 = pnand %p6453_p4, %p6447_p13 }
  0xe0   : > { %6457 = shalt.err (!%p6454_p7)
}
  0xe1   : > { %5958 = dma.hbm_to_vmem [thread:$0]  (!%p6949_p5), %s6818_s3, 768, %s794_s4, [#allocation22], %s7786_s1, %s7786_s1, %s7787_s22  }
  0xe2   : > { %s6764_s8 = smov [#allocation26]   ;;  %s6765_s0 = smov [#allocation29]  }
  0xe3   : > { %s817_s2 = sshll.u32 %s6764_s8, 4  ;;  %s841_s15 = sshll.u32 %s6765_s0, 4  ;;  %s818_s2 = int_to_ptr.vmem [resolvable:$true] %s817_s2  ;;  %s842_s15 = int_to_ptr.vmem [resolvable:$true] %s841_s15 }
  0xe4   : > { %s6469_s16 = scalar_lea.vmem %s818_s2, 1536  ;;  %p6477_p11 = scmp.lt.s32.totalorder %s818_s2, %s818_s2 }
  0xe5   : > { %p6470_p8 = scmp.ne.s32.totalorder %s818_s2, %s6469_s16  ;;  %p6478_p12 = scmp.lt.s32.totalorder %s6469_s16, %s6469_s16 }
  0xe7   : > { %p6472_p9 = pnand %p6470_p8, %p6959_p6  ;;  %p6479_p2 = por %p6478_p12, %p6477_p11 }
  0xe9   : > { %p6473_p10 = pneg %p6472_p9 }
  0xeb   : > { %p6480_p3 = pnand %p6479_p2, %p6473_p10 }
  0xed   : > { %6483 = shalt.err (!%p6480_p3)
}
  0xee   : > { %5964 = dma.hbm_to_vmem [thread:$0]  (!%p6949_p5), %s6828_s14, 1536, %s818_s2, [#allocation25], %s7786_s1, %s7786_s1, %s7787_s22  }
  0xef   : > { %s6495_s4 = scalar_lea.vmem %s842_s15, 1024  ;;  %p6503_p4 = scmp.lt.s32.totalorder %s842_s15, %s842_s15 }
  0xf0   : > { %p6496_p13 = scmp.ne.s32.totalorder %s842_s15, %s6495_s4  ;;  %p6504_p7 = scmp.lt.s32.totalorder %s6495_s4, %s6495_s4 }
  0xf2   : > { %p6498_p0 = pnand %p6496_p13, %p6959_p6  ;;  %p6505_p8 = por %p6504_p7, %p6503_p4 }
  0xf4   : > { %p6499_p1 = pneg %p6498_p0 }
  0xf6   : > { %p6506_p9 = pnand %p6505_p8, %p6499_p1 }
  0xf8   : > { %6509 = shalt.err (!%p6506_p9)
}
  0xf9   : > { %5970 = dma.hbm_to_vmem [thread:$0]  (!%p6949_p5), %s6838_s24, 1024, %s842_s15, [#allocation28], %s7786_s1, %s7786_s1, %s7787_s22  }
  0xfa   : > { %s6766_s27 = smov [#allocation32]   ;;  %s6767_s18 = smov [#allocation35]  }
  0xfb   : > { %s865_s26 = sshll.u32 %s6766_s27, 4  ;;  %s893_s8 = sshll.u32 %s6767_s18, 4  ;;  %s866_s26 = int_to_ptr.vmem [resolvable:$true] %s865_s26  ;;  %s894_s8 = int_to_ptr.vmem [resolvable:$true] %s893_s8 }
  0xfc   : > { %s6521_s2 = scalar_lea.vmem %s866_s26, 1536  ;;  %p6529_p2 = scmp.lt.s32.totalorder %s866_s26, %s866_s26 }
  0xfd   : > { %p6522_p10 = scmp.ne.s32.totalorder %s866_s26, %s6521_s2  ;;  %p6530_p3 = scmp.lt.s32.totalorder %s6521_s2, %s6521_s2 }
  0xff   : > { %p6524_p11 = pnand %p6522_p10, %p6959_p6  ;;  %p6531_p13 = por %p6530_p3, %p6529_p2 }
 0x101   : > { %p6525_p12 = pneg %p6524_p11 }
 0x103   : > { %p6532_p0 = pnand %p6531_p13, %p6525_p12 }
 0x105   : > { %6535 = shalt.err (!%p6532_p0)
}
 0x106   : > { %s7788_s0 = sld [smem:[#allocation63_spill]]  ;;  %s6547_s15 = scalar_lea.vmem %s894_s8, 16 }
 0x107   : > { %p6548_p1 = scmp.ne.s32.totalorder %s894_s8, %s6547_s15  ;;  %s6554_s16 = scalar_lea.vmem %s894_s8, 32 }
 0x108   : > { %p6555_p8 = scmp.lt.s32.totalorder %s894_s8, %s894_s8  ;;  %p6556_p9 = scmp.lt.s32.totalorder %s6554_s16, %s6547_s15 }
 0x109   : > { %p6550_p4 = pnand %p6548_p1, %p6959_p6 }
 0x10a   : > { %p6557_p10 = por %p6556_p9, %p6555_p8 }
 0x10b   : > { %p6551_p7 = pneg %p6550_p4 }
 0x10c   : > { %5976 = dma.hbm_to_vmem [thread:$0]  (!%p6949_p5), %s7788_s0, 1536, %s866_s26, [#allocation31], %s7786_s1, %s7786_s1, %s7787_s22  }
 0x10d   : > { %p6558_p11 = pnand %p6557_p10, %p6551_p7 }
 0x10f   : > { %6561 = shalt.err (!%p6558_p11)
}
 0x110   : > { %s7789_s4 = sld [smem:[#allocation65_spill]]  ;;  %s6768_s27 = smov [#allocation38]  }
 0x111   : > { %s917_s18 = sshll.u32 %s6768_s27, 4  ;;  %s6769_s2 = smov [#allocation41]   ;;  %s918_s18 = int_to_ptr.vmem [resolvable:$true] %s917_s18 }
 0x112   : > { %s945_s1 = sshll.u32 %s6769_s2, 4  ;;  %s6573_s22 = scalar_lea.vmem %s918_s18, 16  ;;  %s946_s1 = int_to_ptr.vmem [resolvable:$true] %s945_s1 }
 0x113   : > { %p6574_p12 = scmp.ne.s32.totalorder %s918_s18, %s6573_s22  ;;  %s6580_s26 = scalar_lea.vmem %s918_s18, 32 }
 0x114   : > { %p6581_p13 = scmp.lt.s32.totalorder %s918_s18, %s918_s18  ;;  %p6582_p0 = scmp.lt.s32.totalorder %s6580_s26, %s6573_s22 }
 0x115   : > { %p6576_p2 = pnand %p6574_p12, %p6959_p6 }
 0x116   : > { %5982 = dma.hbm_to_vmem [thread:$0]  (!%p6949_p5), %s7789_s4, 16, %s894_s8, [#allocation34]  }
 0x117   : > { %p6577_p3 = pneg %p6576_p2  ;;  %p6583_p1 = por %p6582_p0, %p6581_p13 }
 0x119   : > { %p6584_p4 = pnand %p6583_p1, %p6577_p3 }
 0x11b   : > { %6587 = shalt.err (!%p6584_p4)
}
 0x11c   : > { %s7790_s8 = sld [smem:[#allocation67_spill]]  ;;  %s6599_s0 = scalar_lea.vmem %s946_s1, 16 }
 0x11d   : > { %p6600_p7 = scmp.ne.s32.totalorder %s946_s1, %s6599_s0  ;;  %s6606_s15 = scalar_lea.vmem %s946_s1, 32 }
 0x11e   : > { %p6607_p10 = scmp.lt.s32.totalorder %s946_s1, %s946_s1  ;;  %p6608_p11 = scmp.lt.s32.totalorder %s6606_s15, %s6599_s0 }
 0x11f   : > { %p6602_p8 = pnand %p6600_p7, %p6959_p6 }
 0x120   : > { %p6609_p12 = por %p6608_p11, %p6607_p10 }
 0x121   : > { %p6603_p9 = pneg %p6602_p8 }
 0x122   : > { %5988 = dma.hbm_to_vmem [thread:$0]  (!%p6949_p5), %s7790_s8, 16, %s918_s18, [#allocation37]  }
 0x123   : > { %p6610_p2 = pnand %p6609_p12, %p6603_p9 }
 0x125   : > { %6613 = shalt.err (!%p6610_p2)
}
 0x126   : > { %s7791_s16 = sld [smem:[#allocation70_spill]]  ;;  %s6770_s4 = smov [#allocation44]  }
 0x127   : > { %s969_s27 = sshll.u32 %s6770_s4, 4  ;;  %s6771_s2 = smov [#allocation47]   ;;  %s970_s27 = int_to_ptr.vmem [resolvable:$true] %s969_s27 }
 0x128   : > { %s994_s18 = sshll.u32 %s6771_s2, 4  ;;  %s6625_s22 = scalar_lea.vmem %s970_s27, 16  ;;  %s995_s18 = int_to_ptr.vmem [resolvable:$true] %s994_s18 }
 0x129   : > { %p6626_p3 = scmp.ne.s32.totalorder %s970_s27, %s6625_s22  ;;  %s6632_s26 = scalar_lea.vmem %s970_s27, 32 }
 0x12a   : > { %p6633_p1 = scmp.lt.s32.totalorder %s970_s27, %s970_s27  ;;  %p6634_p4 = scmp.lt.s32.totalorder %s6632_s26, %s6625_s22 }
 0x12b   : > { %p6628_p13 = pnand %p6626_p3, %p6959_p6 }
 0x12c   : > { %5994 = dma.hbm_to_vmem [thread:$0]  (!%p6949_p5), %s7791_s16, 16, %s946_s1, [#allocation40]  }
 0x12d   : > { %p6629_p0 = pneg %p6628_p13  ;;  %p6635_p7 = por %p6634_p4, %p6633_p1 }
 0x12f   : > { %p6636_p8 = pnand %p6635_p7, %p6629_p0 }
 0x131   : > { %6639 = shalt.err (!%p6636_p8)
}
 0x132   : > { %s7792_s1 = sld [smem:[#allocation71_spill]]  ;;  %s6651_s8 = scalar_lea.vmem %s995_s18, 16 }
 0x133   : > { %p6652_p9 = scmp.ne.s32.totalorder %s995_s18, %s6651_s8  ;;  %s6658_s0 = scalar_lea.vmem %s995_s18, 32 }
 0x134   : > { %p6659_p12 = scmp.lt.s32.totalorder %s995_s18, %s995_s18  ;;  %p6660_p2 = scmp.lt.s32.totalorder %s6658_s0, %s6651_s8 }
 0x135   : > { %p6654_p10 = pnand %p6652_p9, %p6959_p6 }
 0x136   : > { %p6661_p3 = por %p6660_p2, %p6659_p12 }
 0x137   : > { %p6655_p11 = pneg %p6654_p10 }
 0x138   : > { %6000 = dma.hbm_to_vmem [thread:$0]  (!%p6949_p5), %s7792_s1, 16, %s970_s27, [#allocation43]  }
 0x139   : > { %p6662_p13 = pnand %p6661_p3, %p6655_p11 }
 0x13b   : > { %6665 = shalt.err (!%p6662_p13)
}
 0x13c   : > { %6006 = dma.hbm_to_vmem [thread:$0]  (!%p6949_p5), %s6918_s6, 16, %s995_s18, [#allocation46]  }
 0x13d   : > { %p7793_p0 = scmp.ne.s32.totalorder %s7781_s11, 0 }
 0x13e   : > { %p7794_p1 = scmp.eq.s32.totalorder (!%p7793_p0), %s6934_s10, 0 }
 0x13f   : > { %1018 = sbr.rel (%p7793_p0) target bundleno = 3387 (0xd3b), region = 136 }
 0x144   : > { %6671 = dma.done.wait (%p7794_p1), [#allocation17], 176   ;;  %p7795_p4 = pmov %p7794_p1 }
 0x145   : > { %p7796_p6 = pmov %p7794_p1 }
 0x146   : > { %6673 = vsyncadd (%p7795_p4), [#allocation17], 4294967120 }
 0x147   : > { %6675 = dma.done.wait (%p7796_p6), [#allocation19], 784   ;;  %p7797_p7 = pmov %p7794_p1 }
 0x148   : > { %p7798_p8 = pmov %p7794_p1 }
 0x149   : > { %6677 = vsyncadd (%p7797_p7), [#allocation19], 4294966512 }
 0x14a   : > { %6679 = dma.done.wait (%p7798_p8), [#allocation22], 784   ;;  %p7799_p5 = pmov %p7794_p1 }
 0x14b   : > { %p7800_p9 = pmov %p7794_p1 }
 0x14c   : > { %6681 = vsyncadd (%p7799_p5), [#allocation22], 4294966512 }
 0x14d   : > { %6683 = dma.done.wait (%p7800_p9), [#allocation25], 1552   ;;  %p7801_p10 = pmov %p7794_p1 }
 0x14e   : > { %p7802_p11 = pmov %p7794_p1 }
 0x14f   : > { %6685 = vsyncadd (%p7801_p10), [#allocation25], 4294965744 }
 0x150   : > { %6687 = dma.done.wait (%p7802_p11), [#allocation28], 1040   ;;  %p7803_p12 = pmov %p7794_p1 }
 0x151   : > { %p7804_p2 = pmov %p7794_p1 }
 0x152   : > { %6689 = vsyncadd (%p7803_p12), [#allocation28], 4294966256 }
 0x153   : > { %6691 = dma.done.wait (%p7804_p2), [#allocation31], 1552   ;;  %p7805_p3 = pmov %p7794_p1 }
 0x154   : > { %p7806_p13 = pmov %p7794_p1 }
 0x155   : > { %6693 = vsyncadd (%p7805_p3), [#allocation31], 4294965744 }
 0x156   : > { %6695 = dma.done.wait (%p7806_p13), [#allocation34], 32   ;;  %p7807_p0 = pmov %p7794_p1 }
 0x158   : > { %6697 = vsyncadd (%p7807_p0), [#allocation34], 4294967264  ;;  %p7808_p1 = pmov %p7807_p0 }
 0x159   : > { %p7809_p4 = pmov %p7807_p0 }
 0x15a   : > { %6699 = dma.done.wait (%p7808_p1), [#allocation37], 2064  }
 0x15b   : > { %6701 = vsyncadd (%p7809_p4), [#allocation37], 4294965232  ;;  %p7810_p6 = pmov %p7807_p0 }
 0x15c   : > { %p7811_p7 = pmov %p7807_p0 }
 0x15d   : > { %6703 = dma.done.wait (%p7810_p6), [#allocation40], 32  }
 0x15e   : > { %6705 = vsyncadd (%p7811_p7), [#allocation40], 4294967264  ;;  %p7812_p8 = pmov %p7807_p0 }
 0x15f   : > { %p7813_p5 = pmov %p7807_p0 }
 0x160   : > { %6707 = dma.done.wait (%p7812_p8), [#allocation43], 2064  }
 0x161   : > { %6709 = vsyncadd (%p7813_p5), [#allocation43], 4294965232  ;;  %p7814_p9 = pmov %p7807_p0 }
 0x162   : > { %p7815_p10 = pmov %p7807_p0 }
 0x163   : > { %6711 = dma.done.wait (%p7814_p9), [#allocation46], 32  }
 0x164   : > { %6713 = vsyncadd (%p7815_p10), [#allocation46], 4294967264  ;;  %s7816_s11 = sld [smem:[#allocation59_spill]]  ;;  %p1172_p11 = scmp.lt.s32.totalorder %s6934_s10, 1  ;;  %v6772_v1 = vmov 0   ;;  %vm1212_vm0 = vcmask 7168  }
 0x165   : > { %6115 = vset.pattern.permute.xlu1 %v6772_v1  ;;  %6114 = vset.pattern.permute.xlu0 %v6772_v1  ;;  %s7817_s15 = sld [smem:[#allocation61_spill]]  ;;  %vm6774_vm1 = vmmov 0   ;;  %vm1950_vm2 = vcmask 122880   ;;  %vm1944_vm3 = vcmask 130048   ;;  %vm2262_vm4 = vcmask 125952  }
 0x166   : > { %s7824_s10 = smov (!%p1172_p11, %s6934_s10), 1  ;;  %s7818_s16 = sld [smem:[#allocation60_spill]]  ;;  %vm2813_vm5 = vcmask 253952   ;;  %vm2816_vm6 = vcmask 261120   ;;  %vm3268_vm7 = vcmask 258048   ;;  %vm3516_vm8 = vcmask 516096  }
 0x167   : > { %s5215_s23 = sshll.u32 %s7824_s10, 8  ;;  %s7819_s4 = sld [smem:[#allocation64_spill]]  ;;  %vm3519_vm9 = vcmask 520192   ;;  %vm3540_vm10 = vcmask 523264   ;;  %vm3960_vm11 = vcmask 518144   ;;  %vm4659_vm12 = vcmask 517120  }
 0x168   : > { %s7820_s27 = sld [smem:[#allocation68_spill]]  ;;  %s1179_s22 = scalar_lea.vmem %s6926_s5, %s7824_s10  ;;  %vm4762_vm13 = vcmask 0  }
 0x169   : > { %s7821_s2 = sld [smem:[#allocation69_spill]] }
 0x16a   : > { %s7159_s28 = scalar_lea.vmem %s7816_s11, %s5215_s23  ;;  %s7822_s18 = sld [smem:[#allocation72_spill]] }
 0x16b   : > { %v1180_v2 = vld [vmem:[%s7159_s28] sm:$0xff]  ;;  %v1181_v3 = vld [vmem:[%s7159_s28 + $0x8] sm:$0xff]  ;;  %v1182_v4 = vld [vmem:[%s7159_s28 + $0x10] sm:$0xff] }
 0x16c   : > { %v1183_v5 = vld [vmem:[%s7159_s28 + $0x18] sm:$0xff]  ;;  %v1184_v6 = vld [vmem:[%s7159_s28 + $0x20] sm:$0xff]  ;;  %v1185_v7 = vld [vmem:[%s7159_s28 + $0x28] sm:$0xff]  ;;  %1213 = vst.msk [vmem:[#allocation2] sm:$0xff] %vm1212_vm0, %v1180_v2 }
 0x16d   : > { %1214 = vst.msk [vmem:[#allocation2 + $0x8] sm:$0xff] %vm1212_vm0, %v1181_v3  ;;  %1215 = vst.msk [vmem:[#allocation2 + $0x10] sm:$0xff] %vm1212_vm0, %v1182_v4  ;;  %v1186_v8 = vld [vmem:[%s7159_s28 + $0x30] sm:$0xff]  ;;  %v1187_v9 = vld [vmem:[%s7159_s28 + $0x38] sm:$0xff] }
 0x16e   : > { %1216 = vst.msk [vmem:[#allocation2 + $0x18] sm:$0xff] %vm1212_vm0, %v1183_v5  ;;  %1217 = vst.msk [vmem:[#allocation2 + $0x20] sm:$0xff] %vm1212_vm0, %v1184_v6  ;;  %v1188_v10 = vld [vmem:[%s7159_s28 + $0x40] sm:$0xff]  ;;  %v1189_v11 = vld [vmem:[%s7159_s28 + $0x48] sm:$0xff] }
 0x16f   : > { %1218 = vst.msk [vmem:[#allocation2 + $0x28] sm:$0xff] %vm1212_vm0, %v1185_v7  ;;  %v1190_v12 = vld [vmem:[%s7159_s28 + $0x50] sm:$0xff]  ;;  %v1191_v13 = vld [vmem:[%s7159_s28 + $0x58] sm:$0xff]  ;;  %1219 = vst.msk [vmem:[#allocation2 + $0x30] sm:$0xff] %vm1212_vm0, %v1186_v8 }
 0x170   : > { %1220 = vst.msk [vmem:[#allocation2 + $0x38] sm:$0xff] %vm1212_vm0, %v1187_v9  ;;  %1221 = vst.msk [vmem:[#allocation2 + $0x40] sm:$0xff] %vm1212_vm0, %v1188_v10  ;;  %v1198_v14 = vld [vmem:[%s7159_s28 + $0x90] sm:$0xff]  ;;  %v1199_v15 = vld [vmem:[%s7159_s28 + $0x98] sm:$0xff] }
 0x171   : > { %1222 = vst.msk [vmem:[#allocation2 + $0x48] sm:$0xff] %vm1212_vm0, %v1189_v11  ;;  %1223 = vst.msk [vmem:[#allocation2 + $0x50] sm:$0xff] %vm1212_vm0, %v1190_v12  ;;  %v1200_v16 = vld [vmem:[%s7159_s28 + $0xa0] sm:$0xff]  ;;  %v1201_v17 = vld [vmem:[%s7159_s28 + $0xa8] sm:$0xff] }
 0x172   : > { %1224 = vst.msk [vmem:[#allocation2 + $0x58] sm:$0xff] %vm1212_vm0, %v1191_v13  ;;  %v1202_v18 = vld [vmem:[%s7159_s28 + $0xb0] sm:$0xff]  ;;  %v1203_v19 = vld [vmem:[%s7159_s28 + $0xb8] sm:$0xff]  ;;  %1231 = vst.msk [vmem:[#allocation2 + $0x90] sm:$0xff] %vm1212_vm0, %v1198_v14 }
 0x173   : > { %1232 = vst.msk [vmem:[#allocation2 + $0x98] sm:$0xff] %vm1212_vm0, %v1199_v15  ;;  %1233 = vst.msk [vmem:[#allocation2 + $0xa0] sm:$0xff] %vm1212_vm0, %v1200_v16  ;;  %v1192_v20 = vld [vmem:[%s7159_s28 + $0x60] sm:$0xff]  ;;  %v1193_v21 = vld [vmem:[%s7159_s28 + $0x68] sm:$0xff] }
 0x174   : > { %1234 = vst.msk [vmem:[#allocation2 + $0xa8] sm:$0xff] %vm1212_vm0, %v1201_v17  ;;  %1235 = vst.msk [vmem:[#allocation2 + $0xb0] sm:$0xff] %vm1212_vm0, %v1202_v18  ;;  %v1194_v22 = vld [vmem:[%s7159_s28 + $0x70] sm:$0xff]  ;;  %v1195_v23 = vld [vmem:[%s7159_s28 + $0x78] sm:$0xff] }
 0x175   : > { %1236 = vst.msk [vmem:[#allocation2 + $0xb8] sm:$0xff] %vm1212_vm0, %v1203_v19  ;;  %v1196_v24 = vld [vmem:[%s7159_s28 + $0x80] sm:$0xff]  ;;  %v1197_v25 = vld [vmem:[%s7159_s28 + $0x88] sm:$0xff]  ;;  %1225 = vst.msk [vmem:[#allocation2 + $0x60] sm:$0xff] %vm1212_vm0, %v1192_v20 }
 0x176   : > { %1226 = vst.msk [vmem:[#allocation2 + $0x68] sm:$0xff] %vm1212_vm0, %v1193_v21  ;;  %1227 = vst.msk [vmem:[#allocation2 + $0x70] sm:$0xff] %vm1212_vm0, %v1194_v22  ;;  %v1204_v26 = vld [vmem:[%s7159_s28 + $0xc0] sm:$0xff]  ;;  %v1205_v27 = vld [vmem:[%s7159_s28 + $0xc8] sm:$0xff] }
 0x177   : > { %1228 = vst.msk [vmem:[#allocation2 + $0x78] sm:$0xff] %vm1212_vm0, %v1195_v23  ;;  %1229 = vst.msk [vmem:[#allocation2 + $0x80] sm:$0xff] %vm1212_vm0, %v1196_v24  ;;  %v1206_v28 = vld [vmem:[%s7159_s28 + $0xd0] sm:$0xff]  ;;  %v1207_v31 = vld [vmem:[%s7159_s28 + $0xd8] sm:$0xff] }
 0x178   : > { %1230 = vst.msk [vmem:[#allocation2 + $0x88] sm:$0xff] %vm1212_vm0, %v1197_v25  ;;  %v1306_v29 = vld [vmem:[#allocation2 + $0x1] ss:$6 sm:$0xff]  ;;  %v1245_v30 = vld [vmem:[#allocation2] ss:$6 sm:$0xff]  ;;  %1237 = vst.msk [vmem:[#allocation2 + $0xc0] sm:$0xff] %vm1212_vm0, %v1204_v26 }
 0x179   : > { %1238 = vst.msk [vmem:[#allocation2 + $0xc8] sm:$0xff] %vm1212_vm0, %v1205_v27  ;;  %1239 = vst.msk [vmem:[#allocation2 + $0xd0] sm:$0xff] %vm1212_vm0, %v1206_v28  ;;  %1321 = vperm.xlu1 %6115, %v1306_v29   ;;  %1259 = vperm.xlu0 %6114, %v1245_v30   ;;  %v1308_v32 = vld [vmem:[#allocation2 + $0x31] ss:$6 sm:$0xff]  ;;  %v1247_v33 = vld [vmem:[#allocation2 + $0x30] ss:$6 sm:$0xff] }
 0x17a   : > { %1240 = vst.msk [vmem:[#allocation2 + $0xd8] sm:$0xff] %vm1212_vm0, %v1207_v31  ;;  %v1208_v34 = vld [vmem:[%s7159_s28 + $0xe0] sm:$0xff]  ;;  %v1209_v35 = vld [vmem:[%s7159_s28 + $0xe8] sm:$0xff]  ;;  %v1210_v42 = vld [vmem:[%s7159_s28 + $0xf0] sm:$0xff]  ;;  %v6773_v26 = vmov 0.0  }
 0x17b   : > { %1241 = vst.msk [vmem:[#allocation2 + $0xe0] sm:$0xff] %vm1212_vm0, %v1208_v34  ;;  %v1370_v36 = vld [vmem:[#allocation2 + $0x32] ss:$6 sm:$0xff]  ;;  %v1368_v37 = vld [vmem:[#allocation2 + $0x2] ss:$6 sm:$0xff]  ;;  %1242 = vst.msk [vmem:[#allocation2 + $0xe8] sm:$0xff] %vm1212_vm0, %v1209_v35  ;;  %5424 = vmatprep.subr.mxu0 %v6773_v26  ;;  %5437 = vmatprep.subr.mxu1 %v6773_v26 }
 0x17c   : > { %v1251_v38 = vld [vmem:[#allocation2 + $0x90] ss:$6 sm:$0xff]  ;;  %v1312_v40 = vld [vmem:[#allocation2 + $0x91] ss:$6 sm:$0xff]  ;;  %1243 = vst.msk [vmem:[#allocation2 + $0xf0] sm:$0xff] %vm1212_vm0, %v1210_v42  ;;  %5428 = vmatprep.mubr.msk.f32.mxu0 %vm6774_vm1, %v6773_v26  ;;  %5441 = vmatprep.mubr.msk.f32.mxu1 %vm6774_vm1, %v6773_v26 }
 0x17d   : > { %1326 = vperm.xlu1 %6115, %v1308_v32   ;;  %1264 = vperm.xlu0 %6114, %v1247_v33   ;;  %v1432_v43 = vld [vmem:[#allocation2 + $0x33] ss:$6 sm:$0xff]  ;;  %v1430_v44 = vld [vmem:[#allocation2 + $0x3] ss:$6 sm:$0xff]  ;;  %v1374_v46 = vld [vmem:[#allocation2 + $0x92] ss:$6 sm:$0xff] }
 0x17e   : > { %v1211_v45 = vld [vmem:[%s7159_s28 + $0xf8] sm:$0xff]  ;;  %v1958_v23 = vld [vmem:[%s7817_s15 + $0x8] sm:$0xff]  ;;  %v5103_v27 = vld [vmem:[%s7817_s15 + $0x10] sm:$0xff]  ;;  %2539 = vst.msk [vmem:[#allocation5] sm:$0x1] %vm1950_vm2, %v6773_v26 }
 0x17f   : > { %v1249_v39 = vld [vmem:[#allocation2 + $0x60] ss:$6 sm:$0xff]  ;;  %v1310_v41 = vld [vmem:[#allocation2 + $0x61] ss:$6 sm:$0xff]  ;;  %1244 = vst.msk [vmem:[#allocation2 + $0xf8] sm:$0xff] %vm1212_vm0, %v1211_v45  ;;  %5438 = vmatpush3.msra.mxu1 %v1958_v23 }
 0x180   : > { %v1372_v47 = vld [vmem:[#allocation2 + $0x62] ss:$6 sm:$0xff]  ;;  %v1436_v52 = vld [vmem:[#allocation2 + $0x93] ss:$6 sm:$0xff]  ;;  %v1434_v53 = vld [vmem:[#allocation2 + $0x63] ss:$6 sm:$0xff]  ;;  %5439 = vmatprep.subr.mxu1 %v6773_v26 }
 0x181   : > { %1388 = vperm.xlu1 %6115, %v1370_v36   ;;  %1383 = vperm.xlu0 %6114, %v1368_v37   ;;  %v1494_v48 = vld [vmem:[#allocation2 + $0x34] ss:$6 sm:$0xff]  ;;  %v1492_v49 = vld [vmem:[#allocation2 + $0x4] ss:$6 sm:$0xff]  ;;  %v1556_v54 = vld [vmem:[#allocation2 + $0x35] ss:$6 sm:$0xff] }
 0x182   : > { %v1314_v50 = vld [vmem:[#allocation2 + $0xc1] ss:$6 sm:$0xff]  ;;  %v1253_v51 = vld [vmem:[#allocation2 + $0xc0] ss:$6 sm:$0xff]  ;;  %2540 = vst.msk [vmem:[#allocation5 + $0xa] sm:$0x1] %vm1950_vm2, %v6773_v26 }
 0x183   : > { %v1554_v55 = vld [vmem:[#allocation2 + $0x5] ss:$6 sm:$0xff]  ;;  %v1496_v56 = vld [vmem:[#allocation2 + $0x64] ss:$6 sm:$0xff]  ;;  %v1498_v59 = vld [vmem:[#allocation2 + $0x94] ss:$6 sm:$0xff] }
 0x184   : > { %v1376_v57 = vld [vmem:[#allocation2 + $0xc2] ss:$6 sm:$0xff]  ;;  %v1438_v60 = vld [vmem:[#allocation2 + $0xc3] ss:$6 sm:$0xff]  ;;  %2814 = vst.msk [vmem:[#allocation6] sm:$0x1] %vm2813_vm5, %v6773_v26 }
 0x185   : > { %1274 = vperm.xlu1 %6115, %v1251_v38   ;;  %1269 = vperm.xlu0 %6114, %v1249_v39   ;;  %v1616_v58 = vld [vmem:[#allocation2 + $0x6] ss:$6 sm:$0xff]  ;;  %v1618_v61 = vld [vmem:[#allocation2 + $0x36] ss:$6 sm:$0xff]  ;;  %v1560_v62 = vld [vmem:[#allocation2 + $0x95] ss:$6 sm:$0xff] }
 0x186   : > { %v1558_v63 = vld [vmem:[#allocation2 + $0x65] ss:$6 sm:$0xff]  ;;  %v1620_v2 = vld [vmem:[#allocation2 + $0x66] ss:$6 sm:$0xff]  ;;  %v1622_v5 = vld [vmem:[#allocation2 + $0x96] ss:$6 sm:$0xff] }
 0x187   : > { %v1680_v0 = vld [vmem:[#allocation2 + $0x37] ss:$6 sm:$0xff]  ;;  %v1678_v1 = vld [vmem:[#allocation2 + $0x7] ss:$6 sm:$0xff]  ;;  %v1500_v3 = vld [vmem:[#allocation2 + $0xc4] ss:$6 sm:$0xff] }
 0x188   : > { %v1740_v4 = vld [vmem:[#allocation2 + $0x8] ss:$6 sm:$0xff]  ;;  %v1562_v6 = vld [vmem:[#allocation2 + $0xc5] ss:$6 sm:$0xff]  ;;  %v1742_v7 = vld [vmem:[#allocation2 + $0x38] ss:$6 sm:$0xff] }
 0x189   : > { %1336 = vperm.xlu1 %6115, %v1312_v40   ;;  %1331 = vperm.xlu0 %6114, %v1310_v41   ;;  %v1684_v8 = vld [vmem:[#allocation2 + $0x97] ss:$6 sm:$0xff]  ;;  %v1682_v9 = vld [vmem:[#allocation2 + $0x67] ss:$6 sm:$0xff]  ;;  %v1744_v12 = vld [vmem:[#allocation2 + $0x68] ss:$6 sm:$0xff] }
 0x18a   : > { %v1804_v10 = vld [vmem:[#allocation2 + $0x39] ss:$6 sm:$0xff]  ;;  %v1802_v11 = vld [vmem:[#allocation2 + $0x9] ss:$6 sm:$0xff]  ;;  %v1624_v13 = vld [vmem:[#allocation2 + $0xc6] ss:$6 sm:$0xff] }
 0x18b   : > { %v1864_v14 = vld [vmem:[#allocation2 + $0xa] ss:$6 sm:$0xff]  ;;  %v1866_v17 = vld [vmem:[#allocation2 + $0x3a] ss:$6 sm:$0xff]  ;;  %v1686_v18 = vld [vmem:[#allocation2 + $0xc7] ss:$6 sm:$0xff] }
 0x18c   : > { %v1746_v15 = vld [vmem:[#allocation2 + $0x98] ss:$6 sm:$0xff]  ;;  %v1316_v19 = vld [vmem:[#allocation2 + $0xf1] ss:$6 sm:$0x1] }
 0x18d   : > { %1450 = vperm.xlu1 %6115, %v1432_v43   ;;  %1445 = vperm.xlu0 %6114, %v1430_v44   ;;  %v1255_v16 = vld [vmem:[#allocation2 + $0xf0] ss:$6 sm:$0x1]  ;;  %v1808_v20 = vld [vmem:[#allocation2 + $0x99] ss:$6 sm:$0xff] }
 0x18e   : > { %v1806_v21 = vld [vmem:[#allocation2 + $0x69] ss:$6 sm:$0xff]  ;;  %v1748_v24 = vld [vmem:[#allocation2 + $0xc8] ss:$6 sm:$0xff]  ;;  %v7240_v38 = vld [vmem:[#allocation16] ss:$0 sm:$0xff] }
 0x18f   : > { %v5104_v22 = vld [vmem:[%s7817_s15 + $0x18] sm:$0xff]  ;;  %v1378_v25 = vld [vmem:[#allocation2 + $0xf2] ss:$6 sm:$0x1]  ;;  %v1957_v28 = vld [vmem:[%s7817_s15] sm:$0xff] }
 0x190   : > { %5425 = vmatpush3.msra.mxu0 %v5104_v22  ;;  %v1870_v29 = vld [vmem:[#allocation2 + $0x9a] ss:$6 sm:$0xff]  ;;  %v1868_v30 = vld [vmem:[#allocation2 + $0x6a] ss:$6 sm:$0xff]  ;;  %5440 = vmatpush3.msra.mxu1 %v1957_v28  ;;  %v1810_v31 = vld [vmem:[#allocation2 + $0xc9] ss:$6 sm:$0xff] }
 0x191   : > { %1398 = vperm.xlu1 %6115, %v1374_v46   ;;  %1393 = vperm.xlu0 %6114, %v1372_v47   ;;  %v1440_v32 = vld [vmem:[#allocation2 + $0xf3] ss:$6 sm:$0x1]  ;;  %v1872_v33 = vld [vmem:[#allocation2 + $0xca] ss:$6 sm:$0xff] }
 0x192   : > { %5426 = vmatprep.subr.mxu0 %v6773_v26  ;;  %v1502_v34 = vld [vmem:[#allocation2 + $0xf4] ss:$6 sm:$0x1]  ;;  %v1626_v35 = vld [vmem:[#allocation2 + $0xf6] ss:$6 sm:$0x1] }
 0x193   : > { %5427 = vmatpush3.msra.mxu0 %v5103_v27  ;;  %v1564_v36 = vld [vmem:[#allocation2 + $0xf5] ss:$6 sm:$0x1]  ;;  %v7238_v37 = vld [vmem:[#allocation16 + $0x1] ss:$0 sm:$0xff] }
 0x194   : > { %5450 = vmatprep.subr.mxu0 %v6773_v26  ;;  %v1750_v39 = vld [vmem:[#allocation2 + $0xf8] ss:$6 sm:$0x1]  ;;  %v1688_v40 = vld [vmem:[#allocation2 + $0xf7] ss:$6 sm:$0x1] }
 0x195   : > { %1512 = vperm.xlu1 %6115, %v1494_v48   ;;  %1507 = vperm.xlu0 %6114, %v1492_v49   ;;  %v1874_v45 = vld [vmem:[#allocation2 + $0xfa] ss:$6 sm:$0x1]  ;;  %v1812_v46 = vld [vmem:[#allocation2 + $0xf9] ss:$6 sm:$0x1] }
 0x196   : > { %2815 = vst.msk [vmem:[#allocation6 + $0xa] sm:$0x1] %vm2813_vm5, %v6773_v26  ;;  %3095 = vst.msk [vmem:[#allocation7] sm:$0x1] %vm2813_vm5, %v6773_v26 }
 0x197   : > { %3266 = vst.msk [vmem:[#allocation8] sm:$0x1] %vm2813_vm5, %v6773_v26  ;;  %3267 = vst.msk [vmem:[#allocation8 + $0x6] sm:$0x1] %vm2813_vm5, %v6773_v26 }
 0x198   : > { %3517 = vst.msk [vmem:[#allocation9] sm:$0x1] %vm3516_vm8, %v6773_v26  ;;  %3518 = vst.msk [vmem:[#allocation9 + $0x6] sm:$0x1] %vm3516_vm8, %v6773_v26 }
 0x199   : > { %1341 = vperm.xlu1 %6115, %v1314_v50   ;;  %1279 = vperm.xlu0 %6114, %v1253_v51   ;;  %3780 = vst.msk [vmem:[#allocation10] sm:$0x1] %vm3516_vm8, %v6773_v26  ;;  %3958 = vst.msk [vmem:[#allocation11] sm:$0x1] %vm3516_vm8, %v6773_v26 }
 0x19a   : > { %3959 = vst.msk [vmem:[#allocation11 + $0x4] sm:$0x1] %vm3516_vm8, %v6773_v26  ;;  %4220 = vst.msk [vmem:[#allocation12] sm:$0x1] %vm3516_vm8, %v6773_v26 }
 0x19b   : > { %4221 = vst.msk [vmem:[#allocation12 + $0x4] sm:$0x1] %vm3516_vm8, %v6773_v26  ;;  %4481 = vst.msk [vmem:[#allocation13] sm:$0x1] %vm3516_vm8, %v6773_v26 }
 0x19d   : > { %1460 = vperm.xlu1 %6115, %v1436_v52   ;;  %1455 = vperm.xlu0 %6114, %v1434_v53   ;;  %v7250_v52 = vld [vmem:[#allocation16 + $0x2] ss:$0 sm:$0xff] }
 0x1a1   : > { %1574 = vperm.xlu1 %6115, %v1556_v54   ;;  %1569 = vperm.xlu0 %6114, %v1554_v55  }
 0x1a5   : > { %1517 = vperm.xlu1 %6115, %v1496_v56   ;;  %1403 = vperm.xlu0 %6114, %v1376_v57  }
 0x1a9   : > { %1631 = vperm.xlu1 %6115, %v1616_v58   ;;  %1522 = vperm.xlu0 %6114, %v1498_v59  }
 0x1ad   : > { %1465 = vperm.xlu1 %6115, %v1438_v60   ;;  %1636 = vperm.xlu0 %6114, %v1618_v61  }
 0x1b1   : > { %1584 = vperm.xlu1 %6115, %v1560_v62   ;;  %1579 = vperm.xlu0 %6114, %v1558_v63  }
 0x1b5   : > { %1698 = vperm.xlu1 %6115, %v1680_v0   ;;  %1693 = vperm.xlu0 %6114, %v1678_v1  }
 0x1b9   : > { %1641 = vperm.xlu1 %6115, %v1620_v2   ;;  %1527 = vperm.xlu0 %6114, %v1500_v3  }
 0x1bd   : > { %1755 = vperm.xlu1 %6115, %v1740_v4   ;;  %1646 = vperm.xlu0 %6114, %v1622_v5  }
 0x1c1   : > { %1589 = vperm.xlu1 %6115, %v1562_v6   ;;  %1760 = vperm.xlu0 %6114, %v1742_v7  }
 0x1c5   : > { %1708 = vperm.xlu1 %6115, %v1684_v8   ;;  %1703 = vperm.xlu0 %6114, %v1682_v9  }
 0x1c9   : > { %1822 = vperm.xlu1 %6115, %v1804_v10   ;;  %1817 = vperm.xlu0 %6114, %v1802_v11  }
 0x1cd   : > { %1765 = vperm.xlu1 %6115, %v1744_v12   ;;  %1651 = vperm.xlu0 %6114, %v1624_v13  }
 0x1d1   : > { %1879 = vperm.xlu1 %6115, %v1864_v14   ;;  %1770 = vperm.xlu0 %6114, %v1746_v15  }
 0x1d5   : > { %1284 = vperm.xlu1 %6115, %v1255_v16   ;;  %1884 = vperm.xlu0 %6114, %v1866_v17  }
 0x1d9   : > { %1713 = vperm.xlu1 %6115, %v1686_v18   ;;  %1346 = vperm.xlu0 %6114, %v1316_v19  }
 0x1dd   : > { %1832 = vperm.xlu1 %6115, %v1808_v20   ;;  %1827 = vperm.xlu0 %6114, %v1806_v21  }
 0x1e1   : > { %1775 = vperm.xlu1 %6115, %v1748_v24   ;;  %1408 = vperm.xlu0 %6114, %v1378_v25  }
 0x1e5   : > { %1894 = vperm.xlu1 %6115, %v1870_v29   ;;  %1889 = vperm.xlu0 %6114, %v1868_v30  }
 0x1e9   : > { %1837 = vperm.xlu1 %6115, %v1810_v31   ;;  %1470 = vperm.xlu0 %6114, %v1440_v32  }
 0x1ed   : > { %1899 = vperm.xlu1 %6115, %v1872_v33   ;;  %1532 = vperm.xlu0 %6114, %v1502_v34  }
 0x1f1   : > { %1656 = vperm.xlu1 %6115, %v1626_v35   ;;  %1594 = vperm.xlu0 %6114, %v1564_v36  }
 0x1f4   : > { %v1322_v41 = vpop.permute.xlu1 %1321  ;;  %v1260_v42 = vpop.permute.xlu0 %1259 }
 0x1f5   : > { %v1355_v43 = vmul.f32 %v7238_v37, %v1322_v41  ;;  %v1293_v44 = vmul.f32 %v7240_v38, %v1260_v42  ;;  %1780 = vperm.xlu1 %6115, %v1750_v39   ;;  %1718 = vperm.xlu0 %6114, %v1688_v40   ;;  %v7292_v42 = vld [vmem:[#allocation16 + $0x3] ss:$0 sm:$0xff] }
 0x1f7   : > { %v1361_v47 = vadd.f32 %v1355_v43, %v1293_v44  ;;  %v7294_v43 = vld [vmem:[#allocation16 + $0x4] ss:$0 sm:$0xff] }
 0x1f8   : > { %v1327_v48 = vpop.permute.xlu1 %1326  ;;  %v1265_v49 = vpop.permute.xlu0 %1264 }
 0x1f9   : > { %v1356_v50 = vmul.f32 %v7238_v37, %v1327_v48  ;;  %v1294_v51 = vmul.f32 %v7240_v38, %v1265_v49  ;;  %1904 = vperm.xlu1 %6115, %v1874_v45   ;;  %1842 = vperm.xlu0 %6114, %v1812_v46   ;;  %v7302_v49 = vld [vmem:[#allocation16 + $0x6] ss:$0 sm:$0xff] }
 0x1fb   : > { %v1362_v53 = vadd.f32 %v1356_v50, %v1294_v51 }
 0x1fc   : > { %v1389_v54 = vpop.permute.xlu1 %1388  ;;  %v1384_v55 = vpop.permute.xlu0 %1383 }
 0x1fd   : > { %v1418_v56 = vmul.f32 %v7250_v52, %v1389_v54  ;;  %v1417_v57 = vmul.f32 %v7250_v52, %v1384_v55 }
 0x1ff   : > { %v7254_v58 = vadd.f32 %v1418_v56, %v1362_v53  ;;  %v1423_v59 = vadd.f32 %v1417_v57, %v1361_v47  ;;  %v7299_v47 = vld [vmem:[#allocation16 + $0x5] ss:$0 sm:$0xff]  ;;  %v7310_v56 = vld [vmem:[#allocation16 + $0x7] ss:$0 sm:$0xff] }
 0x200   : > { %v1275_v60 = vpop.permute.xlu1 %1274  ;;  %v1270_v61 = vpop.permute.xlu0 %1269 }
 0x201   : > { %v1296_v0 = vmul.f32 %v7240_v38, %v1275_v60  ;;  %v1295_v1 = vmul.f32 %v7240_v38, %v1270_v61 }
 0x204   : > { %v1337_v62 = vpop.permute.xlu1 %1336  ;;  %v1332_v63 = vpop.permute.xlu0 %1331 }
 0x205   : > { %v1358_v2 = vmul.f32 %v7238_v37, %v1337_v62  ;;  %v1357_v3 = vmul.f32 %v7238_v37, %v1332_v63  ;;  %v7314_v62 = vld [vmem:[#allocation16 + $0x8] ss:$0 sm:$0xff] }
 0x207   : > { %v1364_v4 = vadd.f32 %v1358_v2, %v1296_v0  ;;  %v1363_v5 = vadd.f32 %v1357_v3, %v1295_v1 }
 0x208   : > { %v1451_v6 = vpop.permute.xlu1 %1450  ;;  %v1446_v7 = vpop.permute.xlu0 %1445 }
 0x209   : > { %v1479_v46 = vmul.f32 %v7292_v42, %v1446_v7  ;;  %v1480_v53 = vmul.f32 %v7292_v42, %v1451_v6 }
 0x20b   : > { %v1485_v54 = vadd.f32 %v1479_v46, %v1423_v59  ;;  %v1486_v1 = vadd.f32 %v1480_v53, %v7254_v58  ;;  %v7333_v46 = vld [vmem:[%s7818_s16] ss:$0 sm:$0xff] }
 0x20c   : > { %v1399_v8 = vpop.permute.xlu1 %1398  ;;  %v1394_v9 = vpop.permute.xlu0 %1393 }
 0x20d   : > { %v1420_v10 = vmul.f32 %v7250_v52, %v1399_v8  ;;  %v1419_v11 = vmul.f32 %v7250_v52, %v1394_v9 }
 0x20f   : > { %v7262_v12 = vadd.f32 %v1420_v10, %v1364_v4  ;;  %v7264_v13 = vadd.f32 %v1419_v11, %v1363_v5  ;;  %v7319_v4 = vld [vmem:[#allocation16 + $0x9] ss:$0 sm:$0xff] }
 0x210   : > { %v1513_v14 = vpop.permute.xlu1 %1512  ;;  %v1508_v15 = vpop.permute.xlu0 %1507 }
 0x211   : > { %v1541_v48 = vmul.f32 %v7294_v43, %v1508_v15  ;;  %v1542_v57 = vmul.f32 %v7294_v43, %v1513_v14 }
 0x213   : > { %v1547_v60 = vadd.f32 %v1541_v48, %v1485_v54  ;;  %v1548_v5 = vadd.f32 %v1542_v57, %v1486_v1 }
 0x214   : > { %v1342_v16 = vpop.permute.xlu1 %1341  ;;  %v1280_v17 = vpop.permute.xlu0 %1279 }
 0x215   : > { %v1359_v18 = vmul.f32 %v7238_v37, %v1342_v16  ;;  %v1297_v19 = vmul.f32 %v7240_v38, %v1280_v17  ;;  %v7327_v16 = vld [vmem:[#allocation16 + $0xa] ss:$0 sm:$0xff] }
 0x217   : > { %v7268_v20 = vadd.f32 %v1359_v18, %v1297_v19 }
 0x218   : > { %v7270_v21 = vpop.permute.xlu1 %1460  ;;  %v7272_v22 = vpop.permute.xlu0 %1455 }
 0x219   : > { %v1482_v53 = vmul.f32 %v7292_v42, %v7270_v21 }
 0x21c   : > { %v1575_v23 = vpop.permute.xlu1 %1574  ;;  %v1570_v24 = vpop.permute.xlu0 %1569 }
 0x21d   : > { %v1603_v55 = vmul.f32 %v7299_v47, %v1570_v24  ;;  %v1604_v2 = vmul.f32 %v7299_v47, %v1575_v23 }
 0x21f   : > { %v1609_v3 = vadd.f32 %v1603_v55, %v1547_v60  ;;  %v1610_v11 = vadd.f32 %v1604_v2, %v1548_v5  ;;  %v1488_v2 = vadd.f32 %v1482_v53, %v7262_v12 }
 0x220   : > { %v7274_v25 = vpop.permute.xlu1 %1517  ;;  %v7276_v27 = vpop.permute.xlu0 %1403 }
 0x224   : > { %v1632_v28 = vpop.permute.xlu1 %1631  ;;  %v7278_v29 = vpop.permute.xlu0 %1522 }
 0x225   : > { %v1665_v61 = vmul.f32 %v7302_v49, %v1632_v28 }
 0x227   : > { %v1671_v6 = vadd.f32 %v1665_v61, %v1609_v3 }
 0x228   : > { %v7280_v30 = vpop.permute.xlu1 %1465  ;;  %v1637_v31 = vpop.permute.xlu0 %1636 }
 0x229   : > { %v1666_v7 = vmul.f32 %v7302_v49, %v1637_v31 }
 0x22b   : > { %v1672_v17 = vadd.f32 %v1666_v7, %v1610_v11 }
 0x22c   : > { %v7282_v32 = vpop.permute.xlu1 %1584  ;;  %v7284_v33 = vpop.permute.xlu0 %1579 }
 0x22d   : > { %v1606_v3 = vmul.f32 %v7299_v47, %v7282_v32 }
 0x230   : > { %v1699_v34 = vpop.permute.xlu1 %1698  ;;  %v1694_v35 = vpop.permute.xlu0 %1693 }
 0x231   : > { %v1727_v59 = vmul.f32 %v7310_v56, %v1694_v35  ;;  %v1728_v58 = vmul.f32 %v7310_v56, %v1699_v34 }
 0x233   : > { %v1733_v14 = vadd.f32 %v1727_v59, %v1671_v6  ;;  %v1734_v28 = vadd.f32 %v1728_v58, %v1672_v17  ;;  %v1605_v6 = vmul.f32 %v7299_v47, %v7284_v33 }
 0x234   : > { %v7286_v36 = vpop.permute.xlu1 %1641  ;;  %v7288_v39 = vpop.permute.xlu0 %1527 }
 0x235   : > { %v1667_v32 = vmul.f32 %v7302_v49, %v7286_v36  ;;  %v1545_v36 = vmul.f32 %v7294_v43, %v7288_v39 }
 0x238   : > { %v1756_v40 = vpop.permute.xlu1 %1755  ;;  %v7290_v41 = vpop.permute.xlu0 %1646 }
 0x239   : > { %v1789_v8 = vmul.f32 %v7314_v62, %v1756_v40  ;;  %v1668_v12 = vmul.f32 %v7302_v49, %v7290_v41 }
 0x23b   : > { %v1795_v18 = vadd.f32 %v1789_v8, %v1733_v14 }
 0x23c   : > { %v7296_v44 = vpop.permute.xlu1 %1589  ;;  %v1761_v45 = vpop.permute.xlu0 %1760 }
 0x23d   : > { %v1790_v19 = vmul.f32 %v7314_v62, %v1761_v45  ;;  %v1481_v45 = vmul.f32 %v7292_v42, %v7272_v22 }
 0x23f   : > { %v1796_v34 = vadd.f32 %v1790_v19, %v1734_v28  ;;  %v1487_v5 = vadd.f32 %v1481_v45, %v7264_v13  ;;  %v1483_v13 = vmul.f32 %v7292_v42, %v7280_v30  ;;  %v1607_v28 = vmul.f32 %v7299_v47, %v7296_v44 }
 0x240   : > { %v7304_v50 = vpop.permute.xlu1 %1708  ;;  %v7306_v51 = vpop.permute.xlu0 %1703 }
 0x241   : > { %v1730_v58 = vmul.f32 %v7310_v56, %v7304_v50 }
 0x244   : > { %v1823_v63 = vpop.permute.xlu1 %1822  ;;  %v1818_v0 = vpop.permute.xlu0 %1817 }
 0x245   : > { %v1851_v15 = vmul.f32 %v7319_v4, %v1818_v0  ;;  %v1852_v31 = vmul.f32 %v7319_v4, %v1823_v63  ;;  %v1544_v63 = vmul.f32 %v7294_v43, %v7278_v29  ;;  %v1543_v0 = vmul.f32 %v7294_v43, %v7274_v25 }
 0x246   : > { %v1421_v25 = vmul.f32 %v7250_v52, %v7276_v27  ;;  %v1729_v27 = vmul.f32 %v7310_v56, %v7306_v51 }
 0x247   : > { %v1857_v35 = vadd.f32 %v1851_v15, %v1795_v18  ;;  %v1858_v57 = vadd.f32 %v1852_v31, %v1796_v34  ;;  %v1550_v7 = vadd.f32 %v1544_v63, %v1488_v2  ;;  %v1549_v8 = vadd.f32 %v1543_v0, %v1487_v5  ;;  %v5112_v63 = vld [vmem:[%s7817_s15 + $0x28] sm:$0xff] }
 0x248   : > { %v1766_v9 = vpop.permute.xlu1 %1765  ;;  %v7323_v10 = vpop.permute.xlu0 %1651  ;;  %v1427_v41 = vadd.f32 %v1421_v25, %v7268_v20 }
 0x249   : > { %v1612_v33 = vadd.f32 %v1606_v3, %v1550_v7  ;;  %v1611_v17 = vadd.f32 %v1605_v6, %v1549_v8  ;;  %v5111_v3 = vld [vmem:[%s7817_s15 + $0x20] sm:$0xff] }
 0x24a   : > { %v1489_v50 = vadd.f32 %v1483_v13, %v1427_v41 }
 0x24b   : > { %v1674_v18 = vadd.f32 %v1668_v12, %v1612_v33  ;;  %v1673_v19 = vadd.f32 %v1667_v32, %v1611_v17 }
 0x24c   : > { %v1880_v23 = vpop.permute.xlu1 %1879  ;;  %v1771_v24 = vpop.permute.xlu0 %1770  ;;  %v1551_v39 = vadd.f32 %v1545_v36, %v1489_v50 }
 0x24d   : > { %v1913_v40 = vmul.f32 %v7327_v16, %v1880_v23  ;;  %v1792_v30 = vmul.f32 %v7314_v62, %v1771_v24  ;;  %v1791_v23 = vmul.f32 %v7314_v62, %v1766_v9  ;;  %v1736_v31 = vadd.f32 %v1730_v58, %v1674_v18 }
 0x24e   : > { %v1735_v20 = vadd.f32 %v1729_v27, %v1673_v19  ;;  %v1669_v24 = vmul.f32 %v7302_v49, %v7323_v10  ;;  %v1613_v9 = vadd.f32 %v1607_v28, %v1551_v39 }
 0x24f   : > { %v1919_v48 = vadd.f32 %v1913_v40, %v1857_v35 }
 0x250   : > { %v7337_v54 = vpop.permute.xlu1 %1284  ;;  %v1885_v55 = vpop.permute.xlu0 %1884  ;;  %v1797_v53 = vadd.f32 %v1791_v23, %v1735_v20  ;;  %v1675_v10 = vadd.f32 %v1669_v24, %v1613_v9 }
 0x251   : > { %v1932_v60 = vadd.f32 %v7333_v46, %v1919_v48  ;;  %v1914_v61 = vmul.f32 %v7327_v16, %v1885_v55  ;;  %v1798_v48 = vadd.f32 %v1792_v30, %v1736_v31 }
 0x253   : > { %v1938_v1 = vmax.f32 %v1932_v60, 0.0  ;;  %v1920_v21 = vadd.f32 %v1914_v61, %v1858_v57 }
 0x254   : > { %v1714_v22 = vpop.permute.xlu1 %1713  ;;  %v1347_v59 = vpop.permute.xlu0 %1346 }
 0x255   : > { %1945 = vst.msk [vmem:[#allocation3] sm:$0xff] %vm1944_vm3, %v1938_v1  ;;  %v1933_v29 = vadd.f32 %v7333_v46, %v1920_v21  ;;  %v1731_v55 = vmul.f32 %v7310_v56, %v1714_v22  ;;  %v1360_v2 = vmul.f32 %v7238_v37, %v1347_v59 }
 0x257   : > { %v1939_v11 = vmax.f32 %v1933_v29, 0.0  ;;  %v1298_v29 = vmul.f32 %v7240_v38, %v7337_v54  ;;  %v1737_v25 = vadd.f32 %v1731_v55, %v1675_v10 }
 0x258   : > { %v1833_v14 = vpop.permute.xlu1 %1832  ;;  %v1828_v15 = vpop.permute.xlu0 %1827 }
 0x259   : > { %1946 = vst.msk [vmem:[#allocation3 + $0x8] sm:$0xff] %vm1944_vm3, %v1939_v11  ;;  %v1854_v51 = vmul.f32 %v7319_v4, %v1833_v14  ;;  %v1853_v34 = vmul.f32 %v7319_v4, %v1828_v15  ;;  %v1366_v11 = vadd.f32 %v1360_v2, %v1298_v29 }
 0x25b   : > { %v1860_v44 = vadd.f32 %v1854_v51, %v1798_v48  ;;  %v1859_v0 = vadd.f32 %v1853_v34, %v1797_v53 }
 0x25c   : > { %v1776_v35 = vpop.permute.xlu1 %1775  ;;  %v1409_v40 = vpop.permute.xlu0 %1408 }
 0x25d   : > { %v1793_v22 = vmul.f32 %v7314_v62, %v1776_v35  ;;  %v1422_v37 = vmul.f32 %v7250_v52, %v1409_v40 }
 0x25f   : > { %v1799_v13 = vadd.f32 %v1793_v22, %v1737_v25  ;;  %v1428_v15 = vadd.f32 %v1422_v37, %v1366_v11 }
 0x260   : > { %v1895_v45 = vpop.permute.xlu1 %1894  ;;  %v1890_v57 = vpop.permute.xlu0 %1889  ;;  %v1960_v60 = vld [vmem:[#allocation3 + $0x1] ss:$2 sm:$0xff]  ;;  %v1952_v61 = vld [vmem:[#allocation3] ss:$2 sm:$0xff] }
 0x261   : > { %v1916_v1 = vmul.f32 %v7327_v16, %v1895_v45  ;;  %v1915_v21 = vmul.f32 %v7327_v16, %v1890_v57  ;;  %5429 = vmatmul.mubr.msk.f32.vlgmr.msra.gmra.mxu0 %vm1944_vm3, %v1960_v60  ;;  %5442 = vmatmul.mubr.msk.f32.vlgmr.msra.gmra.mxu1 %vm1944_vm3, %v1952_v61  ;;  %v2275_v61 = vld [vmem:[#allocation20 + $0x18] sm:$0xff] }
 0x262   : > { %5431 = vmatprep.mubr.msk.f32.mxu0 %vm6774_vm1, %v6773_v26  ;;  %5444 = vmatprep.mubr.msk.f32.mxu1 %vm6774_vm1, %v6773_v26 }
 0x263   : > { %v1922_v5 = vadd.f32 %v1916_v1, %v1860_v44  ;;  %v1921_v6 = vadd.f32 %v1915_v21, %v1859_v0  ;;  %5451 = vmatpush3.msra.mxu0 %v5112_v63  ;;  %5463 = vmatprep.subr.mxu1 %v2275_v61  ;;  %v2268_v63 = vld [vmem:[#allocation20 + $0x8] sm:$0xff] }
 0x264   : > { %v1838_v7 = vpop.permute.xlu1 %1837  ;;  %v1471_v12 = vpop.permute.xlu0 %1470  ;;  %5452 = vmatprep.subr.mxu0 %v6773_v26  ;;  %5464 = vmatpush3.msra.mxu1 %v2275_v61 }
 0x265   : > { %v1935_v59 = vadd.f32 %v7333_v46, %v1922_v5  ;;  %v1934_v8 = vadd.f32 %v7333_v46, %v1921_v6  ;;  %v1855_v32 = vmul.f32 %v7319_v4, %v1838_v7  ;;  %5453 = vmatpush3.msra.mxu0 %v5111_v3  ;;  %v1484_v38 = vmul.f32 %v7292_v42, %v1471_v12 }
 0x267   : > { %v1941_v33 = vmax.f32 %v1935_v59, 0.0  ;;  %v1940_v58 = vmax.f32 %v1934_v8, 0.0  ;;  %v1861_v52 = vadd.f32 %v1855_v32, %v1799_v13  ;;  %v1490_v41 = vadd.f32 %v1484_v38, %v1428_v15  ;;  %v5116_v59 = vld [vmem:[#allocation18] ss:$0 sm:$0xff] }
 0x268   : > { %v1900_v54 = vpop.permute.xlu1 %1899  ;;  %v1533_v14 = vpop.permute.xlu0 %1532 }
 0x269   : > { %1948 = vst.msk [vmem:[#allocation3 + $0x18] sm:$0xff] %vm1944_vm3, %v1941_v33  ;;  %1947 = vst.msk [vmem:[#allocation3 + $0x10] sm:$0xff] %vm1944_vm3, %v1940_v58  ;;  %v1917_v17 = vmul.f32 %v7327_v16, %v1900_v54  ;;  %v1546_v27 = vmul.f32 %v7294_v43, %v1533_v14 }
 0x26b   : > { %v1923_v36 = vadd.f32 %v1917_v17, %v1861_v52  ;;  %v1552_v23 = vadd.f32 %v1546_v27, %v1490_v41 }
 0x26c   : > { %v1657_v18 = vpop.permute.xlu1 %1656  ;;  %v1595_v30 = vpop.permute.xlu0 %1594 }
 0x26d   : > { %v1936_v19 = vadd.f32 %v7333_v46, %v1923_v36  ;;  %v1608_v42 = vmul.f32 %v7299_v47, %v1595_v30  ;;  %v1670_v28 = vmul.f32 %v7302_v49, %v1657_v18 }
 0x26f   : > { %v1942_v50 = vmax.f32 %v1936_v19, 0.0  ;;  %v1614_v31 = vadd.f32 %v1608_v42, %v1552_v23  ;;  %v2267_v23 = vld [vmem:[#allocation20] sm:$0xff] }
 0x270   : > { %v1781_v51 = vpop.permute.xlu1 %1780  ;;  %v1719_v35 = vpop.permute.xlu0 %1718  ;;  %v1962_v40 = vld [vmem:[#allocation3 + $0x11] ss:$2 sm:$0xff]  ;;  %v1954_v20 = vld [vmem:[#allocation3 + $0x10] ss:$2 sm:$0xff] }
 0x271   : > { %1949 = vst.msk [vmem:[#allocation3 + $0x20] sm:$0xff] %vm1944_vm3, %v1942_v50  ;;  %v1676_v43 = vadd.f32 %v1670_v28, %v1614_v31  ;;  %v1732_v34 = vmul.f32 %v7310_v56, %v1719_v35  ;;  %5432 = vmatmul.mubr.msk.f32.gmra.mxu0 %vm1944_vm3, %v1962_v40  ;;  %5445 = vmatmul.mubr.msk.f32.gmra.mxu1 %vm1944_vm3, %v1954_v20  ;;  %v2147_v57 = vld [vmem:[#allocation3 + $0x2] ss:$2 sm:$0xff]  ;;  %v2443_v31 = vld [vmem:[#allocation20 + $0x20] sm:$0xff] }
 0x272   : > { %5434 = vmatprep.mubr.msk.f32.mxu0 %vm6774_vm1, %v6773_v26  ;;  %5447 = vmatprep.mubr.msk.f32.mxu1 %vm6774_vm1, %v6773_v26  ;;  %v1794_v47 = vmul.f32 %v7314_v62, %v1781_v51  ;;  %v2444_v50 = vld [vmem:[#allocation20 + $0x28] sm:$0xff] }
 0x273   : > { %v1738_v49 = vadd.f32 %v1732_v34, %v1676_v43  ;;  %v2551_v40 = vld [vmem:[#allocation23 + $0x18] sm:$0xff]  ;;  %v2550_v20 = vld [vmem:[#allocation23 + $0x10] sm:$0xff]  ;;  %v2546_v43 = vld [vmem:[#allocation23 + $0x8] sm:$0xff] }
 0x274   : > { %v1905_v39 = vpop.permute.xlu1 %1904  ;;  %v1843_v24 = vpop.permute.xlu0 %1842  ;;  %5484 = vmatprep.subr.mxu0 %v2551_v40  ;;  %v2545_v34 = vld [vmem:[#allocation23] sm:$0xff] }
 0x275   : > { %v1800_v48 = vadd.f32 %v1794_v47, %v1738_v49  ;;  %v1856_v53 = vmul.f32 %v7319_v4, %v1843_v24  ;;  %v1918_v56 = vmul.f32 %v7327_v16, %v1905_v39  ;;  %v2718_v47 = vld [vmem:[#allocation23 + $0x28] sm:$0xff] }
 0x277   : > { %v1862_v9 = vadd.f32 %v1856_v53, %v1800_v48 }
 0x278   : > { %v1964_v55 = vld [vmem:[#allocation3 + $0x21] ss:$2 sm:$0xf]  ;;  %v1956_v44 = vld [vmem:[#allocation3 + $0x20] ss:$2 sm:$0xf] }
 0x279   : > { %v1924_v45 = vadd.f32 %v1918_v56, %v1862_v9  ;;  %5435 = vmatmul.mubr.msk.f32.gmra.mxu0 %vm1944_vm3, %v1964_v55  ;;  %5448 = vmatmul.mubr.msk.f32.gmra.mxu1 %vm1944_vm3, %v1956_v44  ;;  %v2149_v4 = vld [vmem:[#allocation3 + $0x12] ss:$2 sm:$0xff]  ;;  %v5123_v9 = vld [vmem:[#allocation21] ss:$0 sm:$0xff] }
 0x27a   : > { %5454 = vmatprep.mubr.msk.f32.mxu0 %vm6774_vm1, %v6773_v26 }
 0x27b   : > { %v1937_v62 = vadd.f32 %v7333_v46, %v1924_v45  ;;  %v2274_v46 = vld [vmem:[#allocation20 + $0x10] sm:$0xff] }
 0x27c   : > { %5465 = vmatprep.subr.mxu1 %v2274_v46 }
 0x27d   : > { %v1943_v60 = vmax.f32 %v1937_v62, 0.0  ;;  %5455 = vmatmul.mubr.msk.f32.vlgmr.msra.gmra.mxu0 %vm1944_vm3, %v2147_v57  ;;  %5466 = vmatpush3.msra.mxu1 %v2274_v46 }
 0x27e   : > { %5457 = vmatprep.mubr.msk.f32.mxu0 %vm6774_vm1, %v6773_v26  ;;  %5470 = vmatprep.subr.mxu1 %v2268_v63 }
 0x27f   : > { %1951 = vst.msk [vmem:[#allocation3 + $0x28] sm:$0x1] %vm1950_vm2, %v1943_v60  ;;  %5485 = vmatpush3.msra.mxu0 %v2551_v40  ;;  %v3102_v40 = vld [vmem:[#allocation29 + $0x10] sm:$0xff] }
 0x280   : > { %5486 = vmatprep.subr.mxu0 %v2550_v20 }
 0x281   : > { %5458 = vmatmul.mubr.msk.f32.gmra.mxu0 %vm1944_vm3, %v2149_v4 }
 0x282   : > { %5460 = vmatprep.mubr.msk.f32.mxu0 %vm6774_vm1, %v6773_v26  ;;  %5487 = vmatpush3.msra.mxu0 %v2550_v20  ;;  %v3108_v20 = vld [vmem:[#allocation29 + $0x28] sm:$0xff] }
 0x283   : > { %5498 = vmatprep.subr.mxu0 %v2718_v47 }
 0x286   : > { %v2151_v16 = vld [vmem:[#allocation3 + $0x22] ss:$2 sm:$0xf] }
 0x287   : > { %5461 = vmatmul.mubr.msk.f32.gmra.mxu0 %vm1944_vm3, %v2151_v16 }
 0x321   : > { %v2043_v0 = vpop.f32.mrf.mxu0  ;;  %v2132_v1 = vpop.f32.mrf.mxu1 }
 0x322   : > { %v2133_v12 = vadd.f32 %v2132_v1, %v2043_v0  ;;  %v2717_v1 = vld [vmem:[#allocation23 + $0x20] sm:$0xff] }
 0x323   : > { %v5430_v21 = vpop.f32.mrf.mxu0  ;;  %v5443_v10 = vpop.f32.mrf.mxu1 }
 0x324   : > { %v2715_v10 = vld [vmem:[#allocation5 + $0xa] sm:$0x1] }
 0x331   : > { %v2048_v2 = vpop.f32.mrf.mxu0  ;;  %v2137_v3 = vpop.f32.mrf.mxu1 }
 0x332   : > { %v2138_v11 = vadd.f32 %v2137_v3, %v2048_v2  ;;  %v2831_v2 = vld [vmem:[#allocation26 + $0x38] sm:$0xff] }
 0x333   : > { %v5433_v22 = vpop.f32.mrf.mxu0  ;;  %v5446_v5 = vpop.f32.mrf.mxu1  ;;  %v2824_v3 = vld [vmem:[#allocation26 + $0x18] sm:$0xff] }
 0x334   : > { %v2830_v22 = vld [vmem:[#allocation26 + $0x30] sm:$0xff] }
 0x335   : > { %v2823_v5 = vld [vmem:[#allocation26 + $0x10] sm:$0xff] }
 0x339   : > { %v2053_v6 = vpop.f32.mrf.mxu0  ;;  %v2142_v29 = vpop.f32.mrf.mxu1 }
 0x33a   : > { %v2143_v15 = vadd.f32 %v2142_v29, %v2053_v6  ;;  %v2829_v6 = vld [vmem:[#allocation26 + $0x28] sm:$0xff] }
 0x33b   : > { %v5436_v25 = vpop.f32.mrf.mxu0  ;;  %v5449_v7 = vpop.f32.mrf.mxu1  ;;  %v2822_v29 = vld [vmem:[#allocation26 + $0x8] sm:$0xff] }
 0x33c   : > { %v2828_v25 = vld [vmem:[#allocation26 + $0x20] sm:$0xff] }
 0x33d   : > { %v2230_v37 = vpop.f32.mrf.mxu0  ;;  %v2821_v7 = vld [vmem:[#allocation26] sm:$0xff] }
 0x33e   : > { %v2244_v8 = vadd.f32 %v2230_v37, %v2133_v12  ;;  %v3000_v12 = vld [vmem:[#allocation26 + $0x58] sm:$0xff] }
 0x33f   : > { %v5456_v32 = vpop.f32.mrf.mxu0 }
 0x340   : > { %v2254_v13 = vadd.f32 %v5116_v59, %v2244_v8 }
 0x341   : > { %v2235_v33 = vpop.f32.mrf.mxu0 }
 0x342   : > { %v2257_v58 = vmax.f32 %v2254_v13, 0.0  ;;  %v2245_v38 = vadd.f32 %v2235_v33, %v2138_v11  ;;  %v5130_v33 = vld [vmem:[#allocation24] ss:$0 sm:$0xff] }
 0x343   : > { %v5459_v54 = vpop.f32.mrf.mxu0 }
 0x344   : > { %2260 = vst.msk [vmem:[#allocation4] sm:$0xff] %vm1944_vm3, %v2257_v58  ;;  %v2255_v14 = vadd.f32 %v5116_v59, %v2245_v38 }
 0x346   : > { %v2258_v52 = vmax.f32 %v2255_v14, 0.0 }
 0x347   : > { %v2240_v17 = vpop.f32.mrf.mxu0 }
 0x348   : > { %2261 = vst.msk [vmem:[#allocation4 + $0x8] sm:$0xff] %vm1944_vm3, %v2258_v52  ;;  %v2246_v27 = vadd.f32 %v2240_v17, %v2143_v15 }
 0x349   : > { %v5462_v41 = vpop.f32.mrf.mxu0 }
 0x34a   : > { %v2256_v36 = vadd.f32 %v5116_v59, %v2246_v27 }
 0x34c   : > { %v2259_v18 = vmax.f32 %v2256_v36, 0.0 }
 0x34e   : > { %2263 = vst.msk [vmem:[#allocation4 + $0x10] sm:$0xf] %vm2262_vm4, %v2259_v18 }
 0x34f   : > { %v2270_v30 = vld [vmem:[#allocation4 + $0x1] ss:$2 sm:$0xff]  ;;  %v2264_v42 = vld [vmem:[#allocation4] ss:$2 sm:$0xff] }
 0x350   : > { %5467 = vmatprep.mubr.msk.f32.mxu1 %vm1944_vm3, %v2270_v30 }
 0x355   : > { %v2272_v19 = vld [vmem:[#allocation4 + $0x11] ss:$2 sm:$0x1]  ;;  %v2266_v28 = vld [vmem:[#allocation4 + $0x10] ss:$2 sm:$0x1] }
 0x356   : > { %5468 = vmatmul.mubr.msk.f32.vlgmr.msra.gmra.mxu1 %vm1944_vm3, %v2272_v19  ;;  %v2439_v51 = vld [vmem:[#allocation4 + $0x2] ss:$2 sm:$0xff]  ;;  %v2441_v35 = vld [vmem:[#allocation4 + $0x12] ss:$2 sm:$0x1] }
 0x357   : > { %5471 = vmatpush3.msra.mxu1 %v2268_v63  ;;  %5474 = vmatprep.mubr.msk.f32.mxu1 %vm1944_vm3, %v2264_v42  ;;  %v2999_v19 = vld [vmem:[#allocation26 + $0x50] sm:$0xff]  ;;  %v2998_v42 = vld [vmem:[#allocation26 + $0x48] sm:$0xff] }
 0x358   : > { %5472 = vmatprep.subr.mxu1 %v2267_v23 }
 0x359   : > { %5473 = vmatpush3.msra.mxu1 %v2267_v23 }
 0x35a   : > { %5477 = vmatprep.subr.mxu1 %v2444_v50  ;;  %5475 = vmatmul.mubr.msk.f32.vlgmr.msra.gmra.mxu1 %vm1944_vm3, %v2266_v28  ;;  %v2995_v28 = vld [vmem:[#allocation6 + $0xa] sm:$0x1] }
 0x35b   : > { %5478 = vmatpush3.msra.mxu1 %v2444_v50  ;;  %5481 = vmatprep.mubr.msk.f32.mxu1 %vm1944_vm3, %v2439_v51  ;;  %v2997_v50 = vld [vmem:[#allocation26 + $0x40] sm:$0xff] }
 0x35c   : > { %5479 = vmatprep.subr.mxu1 %v2443_v31  ;;  %v3103_v51 = vld [vmem:[#allocation29 + $0x18] sm:$0xff] }
 0x35d   : > { %5480 = vmatpush3.msra.mxu1 %v2443_v31  ;;  %v3110_v31 = vld [vmem:[#allocation29 + $0x38] sm:$0xff] }
 0x35e   : > { %5482 = vmatmul.mubr.msk.f32.vlgmr.msra.gmra.mxu1 %vm1944_vm3, %v2441_v35  ;;  %5491 = vmatprep.subr.mxu1 %v2546_v43  ;;  %v3109_v35 = vld [vmem:[#allocation29 + $0x30] sm:$0xff] }
 0x35f   : > { %5492 = vmatpush3.msra.mxu1 %v2546_v43  ;;  %v3101_v43 = vld [vmem:[#allocation29 + $0x8] sm:$0xff] }
 0x360   : > { %5493 = vmatprep.subr.mxu1 %v2545_v34 }
 0x361   : > { %5494 = vmatpush3.msra.mxu1 %v2545_v34  ;;  %v3107_v34 = vld [vmem:[#allocation29 + $0x20] sm:$0xff] }
 0x362   : > { %5505 = vmatprep.subr.mxu1 %v2831_v2 }
 0x416   : > { %v5469_v49 = vpop.f32.mrf.mxu1 }
 0x418   : > { %v2348_v39 = vpop.f32.mrf.mxu1 }
 0x41a   : > { %v5476_v24 = vpop.f32.mrf.mxu1 }
 0x41b   : > { %v2435_v53 = vadd.f32 %v5476_v24, %v5469_v49 }
 0x41c   : > { %v2429_v48 = vpop.f32.mrf.mxu1 }
 0x41d   : > { %v2430_v55 = vadd.f32 %v2429_v48, %v2348_v39 }
 0x41e   : > { %v5483_v56 = vpop.f32.mrf.mxu1 }
 0x41f   : > { %v2527_v44 = vadd.f32 %v5483_v56, %v2435_v53 }
 0x420   : > { %v2517_v45 = vpop.f32.mrf.mxu1 }
 0x421   : > { %v2536_v62 = vadd.f32 %v5123_v9, %v2527_v44  ;;  %v2526_v57 = vadd.f32 %v2517_v45, %v2430_v55 }
 0x423   : > { %v2538_v60 = vmax.f32 %v2536_v62, 0.0  ;;  %v2535_v4 = vadd.f32 %v5123_v9, %v2526_v57  ;;  %v5137_v9 = vld [vmem:[#allocation27] ss:$0 sm:$0xff] }
 0x425   : > { %2542 = vst.msk [vmem:[#allocation5 + $0x9] sm:$0x1] %vm1950_vm2, %v2538_v60  ;;  %v2537_v16 = vmax.f32 %v2535_v4, 0.0 }
 0x427   : > { %2541 = vst.msk [vmem:[#allocation5 + $0x1] sm:$0xff] %vm1944_vm3, %v2537_v16 }
 0x42c   : > { %v2548_v0 = vld [vmem:[#allocation5 + $0x9] sm:$0x1] }
 0x42e   : > { %v2547_v61 = vld [vmem:[#allocation5 + $0x1] sm:$0xff] }
 0x42f   : > { %v2543_v46 = vld [vmem:[#allocation5] sm:$0xff]  ;;  %v2544_v63 = vld [vmem:[#allocation5 + $0x8] sm:$0x1]  ;;  %5488 = vmatprep.mubr.msk.f32.mxu0 %vm1944_vm3, %v2547_v61 }
 0x430   : > { %5495 = vmatprep.mubr.msk.f32.mxu1 %vm1944_vm3, %v2543_v46  ;;  %5489 = vmatmul.mubr.msk.f32.vlgmr.msra.gmra.mxu0 %vm1944_vm3, %v2548_v0  ;;  %v2714_v21 = vld [vmem:[#allocation5 + $0x2] sm:$0xff]  ;;  %v3274_v0 = vld [vmem:[#allocation32 + $0x18] sm:$0xff] }
 0x431   : > { %5496 = vmatmul.mubr.msk.f32.vlgmr.msra.gmra.mxu1 %vm1944_vm3, %v2544_v63  ;;  %5499 = vmatpush3.msra.mxu0 %v2718_v47  ;;  %v3100_v47 = vld [vmem:[#allocation29] sm:$0xff] }
 0x432   : > { %5502 = vmatprep.mubr.msk.f32.mxu0 %vm1944_vm3, %v2714_v21  ;;  %5500 = vmatprep.subr.mxu0 %v2717_v1  ;;  %v3280_v63 = vld [vmem:[#allocation32 + $0x38] sm:$0xff]  ;;  %v3273_v21 = vld [vmem:[#allocation32 + $0x10] sm:$0xff] }
 0x433   : > { %5501 = vmatpush3.msra.mxu0 %v2717_v1  ;;  %5506 = vmatpush3.msra.mxu1 %v2831_v2  ;;  %v3279_v1 = vld [vmem:[#allocation32 + $0x30] sm:$0xff]  ;;  %v3272_v2 = vld [vmem:[#allocation32 + $0x8] sm:$0xff] }
 0x434   : > { %5503 = vmatmul.mubr.msk.f32.vlgmr.msra.gmra.mxu0 %vm1944_vm3, %v2715_v10  ;;  %5516 = vmatprep.subr.mxu0 %v2824_v3  ;;  %v3278_v10 = vld [vmem:[#allocation32 + $0x28] sm:$0xff] }
 0x435   : > { %5517 = vmatpush3.msra.mxu0 %v2824_v3  ;;  %5507 = vmatprep.subr.mxu1 %v2830_v22  ;;  %v3277_v3 = vld [vmem:[#allocation32 + $0x20] sm:$0xff] }
 0x436   : > { %5518 = vmatprep.subr.mxu0 %v2823_v5  ;;  %5508 = vmatpush3.msra.mxu1 %v2830_v22  ;;  %v3271_v22 = vld [vmem:[#allocation32] sm:$0xff] }
 0x437   : > { %5519 = vmatpush3.msra.mxu0 %v2823_v5  ;;  %5509 = vmatprep.subr.mxu1 %v2829_v6 }
 0x438   : > { %5520 = vmatprep.subr.mxu0 %v2822_v29  ;;  %5510 = vmatpush3.msra.mxu1 %v2829_v6 }
 0x439   : > { %5521 = vmatpush3.msra.mxu0 %v2822_v29  ;;  %5511 = vmatprep.subr.mxu1 %v2828_v25  ;;  %v5140_v29 = vld [vmem:[#allocation30] ss:$0 sm:$0xff] }
 0x43a   : > { %5522 = vmatprep.subr.mxu0 %v2821_v7  ;;  %5512 = vmatpush3.msra.mxu1 %v2828_v25 }
 0x43b   : > { %5523 = vmatpush3.msra.mxu0 %v2821_v7  ;;  %5527 = vmatprep.subr.mxu1 %v3000_v12 }
 0x43c   : > { %5538 = vmatprep.subr.mxu0 %v6773_v26 }
 0x4f0   : > { %v5490_v37 = vpop.f32.mrf.mxu0 }
 0x4f1   : > { %v5497_v59 = vpop.f32.mrf.mxu1 }
 0x4f2   : > { %v2624_v8 = vpop.f32.mrf.mxu0  ;;  %v2711_v11 = vadd.f32 %v5497_v59, %v5490_v37 }
 0x4f3   : > { %v2705_v32 = vpop.f32.mrf.mxu1 }
 0x4f4   : > { %v5504_v13 = vpop.f32.mrf.mxu0  ;;  %v2706_v58 = vadd.f32 %v2705_v32, %v2624_v8  ;;  %v3432_v8 = vld [vmem:[#allocation32 + $0x58] sm:$0xff] }
 0x4f5   : > { %v2801_v38 = vadd.f32 %v5504_v13, %v2711_v11  ;;  %v3431_v13 = vld [vmem:[#allocation32 + $0x50] sm:$0xff] }
 0x4f6   : > { %v2791_v54 = vpop.f32.mrf.mxu0 }
 0x4f7   : > { %v2810_v14 = vadd.f32 %v5130_v33, %v2801_v38  ;;  %v2800_v15 = vadd.f32 %v2791_v54, %v2706_v58  ;;  %v3429_v58 = vld [vmem:[#allocation32 + $0x40] sm:$0xff]  ;;  %v5152_v54 = vld [vmem:[%s7819_s4 + $0x78] sm:$0xff] }
 0x4f9   : > { %v2812_v52 = vmax.f32 %v2810_v14, 0.0  ;;  %v2809_v17 = vadd.f32 %v5130_v33, %v2800_v15  ;;  %v3430_v33 = vld [vmem:[#allocation32 + $0x48] sm:$0xff]  ;;  %v3529_v14 = vld [vmem:[%s7819_s4 + $0x38] sm:$0xff] }
 0x4fa   : > { %v5151_v15 = vld [vmem:[%s7819_s4 + $0x70] sm:$0xff] }
 0x4fb   : > { %2818 = vst.msk [vmem:[#allocation6 + $0x9] sm:$0x1] %vm2813_vm5, %v2812_v52  ;;  %v2811_v27 = vmax.f32 %v2809_v17, 0.0  ;;  %v3528_v52 = vld [vmem:[%s7819_s4 + $0x30] sm:$0xff]  ;;  %v5150_v17 = vld [vmem:[%s7819_s4 + $0x68] sm:$0xff] }
 0x4fd   : > { %2817 = vst.msk [vmem:[#allocation6 + $0x1] sm:$0xff] %vm2816_vm6, %v2811_v27  ;;  %v3527_v27 = vld [vmem:[%s7819_s4 + $0x28] sm:$0xff] }
 0x502   : > { %v2826_v30 = vld [vmem:[#allocation6 + $0x9] sm:$0x1] }
 0x504   : > { %v2825_v41 = vld [vmem:[#allocation6 + $0x1] sm:$0xff] }
 0x505   : > { %v2819_v36 = vld [vmem:[#allocation6] sm:$0xff]  ;;  %v2820_v18 = vld [vmem:[#allocation6 + $0x8] sm:$0x1]  ;;  %5513 = vmatprep.mubr.msk.f32.mxu1 %vm2816_vm6, %v2825_v41 }
 0x506   : > { %5524 = vmatprep.mubr.msk.f32.mxu0 %vm2816_vm6, %v2819_v36  ;;  %5514 = vmatmul.mubr.msk.f32.vlgmr.msra.gmra.mxu1 %vm2816_vm6, %v2826_v30  ;;  %v2994_v23 = vld [vmem:[#allocation6 + $0x2] sm:$0xff] }
 0x507   : > { %5525 = vmatmul.mubr.msk.f32.vlgmr.msra.gmra.mxu0 %vm2816_vm6, %v2820_v18  ;;  %5528 = vmatpush3.msra.mxu1 %v3000_v12  ;;  %v5149_v41 = vld [vmem:[%s7819_s4 + $0x60] sm:$0xff]  ;;  %v5148_v18 = vld [vmem:[%s7819_s4 + $0x58] sm:$0xff] }
 0x508   : > { %5535 = vmatprep.mubr.msk.f32.mxu1 %vm2816_vm6, %v2994_v23  ;;  %5529 = vmatprep.subr.mxu1 %v2999_v19  ;;  %v3526_v36 = vld [vmem:[%s7819_s4 + $0x20] sm:$0xff]  ;;  %v3525_v30 = vld [vmem:[%s7819_s4 + $0x18] sm:$0xff]  ;;  %v3524_v23 = vld [vmem:[%s7819_s4 + $0x10] sm:$0xff] }
 0x509   : > { %5546 = vmatprep.mubr.msk.f32.mxu0 %vm6774_vm1, %v6773_v26  ;;  %5530 = vmatpush3.msra.mxu1 %v2999_v19  ;;  %v5147_v19 = vld [vmem:[%s7819_s4 + $0x50] sm:$0xff] }
 0x50a   : > { %5531 = vmatprep.subr.mxu1 %v2998_v42  ;;  %5539 = vmatpush3.msra.mxu0 %v3110_v31  ;;  %v3522_v31 = vld [vmem:[%s7819_s4] sm:$0xff] }
 0x50b   : > { %5532 = vmatpush3.msra.mxu1 %v2998_v42  ;;  %5540 = vmatprep.subr.mxu0 %v6773_v26  ;;  %v5146_v42 = vld [vmem:[%s7819_s4 + $0x48] sm:$0xff] }
 0x50c   : > { %5533 = vmatprep.subr.mxu1 %v2997_v50  ;;  %5541 = vmatpush3.msra.mxu0 %v3109_v35 }
 0x50d   : > { %5534 = vmatpush3.msra.mxu1 %v2997_v50  ;;  %5542 = vmatprep.subr.mxu0 %v6773_v26  ;;  %v3523_v50 = vld [vmem:[%s7819_s4 + $0x8] sm:$0xff] }
 0x50e   : > { %5536 = vmatmul.mubr.msk.f32.vlgmr.msra.gmra.mxu1 %vm2816_vm6, %v2995_v28  ;;  %5549 = vmatprep.subr.mxu1 %v6773_v26  ;;  %v5145_v28 = vld [vmem:[%s7819_s4 + $0x40] sm:$0xff] }
 0x50f   : > { %5557 = vmatprep.mubr.msk.f32.mxu1 %vm6774_vm1, %v6773_v26  ;;  %5550 = vmatpush3.msra.mxu1 %v3103_v51 }
 0x510   : > { %5551 = vmatprep.subr.mxu1 %v6773_v26  ;;  %5543 = vmatpush3.msra.mxu0 %v3108_v20 }
 0x511   : > { %5552 = vmatpush3.msra.mxu1 %v3102_v40  ;;  %5544 = vmatprep.subr.mxu0 %v6773_v26 }
 0x512   : > { %5553 = vmatprep.subr.mxu1 %v6773_v26  ;;  %5545 = vmatpush3.msra.mxu0 %v3107_v34 }
 0x513   : > { %5554 = vmatpush3.msra.mxu1 %v3101_v43  ;;  %5560 = vmatprep.subr.mxu0 %v6773_v26 }
 0x514   : > { %5555 = vmatprep.subr.mxu1 %v6773_v26 }
 0x515   : > { %5556 = vmatpush3.msra.mxu1 %v3100_v47  ;;  %v5144_v47 = vld [vmem:[#allocation33] ss:$0 sm:$0xff] }
 0x516   : > { %5571 = vmatprep.subr.mxu1 %v6773_v26 }
 0x5c6   : > { %v5515_v49 = vpop.f32.mrf.mxu1 }
 0x5c7   : > { %v5526_v39 = vpop.f32.mrf.mxu0 }
 0x5c8   : > { %v2904_v24 = vpop.f32.mrf.mxu1  ;;  %v2991_v53 = vadd.f32 %v5526_v39, %v5515_v49 }
 0x5c9   : > { %v2985_v48 = vpop.f32.mrf.mxu0 }
 0x5ca   : > { %v2986_v55 = vadd.f32 %v2985_v48, %v2904_v24 }
 0x5ce   : > { %v5537_v56 = vpop.f32.mrf.mxu1 }
 0x5cf   : > { %v3083_v44 = vadd.f32 %v5537_v56, %v2991_v53  ;;  %v5162_v53 = vld [vmem:[%s7819_s4 + $0xb8] sm:$0xff] }
 0x5d0   : > { %v3073_v45 = vpop.f32.mrf.mxu1 }
 0x5d1   : > { %v3092_v62 = vadd.f32 %v5137_v9, %v3083_v44  ;;  %v3082_v57 = vadd.f32 %v3073_v45, %v2986_v55  ;;  %v5161_v55 = vld [vmem:[%s7819_s4 + $0xb0] sm:$0xff]  ;;  %v5160_v44 = vld [vmem:[%s7819_s4 + $0xa8] sm:$0xff]  ;;  %v5159_v45 = vld [vmem:[%s7819_s4 + $0xa0] sm:$0xff] }
 0x5d3   : > { %v3094_v60 = vmax.f32 %v3092_v62, 0.0  ;;  %v3091_v4 = vadd.f32 %v5137_v9, %v3082_v57  ;;  %v5158_v62 = vld [vmem:[%s7819_s4 + $0x98] sm:$0xff]  ;;  %v5157_v57 = vld [vmem:[%s7819_s4 + $0x90] sm:$0xff] }
 0x5d5   : > { %3098 = vst.msk [vmem:[#allocation7 + $0x9] sm:$0x1] %vm2813_vm5, %v3094_v60  ;;  %v3093_v16 = vmax.f32 %v3091_v4, 0.0  ;;  %v5156_v60 = vld [vmem:[%s7819_s4 + $0x88] sm:$0xff]  ;;  %v5155_v4 = vld [vmem:[%s7819_s4 + $0x80] sm:$0xff] }
 0x5d7   : > { %3097 = vst.msk [vmem:[#allocation7 + $0x1] sm:$0xff] %vm2816_vm6, %v3093_v16 }
 0x5de   : > { %v3105_v61 = vld [vmem:[#allocation7 + $0x1] ss:$2 sm:$0x1f]  ;;  %v3099_v46 = vld [vmem:[#allocation7] ss:$2 sm:$0x1f] }
 0x5df   : > { %5547 = vmatmul.mubr.msk.f32.vlgmr.msra.gmra.mxu0 %vm2816_vm6, %v3105_v61  ;;  %5558 = vmatmul.mubr.msk.f32.vlgmr.msra.gmra.mxu1 %vm2816_vm6, %v3099_v46  ;;  %v3802_v61 = vld [vmem:[#allocation36 + $0x78] sm:$0xff] }
 0x5e0   : > { %5568 = vmatprep.mubr.msk.f32.mxu0 %vm6774_vm1, %v6773_v26  ;;  %5579 = vmatprep.mubr.msk.f32.mxu1 %vm6774_vm1, %v6773_v26  ;;  %v3791_v46 = vld [vmem:[#allocation36 + $0x38] sm:$0xff] }
 0x5e1   : > { %5561 = vmatpush3.msra.mxu0 %v3280_v63  ;;  %5572 = vmatpush3.msra.mxu1 %v3274_v0  ;;  %v3801_v63 = vld [vmem:[#allocation36 + $0x70] sm:$0xff] }
 0x5e2   : > { %5562 = vmatprep.subr.mxu0 %v6773_v26  ;;  %5573 = vmatprep.subr.mxu1 %v6773_v26  ;;  %v3790_v0 = vld [vmem:[#allocation36 + $0x30] sm:$0xff] }
 0x5e3   : > { %5563 = vmatpush3.msra.mxu0 %v3279_v1  ;;  %5574 = vmatpush3.msra.mxu1 %v3273_v21  ;;  %v3800_v1 = vld [vmem:[#allocation36 + $0x68] sm:$0xff] }
 0x5e4   : > { %5564 = vmatprep.subr.mxu0 %v6773_v26  ;;  %5575 = vmatprep.subr.mxu1 %v6773_v26  ;;  %v3789_v21 = vld [vmem:[#allocation36 + $0x28] sm:$0xff] }
 0x5e5   : > { %5565 = vmatpush3.msra.mxu0 %v3278_v10  ;;  %5576 = vmatpush3.msra.mxu1 %v3272_v2  ;;  %v3799_v10 = vld [vmem:[#allocation36 + $0x60] sm:$0xff] }
 0x5e6   : > { %5566 = vmatprep.subr.mxu0 %v6773_v26  ;;  %5577 = vmatprep.subr.mxu1 %v6773_v26  ;;  %v3788_v2 = vld [vmem:[#allocation36 + $0x20] sm:$0xff] }
 0x5e7   : > { %5567 = vmatpush3.msra.mxu0 %v3277_v3  ;;  %5578 = vmatpush3.msra.mxu1 %v3271_v22  ;;  %v3798_v3 = vld [vmem:[#allocation36 + $0x58] sm:$0xff] }
 0x5e8   : > { %5582 = vmatprep.subr.mxu0 %v6773_v26  ;;  %5593 = vmatprep.subr.mxu1 %v6773_v26  ;;  %v3787_v22 = vld [vmem:[#allocation36 + $0x18] sm:$0xff] }
 0x69f   : > { %v3180_v5 = vpop.f32.mrf.mxu0  ;;  %v3253_v6 = vpop.f32.mrf.mxu1 }
 0x6a0   : > { %v3254_v25 = vadd.f32 %v3253_v6, %v3180_v5  ;;  %v3797_v5 = vld [vmem:[#allocation36 + $0x50] sm:$0xff] }
 0x6a1   : > { %v5548_v7 = vpop.f32.mrf.mxu0  ;;  %v5559_v12 = vpop.f32.mrf.mxu1  ;;  %v3786_v6 = vld [vmem:[#allocation36 + $0x10] sm:$0xff] }
 0x6a2   : > { %v3264_v37 = vadd.f32 %v5140_v29, %v3254_v25  ;;  %v3796_v29 = vld [vmem:[#allocation36 + $0x48] sm:$0xff]  ;;  %v3795_v7 = vld [vmem:[#allocation36 + $0x40] sm:$0xff] }
 0x6a3   : > { %v3785_v25 = vld [vmem:[#allocation36 + $0x8] sm:$0xff]  ;;  %v3784_v12 = vld [vmem:[#allocation36] sm:$0xff] }
 0x6a4   : > { %v3265_v59 = vmax.f32 %v3264_v37, 0.0 }
 0x6a6   : > { %3269 = vst.msk [vmem:[#allocation8 + $0x1] sm:$0x1f] %vm3268_vm7, %v3265_v59 }
 0x6ad   : > { %v3275_v32 = vld [vmem:[#allocation8 + $0x1] sm:$0x1f] }
 0x6ae   : > { %v3270_v11 = vld [vmem:[#allocation8] sm:$0x1f]  ;;  %5569 = vmatmul.mubr.msk.f32.vlgmr.msra.gmra.mxu0 %vm2816_vm6, %v3275_v32 }
 0x6af   : > { %5580 = vmatmul.mubr.msk.f32.vlgmr.msra.gmra.mxu1 %vm2816_vm6, %v3270_v11  ;;  %5583 = vmatpush3.msra.mxu0 %v3432_v8  ;;  %v3427_v38 = vld [vmem:[#allocation8 + $0x2] sm:$0x1f] }
 0x6b0   : > { %5590 = vmatprep.mubr.msk.f32.mxu0 %vm6774_vm1, %v6773_v26  ;;  %5584 = vmatprep.subr.mxu0 %v6773_v26 }
 0x6b1   : > { %5609 = vmatprep.mubr.msk.f32.mxu1 %vm6774_vm1, %v6773_v26  ;;  %5585 = vmatpush3.msra.mxu0 %v3431_v13 }
 0x6b2   : > { %5586 = vmatprep.subr.mxu0 %v6773_v26  ;;  %5594 = vmatpush3.msra.mxu1 %v5152_v54 }
 0x6b3   : > { %5587 = vmatpush3.msra.mxu0 %v3430_v33  ;;  %5595 = vmatprep.subr.mxu1 %v6773_v26  ;;  %v5164_v33 = vld [vmem:[#allocation35] ss:$0 sm:$0xff] }
 0x6b4   : > { %5588 = vmatprep.subr.mxu0 %v6773_v26  ;;  %5596 = vmatpush3.msra.mxu1 %v5151_v15  ;;  %v5175_v15 = vld [vmem:[%s7820_s27 + $0x78] sm:$0xff] }
 0x6b5   : > { %5589 = vmatpush3.msra.mxu0 %v3429_v58  ;;  %5597 = vmatprep.subr.mxu1 %v6773_v26 }
 0x6b6   : > { %5591 = vmatmul.mubr.msk.f32.vlgmr.msra.gmra.mxu0 %vm2816_vm6, %v3427_v38  ;;  %5612 = vmatprep.subr.mxu0 %v6773_v26 }
 0x6b7   : > { %5628 = vmatprep.mubr.msk.f32.mxu0 %vm6774_vm1, %v6773_v26  ;;  %5613 = vmatpush3.msra.mxu0 %v3529_v14 }
 0x6b8   : > { %5614 = vmatprep.subr.mxu0 %v6773_v26  ;;  %5598 = vmatpush3.msra.mxu1 %v5150_v17 }
 0x6b9   : > { %5615 = vmatpush3.msra.mxu0 %v3528_v52  ;;  %5599 = vmatprep.subr.mxu1 %v6773_v26 }
 0x6ba   : > { %5616 = vmatprep.subr.mxu0 %v6773_v26  ;;  %5600 = vmatpush3.msra.mxu1 %v5149_v41  ;;  %v5174_v41 = vld [vmem:[%s7820_s27 + $0x70] sm:$0xff] }
 0x6bb   : > { %5617 = vmatpush3.msra.mxu0 %v3527_v27  ;;  %5601 = vmatprep.subr.mxu1 %v6773_v26  ;;  %v3970_v27 = vld [vmem:[%s7820_s27 + $0x38] sm:$0xff] }
 0x6bc   : > { %5618 = vmatprep.subr.mxu0 %v6773_v26  ;;  %5602 = vmatpush3.msra.mxu1 %v5148_v18  ;;  %v5173_v18 = vld [vmem:[%s7820_s27 + $0x68] sm:$0xff] }
 0x6bd   : > { %5619 = vmatpush3.msra.mxu0 %v3526_v36  ;;  %5603 = vmatprep.subr.mxu1 %v6773_v26  ;;  %v3969_v36 = vld [vmem:[%s7820_s27 + $0x30] sm:$0xff] }
 0x6be   : > { %5620 = vmatprep.subr.mxu0 %v6773_v26  ;;  %5604 = vmatpush3.msra.mxu1 %v5147_v19  ;;  %v5172_v19 = vld [vmem:[%s7820_s27 + $0x60] sm:$0xff] }
 0x6bf   : > { %5621 = vmatpush3.msra.mxu0 %v3525_v30  ;;  %5605 = vmatprep.subr.mxu1 %v6773_v26  ;;  %v3968_v30 = vld [vmem:[%s7820_s27 + $0x28] sm:$0xff] }
 0x6c0   : > { %5622 = vmatprep.subr.mxu0 %v6773_v26  ;;  %5606 = vmatpush3.msra.mxu1 %v5146_v42  ;;  %v5171_v42 = vld [vmem:[%s7820_s27 + $0x58] sm:$0xff] }
 0x6c1   : > { %5623 = vmatpush3.msra.mxu0 %v3524_v23  ;;  %5607 = vmatprep.subr.mxu1 %v6773_v26  ;;  %v3967_v23 = vld [vmem:[%s7820_s27 + $0x20] sm:$0xff] }
 0x6c2   : > { %5624 = vmatprep.subr.mxu0 %v6773_v26  ;;  %5608 = vmatpush3.msra.mxu1 %v5145_v28  ;;  %v5170_v28 = vld [vmem:[%s7820_s27 + $0x50] sm:$0xff] }
 0x6c3   : > { %5625 = vmatpush3.msra.mxu0 %v3523_v50  ;;  %5631 = vmatprep.subr.mxu1 %v6773_v26  ;;  %v3966_v50 = vld [vmem:[%s7820_s27 + $0x18] sm:$0xff] }
 0x6c4   : > { %5626 = vmatprep.subr.mxu0 %v6773_v26 }
 0x6c5   : > { %5627 = vmatpush3.msra.mxu0 %v3522_v31  ;;  %v3965_v31 = vld [vmem:[%s7820_s27 + $0x10] sm:$0xff] }
 0x6c6   : > { %5650 = vmatprep.subr.mxu0 %v6773_v26 }
 0x76e   : > { %v3350_v51 = vpop.f32.mrf.mxu0 }
 0x76f   : > { %v3423_v35 = vpop.f32.mrf.mxu1 }
 0x770   : > { %v5570_v40 = vpop.f32.mrf.mxu0  ;;  %v3424_v43 = vadd.f32 %v3423_v35, %v3350_v51  ;;  %v5169_v51 = vld [vmem:[%s7820_s27 + $0x48] sm:$0xff] }
 0x771   : > { %v5581_v20 = vpop.f32.mrf.mxu1  ;;  %v3964_v35 = vld [vmem:[%s7820_s27 + $0x8] sm:$0xff]  ;;  %v5168_v40 = vld [vmem:[%s7820_s27 + $0x40] sm:$0xff] }
 0x772   : > { %v3963_v20 = vld [vmem:[%s7820_s27] sm:$0xff] }
 0x776   : > { %v3502_v34 = vpop.f32.mrf.mxu0 }
 0x777   : > { %v3506_v49 = vadd.f32 %v3502_v34, %v3424_v43 }
 0x778   : > { %v5592_v39 = vpop.f32.mrf.mxu0 }
 0x779   : > { %v3514_v24 = vadd.f32 %v5144_v47, %v3506_v49  ;;  %v5167_v47 = vld [vmem:[#allocation38] ss:$0 sm:$0xff] }
 0x77b   : > { %v3515_v48 = vmax.f32 %v3514_v24, 0.0 }
 0x77d   : > { %3520 = vst.msk [vmem:[#allocation9 + $0x1] sm:$0x1f] %vm3519_vm9, %v3515_v48 }
 0x784   : > { %v3530_v56 = vld [vmem:[#allocation9 + $0x1] sm:$0x1f] }
 0x785   : > { %v3521_v9 = vld [vmem:[#allocation9] sm:$0x1f]  ;;  %5610 = vmatmul.mubr.msk.f32.vlgmr.msra.gmra.mxu1 %vm3540_vm10, %v3530_v56  ;;  %v5185_v56 = vld [vmem:[%s7820_s27 + $0xb8] sm:$0xff] }
 0x786   : > { %5629 = vmatmul.mubr.msk.f32.vlgmr.msra.gmra.mxu0 %vm3540_vm10, %v3521_v9  ;;  %5632 = vmatpush3.msra.mxu1 %v5162_v53  ;;  %v3687_v16 = vld [vmem:[#allocation9 + $0x2] sm:$0x1f] }
 0x787   : > { %5647 = vmatprep.mubr.msk.f32.mxu1 %vm6774_vm1, %v6773_v26  ;;  %5633 = vmatprep.subr.mxu1 %v6773_v26 }
 0x788   : > { %5666 = vmatprep.mubr.msk.f32.mxu0 %vm6774_vm1, %v6773_v26  ;;  %5634 = vmatpush3.msra.mxu1 %v5161_v55 }
 0x789   : > { %5635 = vmatprep.subr.mxu1 %v6773_v26  ;;  %5651 = vmatpush3.msra.mxu0 %v3802_v61 }
 0x78a   : > { %5636 = vmatpush3.msra.mxu1 %v5160_v44  ;;  %5652 = vmatprep.subr.mxu0 %v6773_v26  ;;  %v5184_v44 = vld [vmem:[%s7820_s27 + $0xb0] sm:$0xff] }
 0x78b   : > { %5637 = vmatprep.subr.mxu1 %v6773_v26  ;;  %5653 = vmatpush3.msra.mxu0 %v3801_v63  ;;  %v4231_v63 = vld [vmem:[%s7821_s2 + $0x38] sm:$0xff] }
 0x78c   : > { %5638 = vmatpush3.msra.mxu1 %v5159_v45  ;;  %5654 = vmatprep.subr.mxu0 %v6773_v26  ;;  %v5183_v45 = vld [vmem:[%s7820_s27 + $0xa8] sm:$0xff] }
 0x78d   : > { %5639 = vmatprep.subr.mxu1 %v6773_v26  ;;  %5655 = vmatpush3.msra.mxu0 %v3800_v1  ;;  %v4230_v1 = vld [vmem:[%s7821_s2 + $0x30] sm:$0xff] }
 0x78e   : > { %5640 = vmatpush3.msra.mxu1 %v5158_v62  ;;  %5656 = vmatprep.subr.mxu0 %v6773_v26  ;;  %v5182_v62 = vld [vmem:[%s7820_s27 + $0xa0] sm:$0xff] }
 0x78f   : > { %5641 = vmatprep.subr.mxu1 %v6773_v26  ;;  %5657 = vmatpush3.msra.mxu0 %v3799_v10  ;;  %v4229_v10 = vld [vmem:[%s7821_s2 + $0x28] sm:$0xff] }
 0x790   : > { %5642 = vmatpush3.msra.mxu1 %v5157_v57  ;;  %5658 = vmatprep.subr.mxu0 %v6773_v26  ;;  %v5181_v57 = vld [vmem:[%s7820_s27 + $0x98] sm:$0xff] }
 0x791   : > { %5643 = vmatprep.subr.mxu1 %v6773_v26  ;;  %5659 = vmatpush3.msra.mxu0 %v3798_v3  ;;  %v4228_v3 = vld [vmem:[%s7821_s2 + $0x20] sm:$0xff] }
 0x792   : > { %5644 = vmatpush3.msra.mxu1 %v5156_v60  ;;  %5660 = vmatprep.subr.mxu0 %v6773_v26  ;;  %v5180_v60 = vld [vmem:[%s7820_s27 + $0x90] sm:$0xff] }
 0x793   : > { %5645 = vmatprep.subr.mxu1 %v6773_v26  ;;  %5661 = vmatpush3.msra.mxu0 %v3797_v5  ;;  %v4227_v5 = vld [vmem:[%s7821_s2 + $0x18] sm:$0xff] }
 0x794   : > { %5646 = vmatpush3.msra.mxu1 %v5155_v4  ;;  %5662 = vmatprep.subr.mxu0 %v6773_v26  ;;  %v5179_v4 = vld [vmem:[%s7820_s27 + $0x88] sm:$0xff] }
 0x795   : > { %5648 = vmatmul.mubr.msk.f32.vlgmr.msra.gmra.mxu1 %vm3540_vm10, %v3687_v16  ;;  %5669 = vmatprep.subr.mxu1 %v6773_v26  ;;  %v5178_v16 = vld [vmem:[%s7820_s27 + $0x80] sm:$0xff] }
 0x796   : > { %5685 = vmatprep.mubr.msk.f32.mxu1 %vm6774_vm1, %v6773_v26  ;;  %5670 = vmatpush3.msra.mxu1 %v3791_v46  ;;  %v5195_v46 = vld [vmem:[%s7821_s2 + $0x78] sm:$0xff] }
 0x797   : > { %5671 = vmatprep.subr.mxu1 %v6773_v26  ;;  %5663 = vmatpush3.msra.mxu0 %v3796_v29  ;;  %v4226_v29 = vld [vmem:[%s7821_s2 + $0x10] sm:$0xff] }
 0x798   : > { %5672 = vmatpush3.msra.mxu1 %v3790_v0  ;;  %5664 = vmatprep.subr.mxu0 %v6773_v26  ;;  %v5194_v0 = vld [vmem:[%s7821_s2 + $0x70] sm:$0xff] }
 0x799   : > { %5673 = vmatprep.subr.mxu1 %v6773_v26  ;;  %5665 = vmatpush3.msra.mxu0 %v3795_v7  ;;  %v4225_v7 = vld [vmem:[%s7821_s2 + $0x8] sm:$0xff] }
 0x79a   : > { %5674 = vmatpush3.msra.mxu1 %v3789_v21  ;;  %5688 = vmatprep.subr.mxu0 %v6773_v26  ;;  %v5193_v21 = vld [vmem:[%s7821_s2 + $0x68] sm:$0xff] }
 0x79b   : > { %5675 = vmatprep.subr.mxu1 %v6773_v26 }
 0x79c   : > { %5676 = vmatpush3.msra.mxu1 %v3788_v2  ;;  %v5192_v2 = vld [vmem:[%s7821_s2 + $0x60] sm:$0xff] }
 0x79d   : > { %5677 = vmatprep.subr.mxu1 %v6773_v26 }
 0x79e   : > { %5678 = vmatpush3.msra.mxu1 %v3787_v22  ;;  %v5191_v22 = vld [vmem:[%s7821_s2 + $0x58] sm:$0xff] }
 0x79f   : > { %5679 = vmatprep.subr.mxu1 %v6773_v26 }
 0x7a0   : > { %5680 = vmatpush3.msra.mxu1 %v3786_v6  ;;  %v5190_v6 = vld [vmem:[%s7821_s2 + $0x50] sm:$0xff] }
 0x7a1   : > { %5681 = vmatprep.subr.mxu1 %v6773_v26 }
 0x7a2   : > { %5682 = vmatpush3.msra.mxu1 %v3785_v25  ;;  %v5189_v25 = vld [vmem:[%s7821_s2 + $0x48] sm:$0xff] }
 0x7a3   : > { %5683 = vmatprep.subr.mxu1 %v6773_v26 }
 0x7a4   : > { %5684 = vmatpush3.msra.mxu1 %v3784_v12  ;;  %v5188_v12 = vld [vmem:[%s7821_s2 + $0x40] sm:$0xff] }
 0x7a5   : > { %5707 = vmatprep.subr.mxu1 %v6773_v26 }
 0x845   : > { %v3610_v37 = vpop.f32.mrf.mxu1 }
 0x846   : > { %v3683_v59 = vpop.f32.mrf.mxu0 }
 0x847   : > { %v5611_v8 = vpop.f32.mrf.mxu1  ;;  %v3684_v11 = vadd.f32 %v3683_v59, %v3610_v37  ;;  %v4224_v37 = vld [vmem:[%s7821_s2] sm:$0xff] }
 0x848   : > { %v5630_v32 = vpop.f32.mrf.mxu0 }
 0x855   : > { %v3766_v13 = vpop.f32.mrf.mxu1 }
 0x856   : > { %v3770_v58 = vadd.f32 %v3766_v13, %v3684_v11 }
 0x857   : > { %v5649_v38 = vpop.f32.mrf.mxu1 }
 0x858   : > { %v3778_v54 = vadd.f32 %v5164_v33, %v3770_v58  ;;  %v5187_v58 = vld [vmem:[#allocation39] ss:$0 sm:$0xff] }
 0x85a   : > { %v3779_v14 = vmax.f32 %v3778_v54, 0.0 }
 0x85c   : > { %3782 = vst.msk [vmem:[#allocation10 + $0x1] sm:$0x1f] %vm3519_vm9, %v3779_v14 }
 0x863   : > { %v3793_v52 = vld [vmem:[#allocation10 + $0x1] ss:$2 sm:$0x7]  ;;  %v3783_v17 = vld [vmem:[#allocation10] ss:$2 sm:$0x7] }
 0x864   : > { %5667 = vmatmul.mubr.msk.f32.vlgmr.msra.gmra.mxu0 %vm3540_vm10, %v3793_v52  ;;  %5686 = vmatmul.mubr.msk.f32.vlgmr.msra.gmra.mxu1 %vm3540_vm10, %v3783_v17  ;;  %v5205_v52 = vld [vmem:[%s7821_s2 + $0xb8] sm:$0xff] }
 0x865   : > { %5689 = vmatpush3.msra.mxu0 %v5175_v15  ;;  %5704 = vmatprep.mubr.msk.f32.mxu0 %vm6774_vm1, %v6773_v26 }
 0x866   : > { %5690 = vmatprep.subr.mxu0 %v6773_v26  ;;  %5723 = vmatprep.mubr.msk.f32.mxu1 %vm6774_vm1, %v6773_v26 }
 0x867   : > { %5708 = vmatpush3.msra.mxu1 %v3970_v27  ;;  %5691 = vmatpush3.msra.mxu0 %v5174_v41  ;;  %v5204_v41 = vld [vmem:[%s7821_s2 + $0xb0] sm:$0xff] }
 0x868   : > { %5709 = vmatprep.subr.mxu1 %v6773_v26  ;;  %5692 = vmatprep.subr.mxu0 %v6773_v26 }
 0x869   : > { %5710 = vmatpush3.msra.mxu1 %v3969_v36  ;;  %5693 = vmatpush3.msra.mxu0 %v5173_v18  ;;  %v5203_v36 = vld [vmem:[%s7821_s2 + $0xa8] sm:$0xff]  ;;  %v5202_v18 = vld [vmem:[%s7821_s2 + $0xa0] sm:$0xff] }
 0x86a   : > { %5711 = vmatprep.subr.mxu1 %v6773_v26  ;;  %5694 = vmatprep.subr.mxu0 %v6773_v26 }
 0x86b   : > { %5712 = vmatpush3.msra.mxu1 %v3968_v30  ;;  %5695 = vmatpush3.msra.mxu0 %v5172_v19  ;;  %v5201_v30 = vld [vmem:[%s7821_s2 + $0x98] sm:$0xff]  ;;  %v5200_v19 = vld [vmem:[%s7821_s2 + $0x90] sm:$0xff] }
 0x86c   : > { %5713 = vmatprep.subr.mxu1 %v6773_v26  ;;  %5696 = vmatprep.subr.mxu0 %v6773_v26 }
 0x86d   : > { %5714 = vmatpush3.msra.mxu1 %v3967_v23  ;;  %5697 = vmatpush3.msra.mxu0 %v5171_v42  ;;  %v5199_v23 = vld [vmem:[%s7821_s2 + $0x88] sm:$0xff]  ;;  %v5198_v42 = vld [vmem:[%s7821_s2 + $0x80] sm:$0xff] }
 0x86e   : > { %5715 = vmatprep.subr.mxu1 %v6773_v26  ;;  %5698 = vmatprep.subr.mxu0 %v6773_v26 }
 0x86f   : > { %5716 = vmatpush3.msra.mxu1 %v3966_v50  ;;  %5699 = vmatpush3.msra.mxu0 %v5170_v28  ;;  %v4503_v28 = vld [vmem:[#allocation42 + $0x78] sm:$0xff] }
 0x870   : > { %5717 = vmatprep.subr.mxu1 %v6773_v26  ;;  %5700 = vmatprep.subr.mxu0 %v6773_v26 }
 0x871   : > { %5718 = vmatpush3.msra.mxu1 %v3965_v31  ;;  %5701 = vmatpush3.msra.mxu0 %v5169_v51  ;;  %v4492_v31 = vld [vmem:[#allocation42 + $0x38] sm:$0xff]  ;;  %v4502_v51 = vld [vmem:[#allocation42 + $0x70] sm:$0xff] }
 0x872   : > { %5719 = vmatprep.subr.mxu1 %v6773_v26  ;;  %5702 = vmatprep.subr.mxu0 %v6773_v26 }
 0x873   : > { %5720 = vmatpush3.msra.mxu1 %v3964_v35  ;;  %5703 = vmatpush3.msra.mxu0 %v5168_v40  ;;  %v4491_v35 = vld [vmem:[#allocation42 + $0x30] sm:$0xff]  ;;  %v4501_v40 = vld [vmem:[#allocation42 + $0x68] sm:$0xff] }
 0x874   : > { %5721 = vmatprep.subr.mxu1 %v6773_v26  ;;  %5726 = vmatprep.subr.mxu0 %v6773_v26 }
 0x875   : > { %5722 = vmatpush3.msra.mxu1 %v3963_v20  ;;  %v4490_v20 = vld [vmem:[#allocation42 + $0x28] sm:$0xff] }
 0x876   : > { %5745 = vmatprep.subr.mxu1 %v6773_v26 }
 0x924   : > { %v3872_v43 = vpop.f32.mrf.mxu0  ;;  %v3945_v34 = vpop.f32.mrf.mxu1 }
 0x925   : > { %v3946_v49 = vadd.f32 %v3945_v34, %v3872_v43  ;;  %v4500_v43 = vld [vmem:[#allocation42 + $0x60] sm:$0xff] }
 0x926   : > { %v5668_v39 = vpop.f32.mrf.mxu0  ;;  %v5687_v24 = vpop.f32.mrf.mxu1  ;;  %v4489_v34 = vld [vmem:[#allocation42 + $0x20] sm:$0xff] }
 0x927   : > { %v3956_v48 = vadd.f32 %v5167_v47, %v3946_v49  ;;  %v4499_v47 = vld [vmem:[#allocation42 + $0x58] sm:$0xff]  ;;  %v4498_v39 = vld [vmem:[#allocation42 + $0x50] sm:$0xff] }
 0x928   : > { %v4488_v49 = vld [vmem:[#allocation42 + $0x18] sm:$0xff]  ;;  %v4487_v24 = vld [vmem:[#allocation42 + $0x10] sm:$0xff] }
 0x929   : > { %v3957_v53 = vmax.f32 %v3956_v48, 0.0  ;;  %v4497_v48 = vld [vmem:[#allocation42 + $0x48] sm:$0xff] }
 0x92b   : > { %3961 = vst.msk [vmem:[#allocation11 + $0x1] sm:$0x7] %vm3960_vm11, %v3957_v53  ;;  %v4486_v53 = vld [vmem:[#allocation42 + $0x8] sm:$0xff] }
 0x932   : > { %v3971_v9 = vld [vmem:[#allocation11 + $0x1] sm:$0x7] }
 0x933   : > { %v3962_v55 = vld [vmem:[#allocation11] sm:$0x7]  ;;  %5705 = vmatmul.mubr.msk.f32.vlgmr.msra.gmra.mxu0 %vm3540_vm10, %v3971_v9 }
 0x934   : > { %5724 = vmatmul.mubr.msk.f32.vlgmr.msra.gmra.mxu1 %vm3540_vm10, %v3962_v55  ;;  %5727 = vmatpush3.msra.mxu0 %v5185_v56  ;;  %v4127_v61 = vld [vmem:[#allocation11 + $0x2] sm:$0x7] }
 0x935   : > { %5742 = vmatprep.mubr.msk.f32.mxu0 %vm6774_vm1, %v6773_v26  ;;  %5728 = vmatprep.subr.mxu0 %v6773_v26  ;;  %v4496_v56 = vld [vmem:[#allocation42 + $0x40] sm:$0xff] }
 0x936   : > { %5761 = vmatprep.mubr.msk.f32.mxu1 %vm6774_vm1, %v6773_v26  ;;  %5729 = vmatpush3.msra.mxu0 %v5184_v44  ;;  %v4485_v9 = vld [vmem:[#allocation42] sm:$0xff] }
 0x937   : > { %5730 = vmatprep.subr.mxu0 %v6773_v26  ;;  %5746 = vmatpush3.msra.mxu1 %v5195_v46 }
 0x938   : > { %5731 = vmatpush3.msra.mxu0 %v5183_v45  ;;  %5747 = vmatprep.subr.mxu1 %v6773_v26 }
 0x939   : > { %5732 = vmatprep.subr.mxu0 %v6773_v26  ;;  %5748 = vmatpush3.msra.mxu1 %v5194_v0 }
 0x93a   : > { %5733 = vmatpush3.msra.mxu0 %v5182_v62  ;;  %5749 = vmatprep.subr.mxu1 %v6773_v26 }
 0x93b   : > { %5734 = vmatprep.subr.mxu0 %v6773_v26  ;;  %5750 = vmatpush3.msra.mxu1 %v5193_v21  ;;  %v4672_v21 = vld [vmem:[%s7822_s18 + $0x38] sm:$0xff] }
 0x93c   : > { %5735 = vmatpush3.msra.mxu0 %v5181_v57  ;;  %5751 = vmatprep.subr.mxu1 %v6773_v26 }
 0x93d   : > { %5736 = vmatprep.subr.mxu0 %v6773_v26  ;;  %5752 = vmatpush3.msra.mxu1 %v5192_v2  ;;  %v4670_v2 = vld [vmem:[%s7822_s18 + $0x28] sm:$0xff] }
 0x93e   : > { %5737 = vmatpush3.msra.mxu0 %v5180_v60  ;;  %5753 = vmatprep.subr.mxu1 %v6773_v26 }
 0x93f   : > { %5738 = vmatprep.subr.mxu0 %v6773_v26  ;;  %5754 = vmatpush3.msra.mxu1 %v5191_v22  ;;  %v4668_v22 = vld [vmem:[%s7822_s18 + $0x18] sm:$0xff] }
 0x940   : > { %5739 = vmatpush3.msra.mxu0 %v5179_v4  ;;  %5755 = vmatprep.subr.mxu1 %v6773_v26  ;;  %v5207_v4 = vld [vmem:[#allocation41] ss:$0 sm:$0xff] }
 0x941   : > { %5740 = vmatprep.subr.mxu0 %v6773_v26  ;;  %5756 = vmatpush3.msra.mxu1 %v5190_v6  ;;  %v4666_v6 = vld [vmem:[%s7822_s18 + $0x8] sm:$0xff] }
 0x942   : > { %5741 = vmatpush3.msra.mxu0 %v5178_v16  ;;  %5757 = vmatprep.subr.mxu1 %v6773_v26 }
 0x943   : > { %5743 = vmatmul.mubr.msk.f32.vlgmr.msra.gmra.mxu0 %vm3540_vm10, %v4127_v61  ;;  %5764 = vmatprep.subr.mxu0 %v6773_v26 }
 0x944   : > { %5780 = vmatprep.mubr.msk.f32.mxu0 %vm6774_vm1, %v6773_v26  ;;  %5765 = vmatpush3.msra.mxu0 %v4231_v63 }
 0x945   : > { %5766 = vmatprep.subr.mxu0 %v6773_v26  ;;  %5758 = vmatpush3.msra.mxu1 %v5189_v25 }
 0x946   : > { %5767 = vmatpush3.msra.mxu0 %v4230_v1  ;;  %5759 = vmatprep.subr.mxu1 %v6773_v26 }
 0x947   : > { %5768 = vmatprep.subr.mxu0 %v6773_v26  ;;  %5760 = vmatpush3.msra.mxu1 %v5188_v12  ;;  %v5210_v12 = vld [vmem:[#allocation44] ss:$0 sm:$0xff] }
 0x948   : > { %5769 = vmatpush3.msra.mxu0 %v4229_v10  ;;  %5783 = vmatprep.subr.mxu1 %v6773_v26  ;;  %v4671_v10 = vld [vmem:[%s7822_s18 + $0x30] sm:$0xff] }
 0x949   : > { %5770 = vmatprep.subr.mxu0 %v6773_v26 }
 0x94a   : > { %5771 = vmatpush3.msra.mxu0 %v4228_v3  ;;  %v4669_v3 = vld [vmem:[%s7822_s18 + $0x20] sm:$0xff] }
 0x94b   : > { %5772 = vmatprep.subr.mxu0 %v6773_v26 }
 0x94c   : > { %5773 = vmatpush3.msra.mxu0 %v4227_v5  ;;  %v4667_v5 = vld [vmem:[%s7822_s18 + $0x10] sm:$0xff] }
 0x94d   : > { %5774 = vmatprep.subr.mxu0 %v6773_v26 }
 0x94e   : > { %5775 = vmatpush3.msra.mxu0 %v4226_v29  ;;  %v4665_v29 = vld [vmem:[%s7822_s18] sm:$0xff] }
 0x94f   : > { %5776 = vmatprep.subr.mxu0 %v6773_v26 }
 0x950   : > { %5777 = vmatpush3.msra.mxu0 %v4225_v7 }
 0x951   : > { %5778 = vmatprep.subr.mxu0 %v6773_v26 }
 0x952   : > { %5779 = vmatpush3.msra.mxu0 %v4224_v37 }
 0x953   : > { %5802 = vmatprep.subr.mxu0 %v6773_v26 }
 0x9f3   : > { %v4050_v59 = vpop.f32.mrf.mxu0 }
 0x9f4   : > { %v4123_v8 = vpop.f32.mrf.mxu1 }
 0x9f5   : > { %v5706_v32 = vpop.f32.mrf.mxu0  ;;  %v4124_v13 = vadd.f32 %v4123_v8, %v4050_v59 }
 0x9f6   : > { %v5725_v11 = vpop.f32.mrf.mxu1 }
 0xa03   : > { %v4206_v33 = vpop.f32.mrf.mxu0 }
 0xa04   : > { %v4210_v38 = vadd.f32 %v4206_v33, %v4124_v13 }
 0xa05   : > { %v5744_v54 = vpop.f32.mrf.mxu0 }
 0xa06   : > { %v4218_v14 = vadd.f32 %v5187_v58, %v4210_v38  ;;  %v4673_v54 = vld [vmem:[#allocation45] sm:$0x1] }
 0xa08   : > { %v4219_v15 = vmax.f32 %v4218_v14, 0.0 }
 0xa0a   : > { %4222 = vst.msk [vmem:[#allocation12 + $0x1] sm:$0x7] %vm3960_vm11, %v4219_v15 }
 0xa11   : > { %v4232_v17 = vld [vmem:[#allocation12 + $0x1] sm:$0x7] }
 0xa12   : > { %v4223_v27 = vld [vmem:[#allocation12] sm:$0x7]  ;;  %5762 = vmatmul.mubr.msk.f32.vlgmr.msra.gmra.mxu1 %vm3540_vm10, %v4232_v17 }
 0xa13   : > { %5781 = vmatmul.mubr.msk.f32.vlgmr.msra.gmra.mxu0 %vm3540_vm10, %v4223_v27  ;;  %5784 = vmatpush3.msra.mxu1 %v5205_v52  ;;  %v4388_v50 = vld [vmem:[#allocation12 + $0x2] sm:$0x7] }
 0xa14   : > { %5799 = vmatprep.mubr.msk.f32.mxu1 %vm6774_vm1, %v6773_v26  ;;  %5785 = vmatprep.subr.mxu1 %v6773_v26 }
 0xa15   : > { %5818 = vmatprep.mubr.msk.f32.mxu0 %vm6774_vm1, %v6773_v26  ;;  %5786 = vmatpush3.msra.mxu1 %v5204_v41  ;;  %v4753_v41 = vld [vmem:[#allocation47] sm:$0x1] }
 0xa16   : > { %5787 = vmatprep.subr.mxu1 %v6773_v26  ;;  %5803 = vmatpush3.msra.mxu0 %v4503_v28 }
 0xa17   : > { %5788 = vmatpush3.msra.mxu1 %v5203_v36  ;;  %5804 = vmatprep.subr.mxu0 %v6773_v26 }
 0xa18   : > { %5789 = vmatprep.subr.mxu1 %v6773_v26  ;;  %5805 = vmatpush3.msra.mxu0 %v4502_v51 }
 0xa19   : > { %5790 = vmatpush3.msra.mxu1 %v5202_v18  ;;  %5806 = vmatprep.subr.mxu0 %v6773_v26 }
 0xa1a   : > { %5791 = vmatprep.subr.mxu1 %v6773_v26  ;;  %5807 = vmatpush3.msra.mxu0 %v4501_v40 }
 0xa1b   : > { %5792 = vmatpush3.msra.mxu1 %v5201_v30  ;;  %5808 = vmatprep.subr.mxu0 %v6773_v26 }
 0xa1c   : > { %5793 = vmatprep.subr.mxu1 %v6773_v26  ;;  %5809 = vmatpush3.msra.mxu0 %v4500_v43 }
 0xa1d   : > { %5794 = vmatpush3.msra.mxu1 %v5200_v19  ;;  %5810 = vmatprep.subr.mxu0 %v6773_v26  ;;  %v4758_v19 = vld [vmem:[#allocation15] sm:$0x1] }
 0xa1e   : > { %5795 = vmatprep.subr.mxu1 %v6773_v26  ;;  %5811 = vmatpush3.msra.mxu0 %v4499_v47 }
 0xa1f   : > { %5796 = vmatpush3.msra.mxu1 %v5199_v23  ;;  %5812 = vmatprep.subr.mxu0 %v6773_v26 }
 0xa20   : > { %5797 = vmatprep.subr.mxu1 %v6773_v26  ;;  %5813 = vmatpush3.msra.mxu0 %v4498_v39 }
 0xa21   : > { %5798 = vmatpush3.msra.mxu1 %v5198_v42  ;;  %5814 = vmatprep.subr.mxu0 %v6773_v26 }
 0xa22   : > { %5800 = vmatmul.mubr.msk.f32.vlgmr.msra.gmra.mxu1 %vm3540_vm10, %v4388_v50  ;;  %5821 = vmatprep.subr.mxu1 %v6773_v26 }
 0xa23   : > { %5837 = vmatprep.mubr.msk.f32.mxu1 %vm6774_vm1, %v6773_v26  ;;  %5822 = vmatpush3.msra.mxu1 %v4492_v31 }
 0xa24   : > { %5823 = vmatprep.subr.mxu1 %v6773_v26  ;;  %5815 = vmatpush3.msra.mxu0 %v4497_v48 }
 0xa25   : > { %5824 = vmatpush3.msra.mxu1 %v4491_v35  ;;  %5816 = vmatprep.subr.mxu0 %v6773_v26 }
 0xa26   : > { %5825 = vmatprep.subr.mxu1 %v6773_v26  ;;  %5817 = vmatpush3.msra.mxu0 %v4496_v56 }
 0xa27   : > { %5826 = vmatpush3.msra.mxu1 %v4490_v20  ;;  %5840 = vmatprep.subr.mxu0 %v6773_v26 }
 0xa28   : > { %5827 = vmatprep.subr.mxu1 %v6773_v26 }
 0xa29   : > { %5828 = vmatpush3.msra.mxu1 %v4489_v34 }
 0xa2a   : > { %5829 = vmatprep.subr.mxu1 %v6773_v26 }
 0xa2b   : > { %5830 = vmatpush3.msra.mxu1 %v4488_v49 }
 0xa2c   : > { %5831 = vmatprep.subr.mxu1 %v6773_v26 }
 0xa2d   : > { %5832 = vmatpush3.msra.mxu1 %v4487_v24 }
 0xa2e   : > { %5833 = vmatprep.subr.mxu1 %v6773_v26 }
 0xa2f   : > { %5834 = vmatpush3.msra.mxu1 %v4486_v53 }
 0xa30   : > { %5835 = vmatprep.subr.mxu1 %v6773_v26 }
 0xa31   : > { %5836 = vmatpush3.msra.mxu1 %v4485_v9 }
 0xad2   : > { %v4311_v55 = vpop.f32.mrf.mxu1 }
 0xad3   : > { %v4384_v44 = vpop.f32.mrf.mxu0 }
 0xad4   : > { %v5763_v45 = vpop.f32.mrf.mxu1  ;;  %v4385_v57 = vadd.f32 %v4384_v44, %v4311_v55 }
 0xad5   : > { %v5782_v62 = vpop.f32.mrf.mxu0 }
 0xae2   : > { %v4467_v60 = vpop.f32.mrf.mxu1 }
 0xae3   : > { %v4471_v16 = vadd.f32 %v4467_v60, %v4385_v57 }
 0xae4   : > { %v5801_v61 = vpop.f32.mrf.mxu1 }
 0xae5   : > { %v4479_v46 = vadd.f32 %v5207_v4, %v4471_v16 }
 0xae7   : > { %v4480_v63 = vmax.f32 %v4479_v46, 0.0 }
 0xae9   : > { %4483 = vst.msk [vmem:[#allocation13 + $0x1] sm:$0x7] %vm3960_vm11, %v4480_v63 }
 0xaf0   : > { %v4494_v0 = vld [vmem:[#allocation13 + $0x1] ss:$2 sm:$0x3]  ;;  %v4484_v1 = vld [vmem:[#allocation13] ss:$2 sm:$0x3] }
 0xaf1   : > { %5819 = vmatmul.mubr.msk.f32.vlgmr.msra.gmra.mxu0 %vm3540_vm10, %v4494_v0  ;;  %5838 = vmatmul.mubr.msk.f32.vlgmr.msra.gmra.mxu1 %vm3540_vm10, %v4484_v1 }
 0xaf2   : > { %5856 = vmatprep.mubr.msk.f32.mxu0 %vm6774_vm1, %v6773_v26  ;;  %5841 = vmatpush3.msra.mxu0 %v4672_v21 }
 0xaf3   : > { %5842 = vmatprep.subr.mxu0 %v6773_v26 }
 0xaf4   : > { %5843 = vmatpush3.msra.mxu0 %v4671_v10 }
 0xaf5   : > { %5844 = vmatprep.subr.mxu0 %v6773_v26 }
 0xaf6   : > { %5845 = vmatpush3.msra.mxu0 %v4670_v2 }
 0xaf7   : > { %5846 = vmatprep.subr.mxu0 %v6773_v26 }
 0xaf8   : > { %5847 = vmatpush3.msra.mxu0 %v4669_v3 }
 0xaf9   : > { %5848 = vmatprep.subr.mxu0 %v6773_v26 }
 0xafa   : > { %5849 = vmatpush3.msra.mxu0 %v4668_v22 }
 0xafb   : > { %5850 = vmatprep.subr.mxu0 %v6773_v26 }
 0xafc   : > { %5851 = vmatpush3.msra.mxu0 %v4667_v5 }
 0xafd   : > { %5852 = vmatprep.subr.mxu0 %v6773_v26 }
 0xafe   : > { %5853 = vmatpush3.msra.mxu0 %v4666_v6 }
 0xaff   : > { %5854 = vmatprep.subr.mxu0 %v6773_v26 }
 0xb00   : > { %5855 = vmatpush3.msra.mxu0 %v4665_v29 }
 0xbb1   : > { %v4573_v25 = vpop.f32.mrf.mxu0  ;;  %v4646_v7 = vpop.f32.mrf.mxu1 }
 0xbb2   : > { %v4647_v37 = vadd.f32 %v4646_v7, %v4573_v25 }
 0xbb3   : > { %v5820_v59 = vpop.f32.mrf.mxu0  ;;  %v5839_v8 = vpop.f32.mrf.mxu1 }
 0xbb4   : > { %v4657_v32 = vadd.f32 %v5210_v12, %v4647_v37 }
 0xbb6   : > { %v4658_v11 = vmax.f32 %v4657_v32, 0.0 }
 0xbb8   : > { %4660 = vst.msk [vmem:[#allocation14] sm:$0x3] %vm4659_vm12, %v4658_v11 }
 0xbbf   : > { %v4661_v13 = vld [vmem:[#allocation14] sm:$0x1]  ;;  %v4662_v33 = vld [vmem:[#allocation14 + $0x1] sm:$0x1] }
 0xbc0   : > { %v4663_v58 = vadd.f32 %v4662_v33, %v4661_v13 }
 0xbc2   : > { %v4664_v38 = vmul.f32 0.5, %v4663_v58 }
 0xbc4   : > { %5857 = vmatmul.mubr.msk.f32.vlgmr.msra.gmra.mxu0 %vm3540_vm10, %v4664_v38 }
 0xc84   : > { %v4743_v14 = vpop.f32.mrf.mxu0 }
 0xc85   : > { %v4744_v26 = vadd.f32 %v4743_v14, %v4673_v54 }
 0xc86   : > { %v5858_v15 = vpop.f32.mrf.mxu0 }
 0xc87   : > { %v5212_v52 = vmul.f32 -1.442695, %v4744_v26 }
 0xc89   : > { %6116 = vpow2.f32 %v5212_v52 }
 0xc96   : > { %v6117_v17 = vpop.eup %6116 }
 0xc97   : > { %v4750_v27 = vadd.f32 1.0, %v6117_v17 }
 0xc99   : > { %6118 = vrcp.f32 %v4750_v27 }
 0xca6   : > { %v6119_v36 = vpop.eup %6118 }
 0xca7   : > { %v4754_v18 = vmul.f32 %v6119_v36, %v4753_v41 }
 0xca9   : > { %v4755_v30 = vsel %vm1950_vm2, %v4754_v18, 0.0 }
 0xcaa   : > { %4756 = vadd.xlane.f32.xlu0 %v4755_v30 }
 0xd33   : > { %v4757_v23 = vpop.xlane.xlu0 %4756 }
 0xd34   : > { %v4759_v42 = vadd.f32 %v4758_v19, %v4757_v23 }
 0xd36   : > { %v4760_v50 = vmax.f32 %v4759_v42, 0.0 }
 0xd38   : > { %v4761_v28 = vmin.f32 %v4760_v50, 1.0 }
 0xd3a   : > { %4763 = vst.msk [vmem:[%s1179_s22] sm:$0x1] %vm4762_vm13, %v4761_v28 }
 0xd3b PF: > { %s82_s7 = sadd.s32 1, %s6716_s7  }
 0xd3c   : > { %p79_p12 = scmp.ge.s32.totalorder %s82_s7, 4  }
 0xd3e   :  { %81 = sbr.rel (!%p79_p12) target bundleno = 62 (0x3e), region = 390 }
 0xd43   :  { %4781 = vsyncpa [#allocation17], 1 }
 0xd44   :  { %4783 = vsyncpa [#allocation17 + $0x1], 1 }
 0xd45   :  { %4784 = vsyncpa [#allocation19], 1 }
 0xd46   :  { %4785 = vsyncpa [#allocation22], 1 }
 0xd47   :  { %4786 = vsyncpa [#allocation25], 1 }
 0xd48   :  { %4787 = vsyncpa [#allocation28], 1 }
 0xd49   :  { %4788 = vsyncpa [#allocation31], 1 }
 0xd4a   :  { %4789 = vsyncpa [#allocation34], 1 }
 0xd4b   :  { %4790 = vsyncpa [#allocation37], 1 }
 0xd4c   :  { %4791 = vsyncpa [#allocation40], 1 }
 0xd4d   :  { %4792 = vsyncpa [#allocation43], 1 }
 0xd4e   :  { %4793 = vsyncpa [#allocation46], 1 }

</bundles_post_ra>
